<compile_context>
chip_gen: v7x
topology: tpu7x:2x2x1
jax: 0.10.0
libtpu: 0.0.40
codegen_flags: <defaults>
</compile_context>

<pallas_src>
from functools import partial

import jax
import jax.numpy as jnp
from jax import lax
from jax.experimental import pallas as pl
from jax.experimental.pallas import tpu as pltpu

EPS = 1e-5


def _round_up(x, m):
    return ((x + m - 1) // m) * m


# ---------------------------------------------------------------------------
# Pallas kernels: K-tiled matmul, accumulate in f32 scratch, fuse
# bias (+ residual) + optional ReLU into the last K step.
# ---------------------------------------------------------------------------
def _mm_bias_act_kernel(x_ref, w_ref, b_ref, o_ref, acc_ref, *, relu):
    k = pl.program_id(2)

    @pl.when(k == 0)
    def _init():
        acc_ref[...] = jnp.zeros_like(acc_ref)

    acc_ref[...] += jnp.dot(x_ref[...], w_ref[...],
                            preferred_element_type=jnp.float32)

    @pl.when(k == pl.num_programs(2) - 1)
    def _finalize():
        y = acc_ref[...] + b_ref[...]
        if relu:
            y = jnp.maximum(y, 0.0)
        o_ref[...] = y.astype(o_ref.dtype)


def _mm_bias_res_act_kernel(x_ref, w_ref, b_ref, r_ref, o_ref, acc_ref, *, relu):
    k = pl.program_id(2)

    @pl.when(k == 0)
    def _init():
        acc_ref[...] = jnp.zeros_like(acc_ref)

    acc_ref[...] += jnp.dot(x_ref[...], w_ref[...],
                            preferred_element_type=jnp.float32)

    @pl.when(k == pl.num_programs(2) - 1)
    def _finalize():
        y = acc_ref[...] + b_ref[...] + r_ref[...].astype(jnp.float32)
        if relu:
            y = jnp.maximum(y, 0.0)
        o_ref[...] = y.astype(o_ref.dtype)


def fused_matmul_bias_act(x2d, wmat, bias, *, relu, residual=None,
                          row_tile=512, cout_tile=512, k_tile=512,
                          compute_dtype=None, out_dtype=None):
    """out = act(x2d @ wmat + bias [+ residual]); wmat already has BN scale folded.

    x2d: (R, K), wmat: (K, C), bias: (C,), residual: (R, C) or None.
    """
    R, K = x2d.shape
    Kw, C = wmat.shape
    assert Kw == K
    out_dtype = out_dtype or x2d.dtype

    # Lane-dense output: Cout padded to a multiple of 128, tiled at <= cout_tile.
    cn = min(cout_tile, _round_up(C, 128))
    Cp = _round_up(C, cn)
    # Row tile: multiple of 8, capped at row_tile; pad rows instead of asserting.
    rm = min(row_tile, _round_up(R, 8))
    Rp = _round_up(R, rm)
    # K tile: full K when it fits, otherwise 512-wide reduction steps (zero-padded).
    if K <= k_tile:
        tk, Kp = K, K
    else:
        tk = k_tile
        Kp = _round_up(K, tk)

    def _pad2(a, rpad, cpad):
        if rpad == 0 and cpad == 0:
            return a
        return jnp.pad(a, ((0, rpad), (0, cpad)))

    x_p = _pad2(x2d, Rp - R, Kp - K)
    w_p = _pad2(wmat, Kp - K, Cp - C)
    b_p = _pad2(bias.reshape(1, C), 0, Cp - C)

    if compute_dtype is not None and compute_dtype != x_p.dtype:
        # Optional bf16 path (v6e/v7x): halves HBM bytes, f32 MXU accumulation kept.
        x_p = x_p.astype(compute_dtype)
        w_p = w_p.astype(compute_dtype)

    in_specs = [
        pl.BlockSpec((rm, tk), lambda i, j, k: (i, k)),
        pl.BlockSpec((tk, cn), lambda i, j, k: (k, j)),
        pl.BlockSpec((1, cn), lambda i, j, k: (0, j)),
    ]
    args = [x_p, w_p, b_p]
    if residual is not None:
        r_p = _pad2(residual, Rp - R, Cp - C)
        in_specs.append(pl.BlockSpec((rm, cn), lambda i, j, k: (i, j)))
        args.append(r_p)
        kernel = partial(_mm_bias_res_act_kernel, relu=relu)
    else:
        kernel = partial(_mm_bias_act_kernel, relu=relu)

    out = pl.pallas_call(
        kernel,
        out_shape=jax.ShapeDtypeStruct((Rp, Cp), out_dtype),
        grid_spec=pltpu.PrefetchScalarGridSpec(
            num_scalar_prefetch=0,
            grid=(Rp // rm, Cp // cn, Kp // tk),
            in_specs=in_specs,
            out_specs=pl.BlockSpec((rm, cn), lambda i, j, k: (i, j)),
            scratch_shapes=[pltpu.VMEM((rm, cn), jnp.float32)],
        ),
        compiler_params=pltpu.CompilerParams(
            dimension_semantics=("parallel", "parallel", "arbitrary"),
            vmem_limit_bytes=48 * 1024 * 1024,
        ),
    )(*args)

    if Rp != R or Cp != C:
        out = out[:R, :C]
    return out


# ---------------------------------------------------------------------------
# Conv (1x1 / 3x3, padding=k//2, no bias) + eval-BN + optional residual + ReLU
# Activations are NHWC throughout.
# ---------------------------------------------------------------------------
def _fold_bn(p, eps):
    scale = p["gamma"] / jnp.sqrt(p["var"] + eps)
    bias = p["beta"] - p["mean"] * scale
    return scale, bias


def conv_bn_act(x_nhwc, p, *, stride=1, relu=True, residual=None, eps=EPS):
    w = p["w"]  # (Cout, Cin, k, k)
    cout, cin, kh, kw = w.shape
    scale, bias = _fold_bn(p, eps)
    n, h, wd, c = x_nhwc.shape
    assert c == cin

    if kh == 1:
        # 1x1 conv: stride is just a spatial slice, then a per-pixel matmul.
        if stride > 1:
            x_nhwc = x_nhwc[:, ::stride, ::stride, :]
        ho, wo = x_nhwc.shape[1], x_nhwc.shape[2]
        x2d = x_nhwc.reshape(n * ho * wo, cin)
        wmat = w.reshape(cout, cin).T                      # (Cin, Cout)
    else:
        # 3x3 conv, padding 1: im2col then matmul.  K ordered (kh, kw, cin).
        xp = jnp.pad(x_nhwc, ((0, 0), (1, 1), (1, 1), (0, 0)))
        ho = (h + 2 - kh) // stride + 1
        wo = (wd + 2 - kw) // stride + 1
        cols = []
        for dh in range(kh):
            for dw in range(kw):
                cols.append(xp[:, dh:dh + stride * (ho - 1) + 1:stride,
                               dw:dw + stride * (wo - 1) + 1:stride, :])
        x2d = jnp.concatenate(cols, axis=-1).reshape(n * ho * wo, kh * kw * cin)
        wmat = jnp.transpose(w, (2, 3, 1, 0)).reshape(kh * kw * cin, cout)

    wmat = wmat * scale[None, :]                            # fold BN scale into W
    res2d = None if residual is None else residual.reshape(-1, cout)
    out2d = fused_matmul_bias_act(x2d, wmat, bias, relu=relu, residual=res2d)
    return out2d.reshape(n, ho, wo, cout)


# ---------------------------------------------------------------------------
# Residual layers / stages / encoder forward (NHWC internal)
# ---------------------------------------------------------------------------
def _bottleneck_fwd(x, p, eps):
    if p["shortcut"] is not None:
        residual = conv_bn_act(x, p["shortcut"], stride=p["stride"], relu=False, eps=eps)
    else:
        residual = x
    h = conv_bn_act(x, p["conv0"], stride=p["stride0"], relu=True, eps=eps)
    h = conv_bn_act(h, p["conv1"], stride=p["stride1"], relu=True, eps=eps)
    # last 1x1 conv + BN + residual add + final ReLU fused in one Pallas call
    return conv_bn_act(h, p["conv2"], stride=1, relu=True, residual=residual, eps=eps)


def _basic_fwd(x, p, eps):
    if p["shortcut"] is not None:
        residual = conv_bn_act(x, p["shortcut"], stride=p["stride"], relu=False, eps=eps)
    else:
        residual = x
    h = conv_bn_act(x, p["conv0"], stride=p["stride"], relu=True, eps=eps)
    # last 3x3 conv + BN + residual add + final ReLU fused in one Pallas call
    return conv_bn_act(h, p["conv1"], stride=1, relu=True, residual=residual, eps=eps)


def resnet_encoder_forward(x_nchw, params, *, output_hidden_states=False, eps=EPS):
    """Matches ResNetEncoder.forward (eval-mode BN).  Returns last_hidden_state
    in NCHW (and the tuple of hidden_states if requested); the
    BaseModelOutputWithNoAttention wrapper is just a container and is omitted."""
    h = jnp.transpose(x_nchw, (0, 2, 3, 1))                 # single NCHW->NHWC
    hidden_states = [] if output_hidden_states else None
    for stage in params["stages"]:
        if output_hidden_states:
            hidden_states.append(jnp.transpose(h, (0, 3, 1, 2)))
        for layer in stage["layers"]:
            if layer["type"] == "bottleneck":
                h = _bottleneck_fwd(h, layer, eps)
            else:
                h = _basic_fwd(h, layer, eps)
    last = jnp.transpose(h, (0, 3, 1, 2))                   # single NHWC->NCHW
    if output_hidden_states:
        hidden_states.append(last)
        return last, tuple(hidden_states)
    return last


# ---------------------------------------------------------------------------
# Parameter initialization (mirrors the PyTorch module structure)
# ---------------------------------------------------------------------------
def _init_conv_bn(key, cin, cout, k):
    kw, kg, kb, km, kv = jax.random.split(key, 5)
    return dict(
        w=jax.random.normal(kw, (cout, cin, k, k), jnp.float32) * 0.1,
        gamma=jax.random.uniform(kg, (cout,), jnp.float32, 0.5, 1.5),
        beta=jax.random.normal(kb, (cout,), jnp.float32) * 0.1,
        mean=jax.random.normal(km, (cout,), jnp.float32) * 0.1,
        var=jax.random.uniform(kv, (cout,), jnp.float32, 0.5, 1.5),
    )


def _init_bottleneck(key, cin, cout, stride, reduction=4, downsample_in_bottleneck=False):
    k0, k1, k2, k3 = jax.random.split(key, 4)
    red = cout // reduction
    need_sc = (cin != cout) or (stride != 1)
    return dict(
        type="bottleneck",
        shortcut=_init_conv_bn(k0, cin, cout, 1) if need_sc else None,
        conv0=_init_conv_bn(k1, cin, red, 1),
        conv1=_init_conv_bn(k2, red, red, 3),
        conv2=_init_conv_bn(k3, red, cout, 1),
        stride=stride,
        stride0=stride if downsample_in_bottleneck else 1,
        stride1=stride if not downsample_in_bottleneck else 1,
    )


def _init_basic(key, cin, cout, stride):
    k0, k1, k2 = jax.random.split(key, 3)
    need_sc = (cin != cout) or (stride != 1)
    return dict(
        type="basic",
        shortcut=_init_conv_bn(k0, cin, cout, 1) if need_sc else None,
        conv0=_init_conv_bn(k1, cin, cout, 3),
        conv1=_init_conv_bn(k2, cout, cout, 3),
        stride=stride,
    )


def _init_stage(key, config, cin, cout, stride, depth):
    keys = jax.random.split(key, depth)
    if config["layer_type"] == "bottleneck":
        layers = [_init_bottleneck(keys[0], cin, cout, stride,
                                   downsample_in_bottleneck=config["downsample_in_bottleneck"])]
        layers += [_init_bottleneck(k, cout, cout, 1,
                                    downsample_in_bottleneck=config["downsample_in_bottleneck"])
                   for k in keys[1:]]
    else:
        layers = [_init_basic(keys[0], cin, cout, stride)]
        layers += [_init_basic(k, cout, cout, 1) for k in keys[1:]]
    return dict(layers=layers)


def init_resnet_encoder(key, config):
    keys = jax.random.split(key, len(config["hidden_sizes"]))
    stages = [_init_stage(keys[0], config, config["embedding_size"],
                          config["hidden_sizes"][0],
                          2 if config["downsample_in_first_stage"] else 1,
                          config["depths"][0])]
    for k, (cin, cout), depth in zip(keys[1:],
                                     zip(config["hidden_sizes"], config["hidden_sizes"][1:]),
                                     config["depths"][1:]):
        stages.append(_init_stage(k, config, cin, cout, 2, depth))
    return dict(stages=stages)


# ---------------------------------------------------------------------------
# Pure-JAX reference (NCHW, lax.conv) for the correctness check
# ---------------------------------------------------------------------------
def _ref_conv_bn(x, p, stride, relu, eps):
    w = p["w"]
    k = w.shape[2]
    y = lax.conv_general_dilated(
        x, w, window_strides=(stride, stride),
        padding=[(k // 2, k // 2), (k // 2, k // 2)],
        dimension_numbers=("NCHW", "OIHW", "NCHW"),
        precision=lax.Precision.HIGHEST)
    y = (y - p["mean"][None, :, None, None]) * (
        p["gamma"][None, :, None, None] / jnp.sqrt(p["var"][None, :, None, None] + eps))
    y = y + p["beta"][None, :, None, None]
    if relu:
        y = jnp.maximum(y, 0.0)
    return y


def _ref_layer(x, p, eps):
    if p["shortcut"] is not None:
        residual = _ref_conv_bn(x, p["shortcut"], p["stride"], False, eps)
    else:
        residual = x
    if p["type"] == "bottleneck":
        h = _ref_conv_bn(x, p["conv0"], p["stride0"], True, eps)
        h = _ref_conv_bn(h, p["conv1"], p["stride1"], True, eps)
        h = _ref_conv_bn(h, p["conv2"], 1, False, eps)
    else:
        h = _ref_conv_bn(x, p["conv0"], p["stride"], True, eps)
        h = _ref_conv_bn(h, p["conv1"], 1, False, eps)
    return jnp.maximum(h + residual, 0.0)


def _ref_encoder(x, params, eps):
    for stage in params["stages"]:
        for layer in stage["layers"]:
            x = _ref_layer(x, layer, eps)
    return x


# ---------------------------------------------------------------------------
if __name__ == "__main__":
    # Small config consistent with ResNetEncoder (bottleneck layers, 2 stages).
    config = dict(
        embedding_size=8,
        hidden_sizes=[16, 32],
        depths=[2, 2],
        layer_type="bottleneck",
        downsample_in_first_stage=False,
        downsample_in_bottleneck=False,
    )
    N, H, W = 2, 16, 16

    key = jax.random.PRNGKey(0)
    k_x, k_p = jax.random.split(key)
    x = jax.random.normal(k_x, (N, config["embedding_size"], H, W), jnp.float32)
    params = init_resnet_encoder(k_p, config)

    # Jit the whole forward so transposes / im2col glue fuse around the Pallas calls.
    forward_jit = jax.jit(lambda inp: resnet_encoder_forward(inp, params))
    out = forward_jit(x)
    out = jax.block_until_ready(out)

    ref = _ref_encoder(x, params, EPS)
    assert out.shape == ref.shape == (N, config["hidden_sizes"][-1], H // 2, W // 2), out.shape
    max_err = float(jnp.max(jnp.abs(out - ref)))
    assert jnp.allclose(out, ref, atol=1e-3, rtol=1e-3), f"max |err| = {max_err}"

    print("KERNEL_OK")
</pallas_src>

<mosaic_0001>
module attributes {stable_mosaic.version = 11 : i64} {
  func.func @_mm_bias_act_kernel(%arg0: i32, %arg1: i32, %arg2: i32, %arg3: memref<512x8xf32, #tpu.memory_space<vmem>>, %arg4: memref<8x128xf32, #tpu.memory_space<vmem>>, %arg5: memref<1x128xf32, #tpu.memory_space<vmem>>, %arg6: memref<512x128xf32, #tpu.memory_space<vmem>>, %arg7: memref<512x128xf32, #tpu.memory_space<vmem>>) attributes {dimension_semantics = [#tpu.dimension_semantics<parallel>, #tpu.dimension_semantics<parallel>, #tpu.dimension_semantics<arbitrary>], iteration_bounds = array<i64: 1, 1, 1>, scalar_prefetch = 0 : i64, scratch_operands = 1 : i64, tpu.core_type = #tpu.core_type<tc>, window_params = [{transform_indices = @transform_0, window_bounds = array<i64: 512, 8>}, {transform_indices = @transform_1, window_bounds = array<i64: 8, 128>}, {transform_indices = @transform_2, window_bounds = array<i64: 1, 128>}, {transform_indices = @transform_3, window_bounds = array<i64: 512, 128>}]} {
    %c0_i32 = arith.constant 0 : i32
    %0 = arith.cmpi eq, %arg2, %c0_i32 : i32
    %1 = arith.extui %0 : i1 to i32
    %c0_i32_0 = arith.constant 0 : i32
    %2 = arith.cmpi ne, %1, %c0_i32_0 : i32
    scf.if %2 {
      %cst_10 = arith.constant 0.000000e+00 : f32
      %12 = vector.broadcast %cst_10 : f32 to vector<512x128xf32>
      %c0_11 = arith.constant 0 : index
      %c0_12 = arith.constant 0 : index
      %13 = vector.load %arg7[%c0_11, %c0_12] : memref<512x128xf32, #tpu.memory_space<vmem>>, vector<512x128xf32>
      tpu.vector_store %arg7[%c0_11, %c0_12], %12 {strides = array<i32>} : memref<512x128xf32, #tpu.memory_space<vmem>>, vector<512x128xf32>,
    } else {
    }
    %c0 = arith.constant 0 : index
    %c0_1 = arith.constant 0 : index
    %3 = vector.load %arg7[%c0, %c0_1] : memref<512x128xf32, #tpu.memory_space<vmem>>, vector<512x128xf32>
    %c0_2 = arith.constant 0 : index
    %c0_3 = arith.constant 0 : index
    %4 = vector.load %arg3[%c0_2, %c0_3] : memref<512x8xf32, #tpu.memory_space<vmem>>, vector<512x8xf32>
    %c0_4 = arith.constant 0 : index
    %c0_5 = arith.constant 0 : index
    %5 = vector.load %arg4[%c0_4, %c0_5] : memref<8x128xf32, #tpu.memory_space<vmem>>, vector<8x128xf32>
    %cst = arith.constant dense<0.000000e+00> : vector<512x128xf32>
    %6 = tpu.matmul %4, %5, %cst {dimension_numbers = #tpu.dot_dimension_numbers<[1], [0], [0], [1], [0, 0, 1, 1], [], []>} : vector<512x8xf32>, vector<8x128xf32>, vector<512x128xf32> -> vector<512x128xf32>
    %7 = arith.addf %3, %6 : vector<512x128xf32>
    %c0_6 = arith.constant 0 : index
    %c0_7 = arith.constant 0 : index
    %8 = vector.load %arg7[%c0_6, %c0_7] : memref<512x128xf32, #tpu.memory_space<vmem>>, vector<512x128xf32>
    tpu.vector_store %arg7[%c0_6, %c0_7], %7 {strides = array<i32>} : memref<512x128xf32, #tpu.memory_space<vmem>>, vector<512x128xf32>,
    %c0_i32_8 = arith.constant 0 : i32
    %9 = arith.cmpi eq, %arg2, %c0_i32_8 : i32
    %10 = arith.extui %9 : i1 to i32
    %c0_i32_9 = arith.constant 0 : i32
    %11 = arith.cmpi ne, %10, %c0_i32_9 : i32
    scf.if %11 {
      %c0_10 = arith.constant 0 : index
      %c0_11 = arith.constant 0 : index
      %12 = vector.load %arg7[%c0_10, %c0_11] : memref<512x128xf32, #tpu.memory_space<vmem>>, vector<512x128xf32>
      %c0_12 = arith.constant 0 : index
      %c0_13 = arith.constant 0 : index
      %13 = vector.load %arg5[%c0_12, %c0_13] : memref<1x128xf32, #tpu.memory_space<vmem>>, vector<1x128xf32>
      %14 = vector.broadcast %13 : vector<1x128xf32> to vector<512x128xf32>
      %15 = arith.addf %12, %14 : vector<512x128xf32>
      %cst_14 = arith.constant 0.000000e+00 : f32
      %16 = vector.broadcast %cst_14 : f32 to vector<512x128xf32>
      %17 = arith.maximumf %15, %16 : vector<512x128xf32>
      %c0_15 = arith.constant 0 : index
      %c0_16 = arith.constant 0 : index
      %18 = vector.load %arg6[%c0_15, %c0_16] : memref<512x128xf32, #tpu.memory_space<vmem>>, vector<512x128xf32>
      tpu.vector_store %arg6[%c0_15, %c0_16], %17 {strides = array<i32>} : memref<512x128xf32, #tpu.memory_space<vmem>>, vector<512x128xf32>,
    } else {
    }
    return
  }
  func.func @transform_0(%arg0: i32, %arg1: i32, %arg2: i32) -> (i32, i32) {
    %c0_i32 = arith.constant 0 : i32
    return %arg0, %arg2 : i32, i32
  }
  func.func @transform_1(%arg0: i32, %arg1: i32, %arg2: i32) -> (i32, i32) {
    %c0_i32 = arith.constant 0 : i32
    return %arg2, %arg1 : i32, i32
  }
  func.func @transform_2(%arg0: i32, %arg1: i32, %arg2: i32) -> (i32, i32) {
    %c0_i32 = arith.constant 0 : i32
    %c0_i32_0 = arith.constant 0 : i32
    return %c0_i32, %arg1 : i32, i32
  }
  func.func @transform_3(%arg0: i32, %arg1: i32, %arg2: i32) -> (i32, i32) {
    %c0_i32 = arith.constant 0 : i32
    return %arg0, %arg1 : i32, i32
  }
}

module attributes {stable_mosaic.version = 11 : i64} {
  func.func @_mm_bias_act_kernel(%arg0: i32, %arg1: i32, %arg2: i32, %arg3: memref<512x8xf32, #tpu.memory_space<vmem>>, %arg4: memref<8x128xf32, #tpu.memory_space<vmem>>, %arg5: memref<1x128xf32, #tpu.memory_space<vmem>>, %arg6: memref<512x128xf32, #tpu.memory_space<vmem>>, %arg7: memref<512x128xf32, #tpu.memory_space<vmem>>) attributes {dimension_semantics = [#tpu.dimension_semantics<parallel>, #tpu.dimension_semantics<parallel>, #tpu.dimension_semantics<arbitrary>], iteration_bounds = array<i64: 1, 1, 1>, scalar_prefetch = 0 : i64, scratch_operands = 1 : i64, tpu.core_type = #tpu.core_type<tc>, window_params = [{transform_indices = @transform_0, window_bounds = array<i64: 512, 8>}, {transform_indices = @transform_1, window_bounds = array<i64: 8, 128>}, {transform_indices = @transform_2, window_bounds = array<i64: 1, 128>}, {transform_indices = @transform_3, window_bounds = array<i64: 512, 128>}]} {
    %c0_i32 = arith.constant 0 : i32
    %0 = arith.cmpi eq, %arg2, %c0_i32 : i32
    %1 = arith.extui %0 : i1 to i32
    %c0_i32_0 = arith.constant 0 : i32
    %2 = arith.cmpi ne, %1, %c0_i32_0 : i32
    scf.if %2 {
      %cst_10 = arith.constant 0.000000e+00 : f32
      %12 = vector.broadcast %cst_10 : f32 to vector<512x128xf32>
      %c0_11 = arith.constant 0 : index
      %c0_12 = arith.constant 0 : index
      %13 = vector.load %arg7[%c0_11, %c0_12] : memref<512x128xf32, #tpu.memory_space<vmem>>, vector<512x128xf32>
      tpu.vector_store %arg7[%c0_11, %c0_12], %12 {strides = array<i32>} : memref<512x128xf32, #tpu.memory_space<vmem>>, vector<512x128xf32>,
    } else {
    }
    %c0 = arith.constant 0 : index
    %c0_1 = arith.constant 0 : index
    %3 = vector.load %arg7[%c0, %c0_1] : memref<512x128xf32, #tpu.memory_space<vmem>>, vector<512x128xf32>
    %c0_2 = arith.constant 0 : index
    %c0_3 = arith.constant 0 : index
    %4 = vector.load %arg3[%c0_2, %c0_3] : memref<512x8xf32, #tpu.memory_space<vmem>>, vector<512x8xf32>
    %c0_4 = arith.constant 0 : index
    %c0_5 = arith.constant 0 : index
    %5 = vector.load %arg4[%c0_4, %c0_5] : memref<8x128xf32, #tpu.memory_space<vmem>>, vector<8x128xf32>
    %cst = arith.constant dense<0.000000e+00> : vector<512x128xf32>
    %6 = tpu.matmul %4, %5, %cst {dimension_numbers = #tpu.dot_dimension_numbers<[1], [0], [0], [1], [0, 0, 1, 1], [], []>} : vector<512x8xf32>, vector<8x128xf32>, vector<512x128xf32> -> vector<512x128xf32>
    %7 = arith.addf %3, %6 : vector<512x128xf32>
    %c0_6 = arith.constant 0 : index
    %c0_7 = arith.constant 0 : index
    %8 = vector.load %arg7[%c0_6, %c0_7] : memref<512x128xf32, #tpu.memory_space<vmem>>, vector<512x128xf32>
    tpu.vector_store %arg7[%c0_6, %c0_7], %7 {strides = array<i32>} : memref<512x128xf32, #tpu.memory_space<vmem>>, vector<512x128xf32>,
    %c0_i32_8 = arith.constant 0 : i32
    %9 = arith.cmpi eq, %arg2, %c0_i32_8 : i32
    %10 = arith.extui %9 : i1 to i32
    %c0_i32_9 = arith.constant 0 : i32
    %11 = arith.cmpi ne, %10, %c0_i32_9 : i32
    scf.if %11 {
      %c0_10 = arith.constant 0 : index
      %c0_11 = arith.constant 0 : index
      %12 = vector.load %arg7[%c0_10, %c0_11] : memref<512x128xf32, #tpu.memory_space<vmem>>, vector<512x128xf32>
      %c0_12 = arith.constant 0 : index
      %c0_13 = arith.constant 0 : index
      %13 = vector.load %arg5[%c0_12, %c0_13] : memref<1x128xf32, #tpu.memory_space<vmem>>, vector<1x128xf32>
      %14 = vector.broadcast %13 : vector<1x128xf32> to vector<512x128xf32>
      %15 = arith.addf %12, %14 : vector<512x128xf32>
      %c0_14 = arith.constant 0 : index
      %c0_15 = arith.constant 0 : index
      %16 = vector.load %arg6[%c0_14, %c0_15] : memref<512x128xf32, #tpu.memory_space<vmem>>, vector<512x128xf32>
      tpu.vector_store %arg6[%c0_14, %c0_15], %15 {strides = array<i32>} : memref<512x128xf32, #tpu.memory_space<vmem>>, vector<512x128xf32>,
    } else {
    }
    return
  }
  func.func @transform_0(%arg0: i32, %arg1: i32, %arg2: i32) -> (i32, i32) {
    %c0_i32 = arith.constant 0 : i32
    return %arg0, %arg2 : i32, i32
  }
  func.func @transform_1(%arg0: i32, %arg1: i32, %arg2: i32) -> (i32, i32) {
    %c0_i32 = arith.constant 0 : i32
    return %arg2, %arg1 : i32, i32
  }
  func.func @transform_2(%arg0: i32, %arg1: i32, %arg2: i32) -> (i32, i32) {
    %c0_i32 = arith.constant 0 : i32
    %c0_i32_0 = arith.constant 0 : i32
    return %c0_i32, %arg1 : i32, i32
  }
  func.func @transform_3(%arg0: i32, %arg1: i32, %arg2: i32) -> (i32, i32) {
    %c0_i32 = arith.constant 0 : i32
    return %arg0, %arg1 : i32, i32
  }
}

module attributes {stable_mosaic.version = 11 : i64} {
  func.func @_mm_bias_act_kernel(%arg0: i32, %arg1: i32, %arg2: i32, %arg3: memref<512x36xf32, #tpu.memory_space<vmem>>, %arg4: memref<36x128xf32, #tpu.memory_space<vmem>>, %arg5: memref<1x128xf32, #tpu.memory_space<vmem>>, %arg6: memref<512x128xf32, #tpu.memory_space<vmem>>, %arg7: memref<512x128xf32, #tpu.memory_space<vmem>>) attributes {dimension_semantics = [#tpu.dimension_semantics<parallel>, #tpu.dimension_semantics<parallel>, #tpu.dimension_semantics<arbitrary>], iteration_bounds = array<i64: 1, 1, 1>, scalar_prefetch = 0 : i64, scratch_operands = 1 : i64, tpu.core_type = #tpu.core_type<tc>, window_params = [{transform_indices = @transform_0, window_bounds = array<i64: 512, 36>}, {transform_indices = @transform_1, window_bounds = array<i64: 36, 128>}, {transform_indices = @transform_2, window_bounds = array<i64: 1, 128>}, {transform_indices = @transform_3, window_bounds = array<i64: 512, 128>}]} {
    %c0_i32 = arith.constant 0 : i32
    %0 = arith.cmpi eq, %arg2, %c0_i32 : i32
    %1 = arith.extui %0 : i1 to i32
    %c0_i32_0 = arith.constant 0 : i32
    %2 = arith.cmpi ne, %1, %c0_i32_0 : i32
    scf.if %2 {
      %cst_10 = arith.constant 0.000000e+00 : f32
      %12 = vector.broadcast %cst_10 : f32 to vector<512x128xf32>
      %c0_11 = arith.constant 0 : index
      %c0_12 = arith.constant 0 : index
      %13 = vector.load %arg7[%c0_11, %c0_12] : memref<512x128xf32, #tpu.memory_space<vmem>>, vector<512x128xf32>
      tpu.vector_store %arg7[%c0_11, %c0_12], %12 {strides = array<i32>} : memref<512x128xf32, #tpu.memory_space<vmem>>, vector<512x128xf32>,
    } else {
    }
    %c0 = arith.constant 0 : index
    %c0_1 = arith.constant 0 : index
    %3 = vector.load %arg7[%c0, %c0_1] : memref<512x128xf32, #tpu.memory_space<vmem>>, vector<512x128xf32>
    %c0_2 = arith.constant 0 : index
    %c0_3 = arith.constant 0 : index
    %4 = vector.load %arg3[%c0_2, %c0_3] : memref<512x36xf32, #tpu.memory_space<vmem>>, vector<512x36xf32>
    %c0_4 = arith.constant 0 : index
    %c0_5 = arith.constant 0 : index
    %5 = vector.load %arg4[%c0_4, %c0_5] : memref<36x128xf32, #tpu.memory_space<vmem>>, vector<36x128xf32>
    %cst = arith.constant dense<0.000000e+00> : vector<512x128xf32>
    %6 = tpu.matmul %4, %5, %cst {dimension_numbers = #tpu.dot_dimension_numbers<[1], [0], [0], [1], [0, 0, 1, 1], [], []>} : vector<512x36xf32>, vector<36x128xf32>, vector<512x128xf32> -> vector<512x128xf32>
    %7 = arith.addf %3, %6 : vector<512x128xf32>
    %c0_6 = arith.constant 0 : index
    %c0_7 = arith.constant 0 : index
    %8 = vector.load %arg7[%c0_6, %c0_7] : memref<512x128xf32, #tpu.memory_space<vmem>>, vector<512x128xf32>
    tpu.vector_store %arg7[%c0_6, %c0_7], %7 {strides = array<i32>} : memref<512x128xf32, #tpu.memory_space<vmem>>, vector<512x128xf32>,
    %c0_i32_8 = arith.constant 0 : i32
    %9 = arith.cmpi eq, %arg2, %c0_i32_8 : i32
    %10 = arith.extui %9 : i1 to i32
    %c0_i32_9 = arith.constant 0 : i32
    %11 = arith.cmpi ne, %10, %c0_i32_9 : i32
    scf.if %11 {
      %c0_10 = arith.constant 0 : index
      %c0_11 = arith.constant 0 : index
      %12 = vector.load %arg7[%c0_10, %c0_11] : memref<512x128xf32, #tpu.memory_space<vmem>>, vector<512x128xf32>
      %c0_12 = arith.constant 0 : index
      %c0_13 = arith.constant 0 : index
      %13 = vector.load %arg5[%c0_12, %c0_13] : memref<1x128xf32, #tpu.memory_space<vmem>>, vector<1x128xf32>
      %14 = vector.broadcast %13 : vector<1x128xf32> to vector<512x128xf32>
      %15 = arith.addf %12, %14 : vector<512x128xf32>
      %cst_14 = arith.constant 0.000000e+00 : f32
      %16 = vector.broadcast %cst_14 : f32 to vector<512x128xf32>
      %17 = arith.maximumf %15, %16 : vector<512x128xf32>
      %c0_15 = arith.constant 0 : index
      %c0_16 = arith.constant 0 : index
      %18 = vector.load %arg6[%c0_15, %c0_16] : memref<512x128xf32, #tpu.memory_space<vmem>>, vector<512x128xf32>
      tpu.vector_store %arg6[%c0_15, %c0_16], %17 {strides = array<i32>} : memref<512x128xf32, #tpu.memory_space<vmem>>, vector<512x128xf32>,
    } else {
    }
    return
  }
  func.func @transform_0(%arg0: i32, %arg1: i32, %arg2: i32) -> (i32, i32) {
    %c0_i32 = arith.constant 0 : i32
    return %arg0, %arg2 : i32, i32
  }
  func.func @transform_1(%arg0: i32, %arg1: i32, %arg2: i32) -> (i32, i32) {
    %c0_i32 = arith.constant 0 : i32
    return %arg2, %arg1 : i32, i32
  }
  func.func @transform_2(%arg0: i32, %arg1: i32, %arg2: i32) -> (i32, i32) {
    %c0_i32 = arith.constant 0 : i32
    %c0_i32_0 = arith.constant 0 : i32
    return %c0_i32, %arg1 : i32, i32
  }
  func.func @transform_3(%arg0: i32, %arg1: i32, %arg2: i32) -> (i32, i32) {
    %c0_i32 = arith.constant 0 : i32
    return %arg0, %arg1 : i32, i32
  }
}

module attributes {stable_mosaic.version = 11 : i64} {
  func.func @_mm_bias_res_act_kernel(%arg0: i32, %arg1: i32, %arg2: i32, %arg3: memref<512x4xf32, #tpu.memory_space<vmem>>, %arg4: memref<4x128xf32, #tpu.memory_space<vmem>>, %arg5: memref<1x128xf32, #tpu.memory_space<vmem>>, %arg6: memref<512x128xf32, #tpu.memory_space<vmem>>, %arg7: memref<512x128xf32, #tpu.memory_space<vmem>>, %arg8: memref<512x128xf32, #tpu.memory_space<vmem>>) attributes {dimension_semantics = [#tpu.dimension_semantics<parallel>, #tpu.dimension_semantics<parallel>, #tpu.dimension_semantics<arbitrary>], iteration_bounds = array<i64: 1, 1, 1>, scalar_prefetch = 0 : i64, scratch_operands = 1 : i64, tpu.core_type = #tpu.core_type<tc>, window_params = [{transform_indices = @transform_0, window_bounds = array<i64: 512, 4>}, {transform_indices = @transform_1, window_bounds = array<i64: 4, 128>}, {transform_indices = @transform_2, window_bounds = array<i64: 1, 128>}, {transform_indices = @transform_3, window_bounds = array<i64: 512, 128>}, {transform_indices = @transform_4, window_bounds = array<i64: 512, 128>}]} {
    %c0_i32 = arith.constant 0 : i32
    %0 = arith.cmpi eq, %arg2, %c0_i32 : i32
    %1 = arith.extui %0 : i1 to i32
    %c0_i32_0 = arith.constant 0 : i32
    %2 = arith.cmpi ne, %1, %c0_i32_0 : i32
    scf.if %2 {
      %cst_10 = arith.constant 0.000000e+00 : f32
      %12 = vector.broadcast %cst_10 : f32 to vector<512x128xf32>
      %c0_11 = arith.constant 0 : index
      %c0_12 = arith.constant 0 : index
      %13 = vector.load %arg8[%c0_11, %c0_12] : memref<512x128xf32, #tpu.memory_space<vmem>>, vector<512x128xf32>
      tpu.vector_store %arg8[%c0_11, %c0_12], %12 {strides = array<i32>} : memref<512x128xf32, #tpu.memory_space<vmem>>, vector<512x128xf32>,
    } else {
    }
    %c0 = arith.constant 0 : index
    %c0_1 = arith.constant 0 : index
    %3 = vector.load %arg8[%c0, %c0_1] : memref<512x128xf32, #tpu.memory_space<vmem>>, vector<512x128xf32>
    %c0_2 = arith.constant 0 : index
    %c0_3 = arith.constant 0 : index
    %4 = vector.load %arg3[%c0_2, %c0_3] : memref<512x4xf32, #tpu.memory_space<vmem>>, vector<512x4xf32>
    %c0_4 = arith.constant 0 : index
    %c0_5 = arith.constant 0 : index
    %5 = vector.load %arg4[%c0_4, %c0_5] : memref<4x128xf32, #tpu.memory_space<vmem>>, vector<4x128xf32>
    %cst = arith.constant dense<0.000000e+00> : vector<512x128xf32>
    %6 = tpu.matmul %4, %5, %cst {dimension_numbers = #tpu.dot_dimension_numbers<[1], [0], [0], [1], [0, 0, 1, 1], [], []>} : vector<512x4xf32>, vector<4x128xf32>, vector<512x128xf32> -> vector<512x128xf32>
    %7 = arith.addf %3, %6 : vector<512x128xf32>
    %c0_6 = arith.constant 0 : index
    %c0_7 = arith.constant 0 : index
    %8 = vector.load %arg8[%c0_6, %c0_7] : memref<512x128xf32, #tpu.memory_space<vmem>>, vector<512x128xf32>
    tpu.vector_store %arg8[%c0_6, %c0_7], %7 {strides = array<i32>} : memref<512x128xf32, #tpu.memory_space<vmem>>, vector<512x128xf32>,
    %c0_i32_8 = arith.constant 0 : i32
    %9 = arith.cmpi eq, %arg2, %c0_i32_8 : i32
    %10 = arith.extui %9 : i1 to i32
    %c0_i32_9 = arith.constant 0 : i32
    %11 = arith.cmpi ne, %10, %c0_i32_9 : i32
    scf.if %11 {
      %c0_10 = arith.constant 0 : index
      %c0_11 = arith.constant 0 : index
      %12 = vector.load %arg8[%c0_10, %c0_11] : memref<512x128xf32, #tpu.memory_space<vmem>>, vector<512x128xf32>
      %c0_12 = arith.constant 0 : index
      %c0_13 = arith.constant 0 : index
      %13 = vector.load %arg5[%c0_12, %c0_13] : memref<1x128xf32, #tpu.memory_space<vmem>>, vector<1x128xf32>
      %14 = vector.broadcast %13 : vector<1x128xf32> to vector<512x128xf32>
      %15 = arith.addf %12, %14 : vector<512x128xf32>
      %c0_14 = arith.constant 0 : index
      %c0_15 = arith.constant 0 : index
      %16 = vector.load %arg6[%c0_14, %c0_15] : memref<512x128xf32, #tpu.memory_space<vmem>>, vector<512x128xf32>
      %17 = arith.addf %15, %16 : vector<512x128xf32>
      %cst_16 = arith.constant 0.000000e+00 : f32
      %18 = vector.broadcast %cst_16 : f32 to vector<512x128xf32>
      %19 = arith.maximumf %17, %18 : vector<512x128xf32>
      %c0_17 = arith.constant 0 : index
      %c0_18 = arith.constant 0 : index
      %20 = vector.load %arg7[%c0_17, %c0_18] : memref<512x128xf32, #tpu.memory_space<vmem>>, vector<512x128xf32>
      tpu.vector_store %arg7[%c0_17, %c0_18], %19 {strides = array<i32>} : memref<512x128xf32, #tpu.memory_space<vmem>>, vector<512x128xf32>,
    } else {
    }
    return
  }
  func.func @transform_0(%arg0: i32, %arg1: i32, %arg2: i32) -> (i32, i32) {
    %c0_i32 = arith.constant 0 : i32
    return %arg0, %arg2 : i32, i32
  }
  func.func @transform_1(%arg0: i32, %arg1: i32, %arg2: i32) -> (i32, i32) {
    %c0_i32 = arith.constant 0 : i32
    return %arg2, %arg1 : i32, i32
  }
  func.func @transform_2(%arg0: i32, %arg1: i32, %arg2: i32) -> (i32, i32) {
    %c0_i32 = arith.constant 0 : i32
    %c0_i32_0 = arith.constant 0 : i32
    return %c0_i32, %arg1 : i32, i32
  }
  func.func @transform_3(%arg0: i32, %arg1: i32, %arg2: i32) -> (i32, i32) {
    %c0_i32 = arith.constant 0 : i32
    return %arg0, %arg1 : i32, i32
  }
  func.func @transform_4(%arg0: i32, %arg1: i32, %arg2: i32) -> (i32, i32) {
    %c0_i32 = arith.constant 0 : i32
    return %arg0, %arg1 : i32, i32
  }
}

module attributes {stable_mosaic.version = 11 : i64} {
  func.func @_mm_bias_act_kernel(%arg0: i32, %arg1: i32, %arg2: i32, %arg3: memref<512x16xf32, #tpu.memory_space<vmem>>, %arg4: memref<16x128xf32, #tpu.memory_space<vmem>>, %arg5: memref<1x128xf32, #tpu.memory_space<vmem>>, %arg6: memref<512x128xf32, #tpu.memory_space<vmem>>, %arg7: memref<512x128xf32, #tpu.memory_space<vmem>>) attributes {dimension_semantics = [#tpu.dimension_semantics<parallel>, #tpu.dimension_semantics<parallel>, #tpu.dimension_semantics<arbitrary>], iteration_bounds = array<i64: 1, 1, 1>, scalar_prefetch = 0 : i64, scratch_operands = 1 : i64, tpu.core_type = #tpu.core_type<tc>, window_params = [{transform_indices = @transform_0, window_bounds = array<i64: 512, 16>}, {transform_indices = @transform_1, window_bounds = array<i64: 16, 128>}, {transform_indices = @transform_2, window_bounds = array<i64: 1, 128>}, {transform_indices = @transform_3, window_bounds = array<i64: 512, 128>}]} {
    %c0_i32 = arith.constant 0 : i32
    %0 = arith.cmpi eq, %arg2, %c0_i32 : i32
    %1 = arith.extui %0 : i1 to i32
    %c0_i32_0 = arith.constant 0 : i32
    %2 = arith.cmpi ne, %1, %c0_i32_0 : i32
    scf.if %2 {
      %cst_10 = arith.constant 0.000000e+00 : f32
      %12 = vector.broadcast %cst_10 : f32 to vector<512x128xf32>
      %c0_11 = arith.constant 0 : index
      %c0_12 = arith.constant 0 : index
      %13 = vector.load %arg7[%c0_11, %c0_12] : memref<512x128xf32, #tpu.memory_space<vmem>>, vector<512x128xf32>
      tpu.vector_store %arg7[%c0_11, %c0_12], %12 {strides = array<i32>} : memref<512x128xf32, #tpu.memory_space<vmem>>, vector<512x128xf32>,
    } else {
    }
    %c0 = arith.constant 0 : index
    %c0_1 = arith.constant 0 : index
    %3 = vector.load %arg7[%c0, %c0_1] : memref<512x128xf32, #tpu.memory_space<vmem>>, vector<512x128xf32>
    %c0_2 = arith.constant 0 : index
    %c0_3 = arith.constant 0 : index
    %4 = vector.load %arg3[%c0_2, %c0_3] : memref<512x16xf32, #tpu.memory_space<vmem>>, vector<512x16xf32>
    %c0_4 = arith.constant 0 : index
    %c0_5 = arith.constant 0 : index
    %5 = vector.load %arg4[%c0_4, %c0_5] : memref<16x128xf32, #tpu.memory_space<vmem>>, vector<16x128xf32>
    %cst = arith.constant dense<0.000000e+00> : vector<512x128xf32>
    %6 = tpu.matmul %4, %5, %cst {dimension_numbers = #tpu.dot_dimension_numbers<[1], [0], [0], [1], [0, 0, 1, 1], [], []>} : vector<512x16xf32>, vector<16x128xf32>, vector<512x128xf32> -> vector<512x128xf32>
    %7 = arith.addf %3, %6 : vector<512x128xf32>
    %c0_6 = arith.constant 0 : index
    %c0_7 = arith.constant 0 : index
    %8 = vector.load %arg7[%c0_6, %c0_7] : memref<512x128xf32, #tpu.memory_space<vmem>>, vector<512x128xf32>
    tpu.vector_store %arg7[%c0_6, %c0_7], %7 {strides = array<i32>} : memref<512x128xf32, #tpu.memory_space<vmem>>, vector<512x128xf32>,
    %c0_i32_8 = arith.constant 0 : i32
    %9 = arith.cmpi eq, %arg2, %c0_i32_8 : i32
    %10 = arith.extui %9 : i1 to i32
    %c0_i32_9 = arith.constant 0 : i32
    %11 = arith.cmpi ne, %10, %c0_i32_9 : i32
    scf.if %11 {
      %c0_10 = arith.constant 0 : index
      %c0_11 = arith.constant 0 : index
      %12 = vector.load %arg7[%c0_10, %c0_11] : memref<512x128xf32, #tpu.memory_space<vmem>>, vector<512x128xf32>
      %c0_12 = arith.constant 0 : index
      %c0_13 = arith.constant 0 : index
      %13 = vector.load %arg5[%c0_12, %c0_13] : memref<1x128xf32, #tpu.memory_space<vmem>>, vector<1x128xf32>
      %14 = vector.broadcast %13 : vector<1x128xf32> to vector<512x128xf32>
      %15 = arith.addf %12, %14 : vector<512x128xf32>
      %cst_14 = arith.constant 0.000000e+00 : f32
      %16 = vector.broadcast %cst_14 : f32 to vector<512x128xf32>
      %17 = arith.maximumf %15, %16 : vector<512x128xf32>
      %c0_15 = arith.constant 0 : index
      %c0_16 = arith.constant 0 : index
      %18 = vector.load %arg6[%c0_15, %c0_16] : memref<512x128xf32, #tpu.memory_space<vmem>>, vector<512x128xf32>
      tpu.vector_store %arg6[%c0_15, %c0_16], %17 {strides = array<i32>} : memref<512x128xf32, #tpu.memory_space<vmem>>, vector<512x128xf32>,
    } else {
    }
    return
  }
  func.func @transform_0(%arg0: i32, %arg1: i32, %arg2: i32) -> (i32, i32) {
    %c0_i32 = arith.constant 0 : i32
    return %arg0, %arg2 : i32, i32
  }
  func.func @transform_1(%arg0: i32, %arg1: i32, %arg2: i32) -> (i32, i32) {
    %c0_i32 = arith.constant 0 : i32
    return %arg2, %arg1 : i32, i32
  }
  func.func @transform_2(%arg0: i32, %arg1: i32, %arg2: i32) -> (i32, i32) {
    %c0_i32 = arith.constant 0 : i32
    %c0_i32_0 = arith.constant 0 : i32
    return %c0_i32, %arg1 : i32, i32
  }
  func.func @transform_3(%arg0: i32, %arg1: i32, %arg2: i32) -> (i32, i32) {
    %c0_i32 = arith.constant 0 : i32
    return %arg0, %arg1 : i32, i32
  }
}

module attributes {stable_mosaic.version = 11 : i64} {
  func.func @_mm_bias_act_kernel(%arg0: i32, %arg1: i32, %arg2: i32, %arg3: memref<128x16xf32, #tpu.memory_space<vmem>>, %arg4: memref<16x128xf32, #tpu.memory_space<vmem>>, %arg5: memref<1x128xf32, #tpu.memory_space<vmem>>, %arg6: memref<128x128xf32, #tpu.memory_space<vmem>>, %arg7: memref<128x128xf32, #tpu.memory_space<vmem>>) attributes {dimension_semantics = [#tpu.dimension_semantics<parallel>, #tpu.dimension_semantics<parallel>, #tpu.dimension_semantics<arbitrary>], iteration_bounds = array<i64: 1, 1, 1>, scalar_prefetch = 0 : i64, scratch_operands = 1 : i64, tpu.core_type = #tpu.core_type<tc>, window_params = [{transform_indices = @transform_0, window_bounds = array<i64: 128, 16>}, {transform_indices = @transform_1, window_bounds = array<i64: 16, 128>}, {transform_indices = @transform_2, window_bounds = array<i64: 1, 128>}, {transform_indices = @transform_3, window_bounds = array<i64: 128, 128>}]} {
    %c0_i32 = arith.constant 0 : i32
    %0 = arith.cmpi eq, %arg2, %c0_i32 : i32
    %1 = arith.extui %0 : i1 to i32
    %c0_i32_0 = arith.constant 0 : i32
    %2 = arith.cmpi ne, %1, %c0_i32_0 : i32
    scf.if %2 {
      %cst_10 = arith.constant 0.000000e+00 : f32
      %12 = vector.broadcast %cst_10 : f32 to vector<128x128xf32>
      %c0_11 = arith.constant 0 : index
      %c0_12 = arith.constant 0 : index
      %13 = vector.load %arg7[%c0_11, %c0_12] : memref<128x128xf32, #tpu.memory_space<vmem>>, vector<128x128xf32>
      tpu.vector_store %arg7[%c0_11, %c0_12], %12 {strides = array<i32>} : memref<128x128xf32, #tpu.memory_space<vmem>>, vector<128x128xf32>,
    } else {
    }
    %c0 = arith.constant 0 : index
    %c0_1 = arith.constant 0 : index
    %3 = vector.load %arg7[%c0, %c0_1] : memref<128x128xf32, #tpu.memory_space<vmem>>, vector<128x128xf32>
    %c0_2 = arith.constant 0 : index
    %c0_3 = arith.constant 0 : index
    %4 = vector.load %arg3[%c0_2, %c0_3] : memref<128x16xf32, #tpu.memory_space<vmem>>, vector<128x16xf32>
    %c0_4 = arith.constant 0 : index
    %c0_5 = arith.constant 0 : index
    %5 = vector.load %arg4[%c0_4, %c0_5] : memref<16x128xf32, #tpu.memory_space<vmem>>, vector<16x128xf32>
    %cst = arith.constant dense<0.000000e+00> : vector<128x128xf32>
    %6 = tpu.matmul %4, %5, %cst {dimension_numbers = #tpu.dot_dimension_numbers<[1], [0], [0], [1], [0, 0, 1, 1], [], []>} : vector<128x16xf32>, vector<16x128xf32>, vector<128x128xf32> -> vector<128x128xf32>
    %7 = arith.addf %3, %6 : vector<128x128xf32>
    %c0_6 = arith.constant 0 : index
    %c0_7 = arith.constant 0 : index
    %8 = vector.load %arg7[%c0_6, %c0_7] : memref<128x128xf32, #tpu.memory_space<vmem>>, vector<128x128xf32>
    tpu.vector_store %arg7[%c0_6, %c0_7], %7 {strides = array<i32>} : memref<128x128xf32, #tpu.memory_space<vmem>>, vector<128x128xf32>,
    %c0_i32_8 = arith.constant 0 : i32
    %9 = arith.cmpi eq, %arg2, %c0_i32_8 : i32
    %10 = arith.extui %9 : i1 to i32
    %c0_i32_9 = arith.constant 0 : i32
    %11 = arith.cmpi ne, %10, %c0_i32_9 : i32
    scf.if %11 {
      %c0_10 = arith.constant 0 : index
      %c0_11 = arith.constant 0 : index
      %12 = vector.load %arg7[%c0_10, %c0_11] : memref<128x128xf32, #tpu.memory_space<vmem>>, vector<128x128xf32>
      %c0_12 = arith.constant 0 : index
      %c0_13 = arith.constant 0 : index
      %13 = vector.load %arg5[%c0_12, %c0_13] : memref<1x128xf32, #tpu.memory_space<vmem>>, vector<1x128xf32>
      %14 = vector.broadcast %13 : vector<1x128xf32> to vector<128x128xf32>
      %15 = arith.addf %12, %14 : vector<128x128xf32>
      %c0_14 = arith.constant 0 : index
      %c0_15 = arith.constant 0 : index
      %16 = vector.load %arg6[%c0_14, %c0_15] : memref<128x128xf32, #tpu.memory_space<vmem>>, vector<128x128xf32>
      tpu.vector_store %arg6[%c0_14, %c0_15], %15 {strides = array<i32>} : memref<128x128xf32, #tpu.memory_space<vmem>>, vector<128x128xf32>,
    } else {
    }
    return
  }
  func.func @transform_0(%arg0: i32, %arg1: i32, %arg2: i32) -> (i32, i32) {
    %c0_i32 = arith.constant 0 : i32
    return %arg0, %arg2 : i32, i32
  }
  func.func @transform_1(%arg0: i32, %arg1: i32, %arg2: i32) -> (i32, i32) {
    %c0_i32 = arith.constant 0 : i32
    return %arg2, %arg1 : i32, i32
  }
  func.func @transform_2(%arg0: i32, %arg1: i32, %arg2: i32) -> (i32, i32) {
    %c0_i32 = arith.constant 0 : i32
    %c0_i32_0 = arith.constant 0 : i32
    return %c0_i32, %arg1 : i32, i32
  }
  func.func @transform_3(%arg0: i32, %arg1: i32, %arg2: i32) -> (i32, i32) {
    %c0_i32 = arith.constant 0 : i32
    return %arg0, %arg1 : i32, i32
  }
}

module attributes {stable_mosaic.version = 11 : i64} {
  func.func @_mm_bias_res_act_kernel(%arg0: i32, %arg1: i32, %arg2: i32, %arg3: memref<128x8xf32, #tpu.memory_space<vmem>>, %arg4: memref<8x128xf32, #tpu.memory_space<vmem>>, %arg5: memref<1x128xf32, #tpu.memory_space<vmem>>, %arg6: memref<128x128xf32, #tpu.memory_space<vmem>>, %arg7: memref<128x128xf32, #tpu.memory_space<vmem>>, %arg8: memref<128x128xf32, #tpu.memory_space<vmem>>) attributes {dimension_semantics = [#tpu.dimension_semantics<parallel>, #tpu.dimension_semantics<parallel>, #tpu.dimension_semantics<arbitrary>], iteration_bounds = array<i64: 1, 1, 1>, scalar_prefetch = 0 : i64, scratch_operands = 1 : i64, tpu.core_type = #tpu.core_type<tc>, window_params = [{transform_indices = @transform_0, window_bounds = array<i64: 128, 8>}, {transform_indices = @transform_1, window_bounds = array<i64: 8, 128>}, {transform_indices = @transform_2, window_bounds = array<i64: 1, 128>}, {transform_indices = @transform_3, window_bounds = array<i64: 128, 128>}, {transform_indices = @transform_4, window_bounds = array<i64: 128, 128>}]} {
    %c0_i32 = arith.constant 0 : i32
    %0 = arith.cmpi eq, %arg2, %c0_i32 : i32
    %1 = arith.extui %0 : i1 to i32
    %c0_i32_0 = arith.constant 0 : i32
    %2 = arith.cmpi ne, %1, %c0_i32_0 : i32
    scf.if %2 {
      %cst_10 = arith.constant 0.000000e+00 : f32
      %12 = vector.broadcast %cst_10 : f32 to vector<128x128xf32>
      %c0_11 = arith.constant 0 : index
      %c0_12 = arith.constant 0 : index
      %13 = vector.load %arg8[%c0_11, %c0_12] : memref<128x128xf32, #tpu.memory_space<vmem>>, vector<128x128xf32>
      tpu.vector_store %arg8[%c0_11, %c0_12], %12 {strides = array<i32>} : memref<128x128xf32, #tpu.memory_space<vmem>>, vector<128x128xf32>,
    } else {
    }
    %c0 = arith.constant 0 : index
    %c0_1 = arith.constant 0 : index
    %3 = vector.load %arg8[%c0, %c0_1] : memref<128x128xf32, #tpu.memory_space<vmem>>, vector<128x128xf32>
    %c0_2 = arith.constant 0 : index
    %c0_3 = arith.constant 0 : index
    %4 = vector.load %arg3[%c0_2, %c0_3] : memref<128x8xf32, #tpu.memory_space<vmem>>, vector<128x8xf32>
    %c0_4 = arith.constant 0 : index
    %c0_5 = arith.constant 0 : index
    %5 = vector.load %arg4[%c0_4, %c0_5] : memref<8x128xf32, #tpu.memory_space<vmem>>, vector<8x128xf32>
    %cst = arith.constant dense<0.000000e+00> : vector<128x128xf32>
    %6 = tpu.matmul %4, %5, %cst {dimension_numbers = #tpu.dot_dimension_numbers<[1], [0], [0], [1], [0, 0, 1, 1], [], []>} : vector<128x8xf32>, vector<8x128xf32>, vector<128x128xf32> -> vector<128x128xf32>
    %7 = arith.addf %3, %6 : vector<128x128xf32>
    %c0_6 = arith.constant 0 : index
    %c0_7 = arith.constant 0 : index
    %8 = vector.load %arg8[%c0_6, %c0_7] : memref<128x128xf32, #tpu.memory_space<vmem>>, vector<128x128xf32>
    tpu.vector_store %arg8[%c0_6, %c0_7], %7 {strides = array<i32>} : memref<128x128xf32, #tpu.memory_space<vmem>>, vector<128x128xf32>,
    %c0_i32_8 = arith.constant 0 : i32
    %9 = arith.cmpi eq, %arg2, %c0_i32_8 : i32
    %10 = arith.extui %9 : i1 to i32
    %c0_i32_9 = arith.constant 0 : i32
    %11 = arith.cmpi ne, %10, %c0_i32_9 : i32
    scf.if %11 {
      %c0_10 = arith.constant 0 : index
      %c0_11 = arith.constant 0 : index
      %12 = vector.load %arg8[%c0_10, %c0_11] : memref<128x128xf32, #tpu.memory_space<vmem>>, vector<128x128xf32>
      %c0_12 = arith.constant 0 : index
      %c0_13 = arith.constant 0 : index
      %13 = vector.load %arg5[%c0_12, %c0_13] : memref<1x128xf32, #tpu.memory_space<vmem>>, vector<1x128xf32>
      %14 = vector.broadcast %13 : vector<1x128xf32> to vector<128x128xf32>
      %15 = arith.addf %12, %14 : vector<128x128xf32>
      %c0_14 = arith.constant 0 : index
      %c0_15 = arith.constant 0 : index
      %16 = vector.load %arg6[%c0_14, %c0_15] : memref<128x128xf32, #tpu.memory_space<vmem>>, vector<128x128xf32>
      %17 = arith.addf %15, %16 : vector<128x128xf32>
      %cst_16 = arith.constant 0.000000e+00 : f32
      %18 = vector.broadcast %cst_16 : f32 to vector<128x128xf32>
      %19 = arith.maximumf %17, %18 : vector<128x128xf32>
      %c0_17 = arith.constant 0 : index
      %c0_18 = arith.constant 0 : index
      %20 = vector.load %arg7[%c0_17, %c0_18] : memref<128x128xf32, #tpu.memory_space<vmem>>, vector<128x128xf32>
      tpu.vector_store %arg7[%c0_17, %c0_18], %19 {strides = array<i32>} : memref<128x128xf32, #tpu.memory_space<vmem>>, vector<128x128xf32>,
    } else {
    }
    return
  }
  func.func @transform_0(%arg0: i32, %arg1: i32, %arg2: i32) -> (i32, i32) {
    %c0_i32 = arith.constant 0 : i32
    return %arg0, %arg2 : i32, i32
  }
  func.func @transform_1(%arg0: i32, %arg1: i32, %arg2: i32) -> (i32, i32) {
    %c0_i32 = arith.constant 0 : i32
    return %arg2, %arg1 : i32, i32
  }
  func.func @transform_2(%arg0: i32, %arg1: i32, %arg2: i32) -> (i32, i32) {
    %c0_i32 = arith.constant 0 : i32
    %c0_i32_0 = arith.constant 0 : i32
    return %c0_i32, %arg1 : i32, i32
  }
  func.func @transform_3(%arg0: i32, %arg1: i32, %arg2: i32) -> (i32, i32) {
    %c0_i32 = arith.constant 0 : i32
    return %arg0, %arg1 : i32, i32
  }
  func.func @transform_4(%arg0: i32, %arg1: i32, %arg2: i32) -> (i32, i32) {
    %c0_i32 = arith.constant 0 : i32
    return %arg0, %arg1 : i32, i32
  }
}

module attributes {stable_mosaic.version = 11 : i64} {
  func.func @_mm_bias_act_kernel(%arg0: i32, %arg1: i32, %arg2: i32, %arg3: memref<128x72xf32, #tpu.memory_space<vmem>>, %arg4: memref<72x128xf32, #tpu.memory_space<vmem>>, %arg5: memref<1x128xf32, #tpu.memory_space<vmem>>, %arg6: memref<128x128xf32, #tpu.memory_space<vmem>>, %arg7: memref<128x128xf32, #tpu.memory_space<vmem>>) attributes {dimension_semantics = [#tpu.dimension_semantics<parallel>, #tpu.dimension_semantics<parallel>, #tpu.dimension_semantics<arbitrary>], iteration_bounds = array<i64: 1, 1, 1>, scalar_prefetch = 0 : i64, scratch_operands = 1 : i64, tpu.core_type = #tpu.core_type<tc>, window_params = [{transform_indices = @transform_0, window_bounds = array<i64: 128, 72>}, {transform_indices = @transform_1, window_bounds = array<i64: 72, 128>}, {transform_indices = @transform_2, window_bounds = array<i64: 1, 128>}, {transform_indices = @transform_3, window_bounds = array<i64: 128, 128>}]} {
    %c0_i32 = arith.constant 0 : i32
    %0 = arith.cmpi eq, %arg2, %c0_i32 : i32
    %1 = arith.extui %0 : i1 to i32
    %c0_i32_0 = arith.constant 0 : i32
    %2 = arith.cmpi ne, %1, %c0_i32_0 : i32
    scf.if %2 {
      %cst_10 = arith.constant 0.000000e+00 : f32
      %12 = vector.broadcast %cst_10 : f32 to vector<128x128xf32>
      %c0_11 = arith.constant 0 : index
      %c0_12 = arith.constant 0 : index
      %13 = vector.load %arg7[%c0_11, %c0_12] : memref<128x128xf32, #tpu.memory_space<vmem>>, vector<128x128xf32>
      tpu.vector_store %arg7[%c0_11, %c0_12], %12 {strides = array<i32>} : memref<128x128xf32, #tpu.memory_space<vmem>>, vector<128x128xf32>,
    } else {
    }
    %c0 = arith.constant 0 : index
    %c0_1 = arith.constant 0 : index
    %3 = vector.load %arg7[%c0, %c0_1] : memref<128x128xf32, #tpu.memory_space<vmem>>, vector<128x128xf32>
    %c0_2 = arith.constant 0 : index
    %c0_3 = arith.constant 0 : index
    %4 = vector.load %arg3[%c0_2, %c0_3] : memref<128x72xf32, #tpu.memory_space<vmem>>, vector<128x72xf32>
    %c0_4 = arith.constant 0 : index
    %c0_5 = arith.constant 0 : index
    %5 = vector.load %arg4[%c0_4, %c0_5] : memref<72x128xf32, #tpu.memory_space<vmem>>, vector<72x128xf32>
    %cst = arith.constant dense<0.000000e+00> : vector<128x128xf32>
    %6 = tpu.matmul %4, %5, %cst {dimension_numbers = #tpu.dot_dimension_numbers<[1], [0], [0], [1], [0, 0, 1, 1], [], []>} : vector<128x72xf32>, vector<72x128xf32>, vector<128x128xf32> -> vector<128x128xf32>
    %7 = arith.addf %3, %6 : vector<128x128xf32>
    %c0_6 = arith.constant 0 : index
    %c0_7 = arith.constant 0 : index
    %8 = vector.load %arg7[%c0_6, %c0_7] : memref<128x128xf32, #tpu.memory_space<vmem>>, vector<128x128xf32>
    tpu.vector_store %arg7[%c0_6, %c0_7], %7 {strides = array<i32>} : memref<128x128xf32, #tpu.memory_space<vmem>>, vector<128x128xf32>,
    %c0_i32_8 = arith.constant 0 : i32
    %9 = arith.cmpi eq, %arg2, %c0_i32_8 : i32
    %10 = arith.extui %9 : i1 to i32
    %c0_i32_9 = arith.constant 0 : i32
    %11 = arith.cmpi ne, %10, %c0_i32_9 : i32
    scf.if %11 {
      %c0_10 = arith.constant 0 : index
      %c0_11 = arith.constant 0 : index
      %12 = vector.load %arg7[%c0_10, %c0_11] : memref<128x128xf32, #tpu.memory_space<vmem>>, vector<128x128xf32>
      %c0_12 = arith.constant 0 : index
      %c0_13 = arith.constant 0 : index
      %13 = vector.load %arg5[%c0_12, %c0_13] : memref<1x128xf32, #tpu.memory_space<vmem>>, vector<1x128xf32>
      %14 = vector.broadcast %13 : vector<1x128xf32> to vector<128x128xf32>
      %15 = arith.addf %12, %14 : vector<128x128xf32>
      %cst_14 = arith.constant 0.000000e+00 : f32
      %16 = vector.broadcast %cst_14 : f32 to vector<128x128xf32>
      %17 = arith.maximumf %15, %16 : vector<128x128xf32>
      %c0_15 = arith.constant 0 : index
      %c0_16 = arith.constant 0 : index
      %18 = vector.load %arg6[%c0_15, %c0_16] : memref<128x128xf32, #tpu.memory_space<vmem>>, vector<128x128xf32>
      tpu.vector_store %arg6[%c0_15, %c0_16], %17 {strides = array<i32>} : memref<128x128xf32, #tpu.memory_space<vmem>>, vector<128x128xf32>,
    } else {
    }
    return
  }
  func.func @transform_0(%arg0: i32, %arg1: i32, %arg2: i32) -> (i32, i32) {
    %c0_i32 = arith.constant 0 : i32
    return %arg0, %arg2 : i32, i32
  }
  func.func @transform_1(%arg0: i32, %arg1: i32, %arg2: i32) -> (i32, i32) {
    %c0_i32 = arith.constant 0 : i32
    return %arg2, %arg1 : i32, i32
  }
  func.func @transform_2(%arg0: i32, %arg1: i32, %arg2: i32) -> (i32, i32) {
    %c0_i32 = arith.constant 0 : i32
    %c0_i32_0 = arith.constant 0 : i32
    return %c0_i32, %arg1 : i32, i32
  }
  func.func @transform_3(%arg0: i32, %arg1: i32, %arg2: i32) -> (i32, i32) {
    %c0_i32 = arith.constant 0 : i32
    return %arg0, %arg1 : i32, i32
  }
}

module attributes {stable_mosaic.version = 11 : i64} {
  func.func @_mm_bias_act_kernel(%arg0: i32, %arg1: i32, %arg2: i32, %arg3: memref<128x32xf32, #tpu.memory_space<vmem>>, %arg4: memref<32x128xf32, #tpu.memory_space<vmem>>, %arg5: memref<1x128xf32, #tpu.memory_space<vmem>>, %arg6: memref<128x128xf32, #tpu.memory_space<vmem>>, %arg7: memref<128x128xf32, #tpu.memory_space<vmem>>) attributes {dimension_semantics = [#tpu.dimension_semantics<parallel>, #tpu.dimension_semantics<parallel>, #tpu.dimension_semantics<arbitrary>], iteration_bounds = array<i64: 1, 1, 1>, scalar_prefetch = 0 : i64, scratch_operands = 1 : i64, tpu.core_type = #tpu.core_type<tc>, window_params = [{transform_indices = @transform_0, window_bounds = array<i64: 128, 32>}, {transform_indices = @transform_1, window_bounds = array<i64: 32, 128>}, {transform_indices = @transform_2, window_bounds = array<i64: 1, 128>}, {transform_indices = @transform_3, window_bounds = array<i64: 128, 128>}]} {
    %c0_i32 = arith.constant 0 : i32
    %0 = arith.cmpi eq, %arg2, %c0_i32 : i32
    %1 = arith.extui %0 : i1 to i32
    %c0_i32_0 = arith.constant 0 : i32
    %2 = arith.cmpi ne, %1, %c0_i32_0 : i32
    scf.if %2 {
      %cst_10 = arith.constant 0.000000e+00 : f32
      %12 = vector.broadcast %cst_10 : f32 to vector<128x128xf32>
      %c0_11 = arith.constant 0 : index
      %c0_12 = arith.constant 0 : index
      %13 = vector.load %arg7[%c0_11, %c0_12] : memref<128x128xf32, #tpu.memory_space<vmem>>, vector<128x128xf32>
      tpu.vector_store %arg7[%c0_11, %c0_12], %12 {strides = array<i32>} : memref<128x128xf32, #tpu.memory_space<vmem>>, vector<128x128xf32>,
    } else {
    }
    %c0 = arith.constant 0 : index
    %c0_1 = arith.constant 0 : index
    %3 = vector.load %arg7[%c0, %c0_1] : memref<128x128xf32, #tpu.memory_space<vmem>>, vector<128x128xf32>
    %c0_2 = arith.constant 0 : index
    %c0_3 = arith.constant 0 : index
    %4 = vector.load %arg3[%c0_2, %c0_3] : memref<128x32xf32, #tpu.memory_space<vmem>>, vector<128x32xf32>
    %c0_4 = arith.constant 0 : index
    %c0_5 = arith.constant 0 : index
    %5 = vector.load %arg4[%c0_4, %c0_5] : memref<32x128xf32, #tpu.memory_space<vmem>>, vector<32x128xf32>
    %cst = arith.constant dense<0.000000e+00> : vector<128x128xf32>
    %6 = tpu.matmul %4, %5, %cst {dimension_numbers = #tpu.dot_dimension_numbers<[1], [0], [0], [1], [0, 0, 1, 1], [], []>} : vector<128x32xf32>, vector<32x128xf32>, vector<128x128xf32> -> vector<128x128xf32>
    %7 = arith.addf %3, %6 : vector<128x128xf32>
    %c0_6 = arith.constant 0 : index
    %c0_7 = arith.constant 0 : index
    %8 = vector.load %arg7[%c0_6, %c0_7] : memref<128x128xf32, #tpu.memory_space<vmem>>, vector<128x128xf32>
    tpu.vector_store %arg7[%c0_6, %c0_7], %7 {strides = array<i32>} : memref<128x128xf32, #tpu.memory_space<vmem>>, vector<128x128xf32>,
    %c0_i32_8 = arith.constant 0 : i32
    %9 = arith.cmpi eq, %arg2, %c0_i32_8 : i32
    %10 = arith.extui %9 : i1 to i32
    %c0_i32_9 = arith.constant 0 : i32
    %11 = arith.cmpi ne, %10, %c0_i32_9 : i32
    scf.if %11 {
      %c0_10 = arith.constant 0 : index
      %c0_11 = arith.constant 0 : index
      %12 = vector.load %arg7[%c0_10, %c0_11] : memref<128x128xf32, #tpu.memory_space<vmem>>, vector<128x128xf32>
      %c0_12 = arith.constant 0 : index
      %c0_13 = arith.constant 0 : index
      %13 = vector.load %arg5[%c0_12, %c0_13] : memref<1x128xf32, #tpu.memory_space<vmem>>, vector<1x128xf32>
      %14 = vector.broadcast %13 : vector<1x128xf32> to vector<128x128xf32>
      %15 = arith.addf %12, %14 : vector<128x128xf32>
      %cst_14 = arith.constant 0.000000e+00 : f32
      %16 = vector.broadcast %cst_14 : f32 to vector<128x128xf32>
      %17 = arith.maximumf %15, %16 : vector<128x128xf32>
      %c0_15 = arith.constant 0 : index
      %c0_16 = arith.constant 0 : index
      %18 = vector.load %arg6[%c0_15, %c0_16] : memref<128x128xf32, #tpu.memory_space<vmem>>, vector<128x128xf32>
      tpu.vector_store %arg6[%c0_15, %c0_16], %17 {strides = array<i32>} : memref<128x128xf32, #tpu.memory_space<vmem>>, vector<128x128xf32>,
    } else {
    }
    return
  }
  func.func @transform_0(%arg0: i32, %arg1: i32, %arg2: i32) -> (i32, i32) {
    %c0_i32 = arith.constant 0 : i32
    return %arg0, %arg2 : i32, i32
  }
  func.func @transform_1(%arg0: i32, %arg1: i32, %arg2: i32) -> (i32, i32) {
    %c0_i32 = arith.constant 0 : i32
    return %arg2, %arg1 : i32, i32
  }
  func.func @transform_2(%arg0: i32, %arg1: i32, %arg2: i32) -> (i32, i32) {
    %c0_i32 = arith.constant 0 : i32
    %c0_i32_0 = arith.constant 0 : i32
    return %c0_i32, %arg1 : i32, i32
  }
  func.func @transform_3(%arg0: i32, %arg1: i32, %arg2: i32) -> (i32, i32) {
    %c0_i32 = arith.constant 0 : i32
    return %arg0, %arg1 : i32, i32
  }
}

module attributes {stable_mosaic.version = 11 : i64} {
  func.func @_mm_bias_res_act_kernel(%arg0: i32, %arg1: i32, %arg2: i32, %arg3: memref<128x8xf32, #tpu.memory_space<vmem>>, %arg4: memref<8x128xf32, #tpu.memory_space<vmem>>, %arg5: memref<1x128xf32, #tpu.memory_space<vmem>>, %arg6: memref<128x128xf32, #tpu.memory_space<vmem>>, %arg7: memref<128x128xf32, #tpu.memory_space<vmem>>, %arg8: memref<128x128xf32, #tpu.memory_space<vmem>>) attributes {dimension_semantics = [#tpu.dimension_semantics<parallel>, #tpu.dimension_semantics<parallel>, #tpu.dimension_semantics<arbitrary>], iteration_bounds = array<i64: 1, 1, 1>, scalar_prefetch = 0 : i64, scratch_operands = 1 : i64, tpu.core_type = #tpu.core_type<tc>, window_params = [{transform_indices = @transform_0, window_bounds = array<i64: 128, 8>}, {transform_indices = @transform_1, window_bounds = array<i64: 8, 128>}, {transform_indices = @transform_2, window_bounds = array<i64: 1, 128>}, {transform_indices = @transform_3, window_bounds = array<i64: 128, 128>}, {transform_indices = @transform_4, window_bounds = array<i64: 128, 128>}]} {
    %c0_i32 = arith.constant 0 : i32
    %0 = arith.cmpi eq, %arg2, %c0_i32 : i32
    %1 = arith.extui %0 : i1 to i32
    %c0_i32_0 = arith.constant 0 : i32
    %2 = arith.cmpi ne, %1, %c0_i32_0 : i32
    scf.if %2 {
      %cst_10 = arith.constant 0.000000e+00 : f32
      %12 = vector.broadcast %cst_10 : f32 to vector<128x128xf32>
      %c0_11 = arith.constant 0 : index
      %c0_12 = arith.constant 0 : index
      %13 = vector.load %arg8[%c0_11, %c0_12] : memref<128x128xf32, #tpu.memory_space<vmem>>, vector<128x128xf32>
      tpu.vector_store %arg8[%c0_11, %c0_12], %12 {strides = array<i32>} : memref<128x128xf32, #tpu.memory_space<vmem>>, vector<128x128xf32>,
    } else {
    }
    %c0 = arith.constant 0 : index
    %c0_1 = arith.constant 0 : index
    %3 = vector.load %arg8[%c0, %c0_1] : memref<128x128xf32, #tpu.memory_space<vmem>>, vector<128x128xf32>
    %c0_2 = arith.constant 0 : index
    %c0_3 = arith.constant 0 : index
    %4 = vector.load %arg3[%c0_2, %c0_3] : memref<128x8xf32, #tpu.memory_space<vmem>>, vector<128x8xf32>
    %c0_4 = arith.constant 0 : index
    %c0_5 = arith.constant 0 : index
    %5 = vector.load %arg4[%c0_4, %c0_5] : memref<8x128xf32, #tpu.memory_space<vmem>>, vector<8x128xf32>
    %cst = arith.constant dense<0.000000e+00> : vector<128x128xf32>
    %6 = tpu.matmul %4, %5, %cst {dimension_numbers = #tpu.dot_dimension_numbers<[1], [0], [0], [1], [0, 0, 1, 1], [], []>} : vector<128x8xf32>, vector<8x128xf32>, vector<128x128xf32> -> vector<128x128xf32>
    %7 = arith.addf %3, %6 : vector<128x128xf32>
    %c0_6 = arith.constant 0 : index
    %c0_7 = arith.constant 0 : index
    %8 = vector.load %arg8[%c0_6, %c0_7] : memref<128x128xf32, #tpu.memory_space<vmem>>, vector<128x128xf32>
    tpu.vector_store %arg8[%c0_6, %c0_7], %7 {strides = array<i32>} : memref<128x128xf32, #tpu.memory_space<vmem>>, vector<128x128xf32>,
    %c0_i32_8 = arith.constant 0 : i32
    %9 = arith.cmpi eq, %arg2, %c0_i32_8 : i32
    %10 = arith.extui %9 : i1 to i32
    %c0_i32_9 = arith.constant 0 : i32
    %11 = arith.cmpi ne, %10, %c0_i32_9 : i32
    scf.if %11 {
      %c0_10 = arith.constant 0 : index
      %c0_11 = arith.constant 0 : index
      %12 = vector.load %arg8[%c0_10, %c0_11] : memref<128x128xf32, #tpu.memory_space<vmem>>, vector<128x128xf32>
      %c0_12 = arith.constant 0 : index
      %c0_13 = arith.constant 0 : index
      %13 = vector.load %arg5[%c0_12, %c0_13] : memref<1x128xf32, #tpu.memory_space<vmem>>, vector<1x128xf32>
      %14 = vector.broadcast %13 : vector<1x128xf32> to vector<128x128xf32>
      %15 = arith.addf %12, %14 : vector<128x128xf32>
      %c0_14 = arith.constant 0 : index
      %c0_15 = arith.constant 0 : index
      %16 = vector.load %arg6[%c0_14, %c0_15] : memref<128x128xf32, #tpu.memory_space<vmem>>, vector<128x128xf32>
      %17 = arith.addf %15, %16 : vector<128x128xf32>
      %cst_16 = arith.constant 0.000000e+00 : f32
      %18 = vector.broadcast %cst_16 : f32 to vector<128x128xf32>
      %19 = arith.maximumf %17, %18 : vector<128x128xf32>
      %c0_17 = arith.constant 0 : index
      %c0_18 = arith.constant 0 : index
      %20 = vector.load %arg7[%c0_17, %c0_18] : memref<128x128xf32, #tpu.memory_space<vmem>>, vector<128x128xf32>
      tpu.vector_store %arg7[%c0_17, %c0_18], %19 {strides = array<i32>} : memref<128x128xf32, #tpu.memory_space<vmem>>, vector<128x128xf32>,
    } else {
    }
    return
  }
  func.func @transform_0(%arg0: i32, %arg1: i32, %arg2: i32) -> (i32, i32) {
    %c0_i32 = arith.constant 0 : i32
    return %arg0, %arg2 : i32, i32
  }
  func.func @transform_1(%arg0: i32, %arg1: i32, %arg2: i32) -> (i32, i32) {
    %c0_i32 = arith.constant 0 : i32
    return %arg2, %arg1 : i32, i32
  }
  func.func @transform_2(%arg0: i32, %arg1: i32, %arg2: i32) -> (i32, i32) {
    %c0_i32 = arith.constant 0 : i32
    %c0_i32_0 = arith.constant 0 : i32
    return %c0_i32, %arg1 : i32, i32
  }
  func.func @transform_3(%arg0: i32, %arg1: i32, %arg2: i32) -> (i32, i32) {
    %c0_i32 = arith.constant 0 : i32
    return %arg0, %arg1 : i32, i32
  }
  func.func @transform_4(%arg0: i32, %arg1: i32, %arg2: i32) -> (i32, i32) {
    %c0_i32 = arith.constant 0 : i32
    return %arg0, %arg1 : i32, i32
  }
}

</mosaic_0001>

<bundles_post_ra>
// kernel: _lambda_.15
= control target key start
LH: loop header
LB: loop body
LE: loop exit
PB: predicated region body
PF: predicated region fallthrough
CT: control target
= control target key end

     0   :  { %vm211_vm0 = vcmask 64512   ;;  %s1957_s1 = inlined_call_operand.vmem [shape: f32[8,128], index: 1, kind: input, shape index: {}]   ;;  %s1958_s0 = inlined_call_operand.vmem [shape: f32[512,8], index: 0, kind: input, shape index: {}]   ;;  %s1959_s2 = inlined_call_operand.vmem [shape: f32[1,128], index: 2, kind: input, shape index: {}]   ;;  %s1960_s3 = inlined_call_operand.vmem [shape: f32[512,128], index: 3, kind: output, shape index: {}]  }
   0x1   :  { %v210_v0 = vld [vmem:[%s1957_s1] sm:$0xff]  ;;  %v147_v3 = vld [vmem:[%s1958_s0 + $0x8] sm:$0xff]  ;;  %v148_v5 = vld [vmem:[%s1958_s0 + $0x10] sm:$0xff] }
   0x2   :  { %v146_v1 = vld [vmem:[%s1958_s0] sm:$0xff]  ;;  %1317 = vmatprep.subr.mxu0 %v210_v0  ;;  %1415 = vmatprep.subr.mxu1 %v210_v0  ;;  %v179_v4 = vld [vmem:[%s1958_s0 + $0x108] sm:$0xff]  ;;  %v180_v6 = vld [vmem:[%s1958_s0 + $0x110] sm:$0xff] }
   0x3   :  { %v178_v2 = vld [vmem:[%s1958_s0 + $0x100] sm:$0xff]  ;;  %1318 = vmatpush3.msra.mxu0 %v210_v0  ;;  %1416 = vmatpush3.msra.mxu1 %v210_v0  ;;  %v149_v7 = vld [vmem:[%s1958_s0 + $0x18] sm:$0xff]  ;;  %v151_v11 = vld [vmem:[%s1958_s0 + $0x28] sm:$0xff] }
   0x4   :  { %1319 = vmatprep.mubr.msk.f32.mxu0 %vm211_vm0, %v146_v1  ;;  %1367 = vmatprep.mubr.msk.f32.mxu1 %vm211_vm0, %v178_v2  ;;  %v181_v8 = vld [vmem:[%s1958_s0 + $0x118] sm:$0xff]  ;;  %v150_v9 = vld [vmem:[%s1958_s0 + $0x20] sm:$0xff]  ;;  %v183_v12 = vld [vmem:[%s1958_s0 + $0x128] sm:$0xff] }
   0x5   :  { %1320 = vmatmul.mubr.msk.f32.vlgmr.msra.gmra.mrb[0].mxu0 %vm211_vm0, %v147_v3  ;;  %1368 = vmatmul.mubr.msk.f32.vlgmr.msra.gmra.mrb[0].mxu1 %vm211_vm0, %v179_v4  ;;  %v182_v10 = vld [vmem:[%s1958_s0 + $0x120] sm:$0xff]  ;;  %v152_v13 = vld [vmem:[%s1958_s0 + $0x30] sm:$0xff]  ;;  %v153_v15 = vld [vmem:[%s1958_s0 + $0x38] sm:$0xff] }
   0x6   :  { %1322 = vmatprep.mubr.msk.f32.mxu0 %vm211_vm0, %v148_v5  ;;  %1370 = vmatprep.mubr.msk.f32.mxu1 %vm211_vm0, %v180_v6  ;;  %v184_v14 = vld [vmem:[%s1958_s0 + $0x130] sm:$0xff]  ;;  %v185_v16 = vld [vmem:[%s1958_s0 + $0x138] sm:$0xff]  ;;  %v154_v17 = vld [vmem:[%s1958_s0 + $0x40] sm:$0xff] }
   0x7   :  { %v186_v18 = vld [vmem:[%s1958_s0 + $0x140] sm:$0xff]  ;;  %v155_v19 = vld [vmem:[%s1958_s0 + $0x48] sm:$0xff]  ;;  %v156_v21 = vld [vmem:[%s1958_s0 + $0x50] sm:$0xff] }
   0x8   :  { %v187_v20 = vld [vmem:[%s1958_s0 + $0x148] sm:$0xff]  ;;  %v188_v22 = vld [vmem:[%s1958_s0 + $0x150] sm:$0xff]  ;;  %v157_v23 = vld [vmem:[%s1958_s0 + $0x58] sm:$0xff] }
   0x9   :  { %1323 = vmatmul.mubr.msk.f32.gmra.mrb[2].mxu0 %vm211_vm0, %v149_v7  ;;  %1371 = vmatmul.mubr.msk.f32.gmra.mrb[2].mxu1 %vm211_vm0, %v181_v8  ;;  %v189_v24 = vld [vmem:[%s1958_s0 + $0x158] sm:$0xff]  ;;  %v158_v25 = vld [vmem:[%s1958_s0 + $0x60] sm:$0xff]  ;;  %v159_v27 = vld [vmem:[%s1958_s0 + $0x68] sm:$0xff] }
   0xa   :  { %1325 = vmatprep.mubr.msk.f32.mxu0 %vm211_vm0, %v150_v9  ;;  %1373 = vmatprep.mubr.msk.f32.mxu1 %vm211_vm0, %v182_v10  ;;  %v190_v26 = vld [vmem:[%s1958_s0 + $0x160] sm:$0xff]  ;;  %v191_v28 = vld [vmem:[%s1958_s0 + $0x168] sm:$0xff]  ;;  %v160_v29 = vld [vmem:[%s1958_s0 + $0x70] sm:$0xff] }
   0xb   :  { %v192_v30 = vld [vmem:[%s1958_s0 + $0x170] sm:$0xff]  ;;  %v161_v31 = vld [vmem:[%s1958_s0 + $0x78] sm:$0xff]  ;;  %v162_v33 = vld [vmem:[%s1958_s0 + $0x80] sm:$0xff] }
   0xc   :  { %v193_v32 = vld [vmem:[%s1958_s0 + $0x178] sm:$0xff]  ;;  %v194_v34 = vld [vmem:[%s1958_s0 + $0x180] sm:$0xff]  ;;  %v163_v35 = vld [vmem:[%s1958_s0 + $0x88] sm:$0xff] }
   0xd   :  { %1326 = vmatmul.mubr.msk.f32.gmra.mrb[4].mxu0 %vm211_vm0, %v151_v11  ;;  %1374 = vmatmul.mubr.msk.f32.gmra.mrb[4].mxu1 %vm211_vm0, %v183_v12  ;;  %v195_v36 = vld [vmem:[%s1958_s0 + $0x188] sm:$0xff]  ;;  %v164_v37 = vld [vmem:[%s1958_s0 + $0x90] sm:$0xff]  ;;  %v165_v39 = vld [vmem:[%s1958_s0 + $0x98] sm:$0xff] }
   0xe   :  { %1328 = vmatprep.mubr.msk.f32.mxu0 %vm211_vm0, %v152_v13  ;;  %1376 = vmatprep.mubr.msk.f32.mxu1 %vm211_vm0, %v184_v14  ;;  %v196_v38 = vld [vmem:[%s1958_s0 + $0x190] sm:$0xff]  ;;  %v197_v40 = vld [vmem:[%s1958_s0 + $0x198] sm:$0xff]  ;;  %v166_v41 = vld [vmem:[%s1958_s0 + $0xa0] sm:$0xff] }
   0xf   :  { %v198_v42 = vld [vmem:[%s1958_s0 + $0x1a0] sm:$0xff]  ;;  %v167_v43 = vld [vmem:[%s1958_s0 + $0xa8] sm:$0xff]  ;;  %v168_v45 = vld [vmem:[%s1958_s0 + $0xb0] sm:$0xff] }
  0x10   :  { %v199_v44 = vld [vmem:[%s1958_s0 + $0x1a8] sm:$0xff]  ;;  %v200_v46 = vld [vmem:[%s1958_s0 + $0x1b0] sm:$0xff]  ;;  %v169_v47 = vld [vmem:[%s1958_s0 + $0xb8] sm:$0xff] }
  0x11   :  { %1329 = vmatmul.mubr.msk.f32.gmra.mrb[6].mxu0 %vm211_vm0, %v153_v15  ;;  %1377 = vmatmul.mubr.msk.f32.gmra.mrb[6].mxu1 %vm211_vm0, %v185_v16  ;;  %v201_v48 = vld [vmem:[%s1958_s0 + $0x1b8] sm:$0xff]  ;;  %v170_v49 = vld [vmem:[%s1958_s0 + $0xc0] sm:$0xff]  ;;  %v171_v51 = vld [vmem:[%s1958_s0 + $0xc8] sm:$0xff] }
  0x12   :  { %1331 = vmatprep.mubr.msk.f32.mxu0 %vm211_vm0, %v154_v17  ;;  %1379 = vmatprep.mubr.msk.f32.mxu1 %vm211_vm0, %v186_v18  ;;  %v202_v50 = vld [vmem:[%s1958_s0 + $0x1c0] sm:$0xff]  ;;  %v203_v52 = vld [vmem:[%s1958_s0 + $0x1c8] sm:$0xff]  ;;  %v172_v53 = vld [vmem:[%s1958_s0 + $0xd0] sm:$0xff] }
  0x13   :  { %v204_v54 = vld [vmem:[%s1958_s0 + $0x1d0] sm:$0xff]  ;;  %v173_v55 = vld [vmem:[%s1958_s0 + $0xd8] sm:$0xff]  ;;  %v174_v57 = vld [vmem:[%s1958_s0 + $0xe0] sm:$0xff] }
  0x14   :  { %v205_v56 = vld [vmem:[%s1958_s0 + $0x1d8] sm:$0xff]  ;;  %v206_v58 = vld [vmem:[%s1958_s0 + $0x1e0] sm:$0xff]  ;;  %v175_v59 = vld [vmem:[%s1958_s0 + $0xe8] sm:$0xff] }
  0x15   :  { %1332 = vmatmul.mubr.msk.f32.gmra.mrb[8].mxu0 %vm211_vm0, %v155_v19  ;;  %1380 = vmatmul.mubr.msk.f32.gmra.mrb[8].mxu1 %vm211_vm0, %v187_v20  ;;  %v207_v60 = vld [vmem:[%s1958_s0 + $0x1e8] sm:$0xff]  ;;  %v176_v61 = vld [vmem:[%s1958_s0 + $0xf0] sm:$0xff]  ;;  %v177_v63 = vld [vmem:[%s1958_s0 + $0xf8] sm:$0xff] }
  0x16   :  { %1334 = vmatprep.mubr.msk.f32.mxu0 %vm211_vm0, %v156_v21  ;;  %1382 = vmatprep.mubr.msk.f32.mxu1 %vm211_vm0, %v188_v22  ;;  %v208_v62 = vld [vmem:[%s1958_s0 + $0x1f0] sm:$0xff]  ;;  %v209_v0 = vld [vmem:[%s1958_s0 + $0x1f8] sm:$0xff]  ;;  %v1699_v1 = vld [vmem:[%s1959_s2] ss:$0 sm:$0xff] }
  0x19   :  { %1335 = vmatmul.mubr.msk.f32.gmra.mrb[10].mxu0 %vm211_vm0, %v157_v23  ;;  %1383 = vmatmul.mubr.msk.f32.gmra.mrb[10].mxu1 %vm211_vm0, %v189_v24 }
  0x1a   :  { %1337 = vmatprep.mubr.msk.f32.mxu0 %vm211_vm0, %v158_v25  ;;  %1385 = vmatprep.mubr.msk.f32.mxu1 %vm211_vm0, %v190_v26 }
  0x1d   :  { %1338 = vmatmul.mubr.msk.f32.gmra.mrb[12].mxu0 %vm211_vm0, %v159_v27  ;;  %1386 = vmatmul.mubr.msk.f32.gmra.mrb[12].mxu1 %vm211_vm0, %v191_v28 }
  0x1e   :  { %1340 = vmatprep.mubr.msk.f32.mxu0 %vm211_vm0, %v160_v29  ;;  %1388 = vmatprep.mubr.msk.f32.mxu1 %vm211_vm0, %v192_v30 }
  0x21   :  { %1341 = vmatmul.mubr.msk.f32.gmra.mrb[14].mxu0 %vm211_vm0, %v161_v31  ;;  %1389 = vmatmul.mubr.msk.f32.gmra.mrb[14].mxu1 %vm211_vm0, %v193_v32 }
  0x22   :  { %1343 = vmatprep.mubr.msk.f32.mxu0 %vm211_vm0, %v162_v33  ;;  %1391 = vmatprep.mubr.msk.f32.mxu1 %vm211_vm0, %v194_v34 }
  0x25   :  { %1344 = vmatmul.mubr.msk.f32.gmra.mrb[16].mxu0 %vm211_vm0, %v163_v35  ;;  %1392 = vmatmul.mubr.msk.f32.gmra.mrb[16].mxu1 %vm211_vm0, %v195_v36 }
  0x26   :  { %1346 = vmatprep.mubr.msk.f32.mxu0 %vm211_vm0, %v164_v37  ;;  %1394 = vmatprep.mubr.msk.f32.mxu1 %vm211_vm0, %v196_v38 }
  0x29   :  { %1347 = vmatmul.mubr.msk.f32.gmra.mrb[18].mxu0 %vm211_vm0, %v165_v39  ;;  %1395 = vmatmul.mubr.msk.f32.gmra.mrb[18].mxu1 %vm211_vm0, %v197_v40 }
  0x2a   :  { %1349 = vmatprep.mubr.msk.f32.mxu0 %vm211_vm0, %v166_v41  ;;  %1397 = vmatprep.mubr.msk.f32.mxu1 %vm211_vm0, %v198_v42 }
  0x2d   :  { %1350 = vmatmul.mubr.msk.f32.gmra.mrb[20].mxu0 %vm211_vm0, %v167_v43  ;;  %1398 = vmatmul.mubr.msk.f32.gmra.mrb[20].mxu1 %vm211_vm0, %v199_v44 }
  0x2e   :  { %1352 = vmatprep.mubr.msk.f32.mxu0 %vm211_vm0, %v168_v45  ;;  %1400 = vmatprep.mubr.msk.f32.mxu1 %vm211_vm0, %v200_v46 }
  0x31   :  { %1353 = vmatmul.mubr.msk.f32.gmra.mrb[22].mxu0 %vm211_vm0, %v169_v47  ;;  %1401 = vmatmul.mubr.msk.f32.gmra.mrb[22].mxu1 %vm211_vm0, %v201_v48 }
  0x32   :  { %1355 = vmatprep.mubr.msk.f32.mxu0 %vm211_vm0, %v170_v49  ;;  %1403 = vmatprep.mubr.msk.f32.mxu1 %vm211_vm0, %v202_v50 }
  0x35   :  { %1356 = vmatmul.mubr.msk.f32.gmra.mrb[24].mxu0 %vm211_vm0, %v171_v51  ;;  %1404 = vmatmul.mubr.msk.f32.gmra.mrb[24].mxu1 %vm211_vm0, %v203_v52 }
  0x36   :  { %1358 = vmatprep.mubr.msk.f32.mxu0 %vm211_vm0, %v172_v53  ;;  %1406 = vmatprep.mubr.msk.f32.mxu1 %vm211_vm0, %v204_v54 }
  0x39   :  { %1359 = vmatmul.mubr.msk.f32.gmra.mrb[26].mxu0 %vm211_vm0, %v173_v55  ;;  %1407 = vmatmul.mubr.msk.f32.gmra.mrb[26].mxu1 %vm211_vm0, %v205_v56 }
  0x3a   :  { %1361 = vmatprep.mubr.msk.f32.mxu0 %vm211_vm0, %v174_v57  ;;  %1409 = vmatprep.mubr.msk.f32.mxu1 %vm211_vm0, %v206_v58 }
  0x3d   :  { %1362 = vmatmul.mubr.msk.f32.gmra.mrb[28].mxu0 %vm211_vm0, %v175_v59  ;;  %1410 = vmatmul.mubr.msk.f32.gmra.mrb[28].mxu1 %vm211_vm0, %v207_v60 }
  0x3e   :  { %1364 = vmatprep.mubr.msk.f32.mxu0 %vm211_vm0, %v176_v61  ;;  %1412 = vmatprep.mubr.msk.f32.mxu1 %vm211_vm0, %v208_v62 }
  0x41   :  { %1365 = vmatmul.mubr.msk.f32.gmra.mrb[30].mxu0 %vm211_vm0, %v177_v63  ;;  %1413 = vmatmul.mubr.msk.f32.gmra.mrb[30].mxu1 %vm211_vm0, %v209_v0 }
  0xd8   :  { %v1321_v2 = vpop.f32.mrb[0].mxu0  ;;  %v1369_v3 = vpop.f32.mrb[0].mxu1 }
  0xd9   :  { %v992_v4 = vadd.f32 %v1321_v2, %v1699_v1  ;;  %v1024_v5 = vadd.f32 %v1369_v3, %v1699_v1  ;;  %v470_v6 = vpop.f32.mrb[1].mxu0  ;;  %v630_v7 = vpop.f32.mrb[1].mxu1 }
  0xda   :  { %v991_v8 = vadd.f32 %v1699_v1, %v470_v6  ;;  %v1023_v9 = vadd.f32 %v1699_v1, %v630_v7 }
  0xdb   :  { %v1056_v10 = vmax.f32 %v992_v4, 0.0  ;;  %v1088_v11 = vmax.f32 %v1024_v5, 0.0 }
  0xdc   :  { %v1055_v12 = vmax.f32 %v991_v8, 0.0  ;;  %v1087_v13 = vmax.f32 %v1023_v9, 0.0  ;;  %v1324_v14 = vpop.f32.mrb[2].mxu0  ;;  %v1372_v15 = vpop.f32.mrb[2].mxu1 }
  0xdd   :  { %1120 = vst [vmem:[%s1960_s3 + $0x8] sm:$0xff] %v1056_v10  ;;  %1152 = vst [vmem:[%s1960_s3 + $0x108] sm:$0xff] %v1088_v11  ;;  %v994_v16 = vadd.f32 %v1324_v14, %v1699_v1  ;;  %v1026_v17 = vadd.f32 %v1372_v15, %v1699_v1  ;;  %v480_v18 = vpop.f32.mrb[3].mxu0  ;;  %v640_v19 = vpop.f32.mrb[3].mxu1 }
  0xde   :  { %1119 = vst [vmem:[%s1960_s3] sm:$0xff] %v1055_v12  ;;  %1151 = vst [vmem:[%s1960_s3 + $0x100] sm:$0xff] %v1087_v13  ;;  %v993_v20 = vadd.f32 %v1699_v1, %v480_v18  ;;  %v1025_v21 = vadd.f32 %v1699_v1, %v640_v19 }
  0xdf   :  { %v1058_v22 = vmax.f32 %v994_v16, 0.0  ;;  %v1090_v23 = vmax.f32 %v1026_v17, 0.0 }
  0xe0   :  { %v1057_v24 = vmax.f32 %v993_v20, 0.0  ;;  %v1089_v25 = vmax.f32 %v1025_v21, 0.0  ;;  %v1327_v26 = vpop.f32.mrb[4].mxu0  ;;  %v1375_v27 = vpop.f32.mrb[4].mxu1 }
  0xe1   :  { %1122 = vst [vmem:[%s1960_s3 + $0x18] sm:$0xff] %v1058_v22  ;;  %1154 = vst [vmem:[%s1960_s3 + $0x118] sm:$0xff] %v1090_v23  ;;  %v996_v28 = vadd.f32 %v1327_v26, %v1699_v1  ;;  %v1028_v29 = vadd.f32 %v1375_v27, %v1699_v1  ;;  %v490_v30 = vpop.f32.mrb[5].mxu0  ;;  %v650_v31 = vpop.f32.mrb[5].mxu1 }
  0xe2   :  { %1121 = vst [vmem:[%s1960_s3 + $0x10] sm:$0xff] %v1057_v24  ;;  %1153 = vst [vmem:[%s1960_s3 + $0x110] sm:$0xff] %v1089_v25  ;;  %v995_v32 = vadd.f32 %v1699_v1, %v490_v30  ;;  %v1027_v33 = vadd.f32 %v1699_v1, %v650_v31 }
  0xe3   :  { %v1060_v34 = vmax.f32 %v996_v28, 0.0  ;;  %v1092_v35 = vmax.f32 %v1028_v29, 0.0 }
  0xe4   :  { %v1059_v36 = vmax.f32 %v995_v32, 0.0  ;;  %v1091_v37 = vmax.f32 %v1027_v33, 0.0  ;;  %v1330_v38 = vpop.f32.mrb[6].mxu0  ;;  %v1378_v39 = vpop.f32.mrb[6].mxu1 }
  0xe5   :  { %1124 = vst [vmem:[%s1960_s3 + $0x28] sm:$0xff] %v1060_v34  ;;  %1156 = vst [vmem:[%s1960_s3 + $0x128] sm:$0xff] %v1092_v35  ;;  %v998_v40 = vadd.f32 %v1330_v38, %v1699_v1  ;;  %v1030_v41 = vadd.f32 %v1378_v39, %v1699_v1  ;;  %v500_v42 = vpop.f32.mrb[7].mxu0  ;;  %v660_v43 = vpop.f32.mrb[7].mxu1 }
  0xe6   :  { %1123 = vst [vmem:[%s1960_s3 + $0x20] sm:$0xff] %v1059_v36  ;;  %1155 = vst [vmem:[%s1960_s3 + $0x120] sm:$0xff] %v1091_v37  ;;  %v997_v44 = vadd.f32 %v1699_v1, %v500_v42  ;;  %v1029_v45 = vadd.f32 %v1699_v1, %v660_v43 }
  0xe7   :  { %v1062_v46 = vmax.f32 %v998_v40, 0.0  ;;  %v1094_v47 = vmax.f32 %v1030_v41, 0.0 }
  0xe8   :  { %v1061_v48 = vmax.f32 %v997_v44, 0.0  ;;  %v1093_v49 = vmax.f32 %v1029_v45, 0.0  ;;  %v1333_v50 = vpop.f32.mrb[8].mxu0  ;;  %v1381_v51 = vpop.f32.mrb[8].mxu1 }
  0xe9   :  { %1126 = vst [vmem:[%s1960_s3 + $0x38] sm:$0xff] %v1062_v46  ;;  %1158 = vst [vmem:[%s1960_s3 + $0x138] sm:$0xff] %v1094_v47  ;;  %v1000_v52 = vadd.f32 %v1333_v50, %v1699_v1  ;;  %v1032_v53 = vadd.f32 %v1381_v51, %v1699_v1  ;;  %v510_v54 = vpop.f32.mrb[9].mxu0  ;;  %v670_v55 = vpop.f32.mrb[9].mxu1 }
  0xea   :  { %1125 = vst [vmem:[%s1960_s3 + $0x30] sm:$0xff] %v1061_v48  ;;  %1157 = vst [vmem:[%s1960_s3 + $0x130] sm:$0xff] %v1093_v49  ;;  %v999_v56 = vadd.f32 %v1699_v1, %v510_v54  ;;  %v1031_v57 = vadd.f32 %v1699_v1, %v670_v55 }
  0xeb   :  { %v1064_v58 = vmax.f32 %v1000_v52, 0.0  ;;  %v1096_v59 = vmax.f32 %v1032_v53, 0.0 }
  0xec   :  { %v1063_v60 = vmax.f32 %v999_v56, 0.0  ;;  %v1095_v61 = vmax.f32 %v1031_v57, 0.0  ;;  %v1336_v62 = vpop.f32.mrb[10].mxu0  ;;  %v1384_v63 = vpop.f32.mrb[10].mxu1 }
  0xed   :  { %1128 = vst [vmem:[%s1960_s3 + $0x48] sm:$0xff] %v1064_v58  ;;  %1160 = vst [vmem:[%s1960_s3 + $0x148] sm:$0xff] %v1096_v59  ;;  %v1002_v0 = vadd.f32 %v1336_v62, %v1699_v1  ;;  %v1034_v2 = vadd.f32 %v1384_v63, %v1699_v1  ;;  %v520_v3 = vpop.f32.mrb[11].mxu0  ;;  %v680_v4 = vpop.f32.mrb[11].mxu1 }
  0xee   :  { %1127 = vst [vmem:[%s1960_s3 + $0x40] sm:$0xff] %v1063_v60  ;;  %1159 = vst [vmem:[%s1960_s3 + $0x140] sm:$0xff] %v1095_v61  ;;  %v1001_v5 = vadd.f32 %v1699_v1, %v520_v3  ;;  %v1033_v6 = vadd.f32 %v1699_v1, %v680_v4 }
  0xef   :  { %v1066_v7 = vmax.f32 %v1002_v0, 0.0  ;;  %v1098_v8 = vmax.f32 %v1034_v2, 0.0 }
  0xf0   :  { %v1065_v9 = vmax.f32 %v1001_v5, 0.0  ;;  %v1097_v10 = vmax.f32 %v1033_v6, 0.0  ;;  %v1339_v11 = vpop.f32.mrb[12].mxu0  ;;  %v1387_v12 = vpop.f32.mrb[12].mxu1 }
  0xf1   :  { %1130 = vst [vmem:[%s1960_s3 + $0x58] sm:$0xff] %v1066_v7  ;;  %1162 = vst [vmem:[%s1960_s3 + $0x158] sm:$0xff] %v1098_v8  ;;  %v1004_v13 = vadd.f32 %v1339_v11, %v1699_v1  ;;  %v1036_v14 = vadd.f32 %v1387_v12, %v1699_v1  ;;  %v530_v15 = vpop.f32.mrb[13].mxu0  ;;  %v690_v16 = vpop.f32.mrb[13].mxu1 }
  0xf2   :  { %1129 = vst [vmem:[%s1960_s3 + $0x50] sm:$0xff] %v1065_v9  ;;  %1161 = vst [vmem:[%s1960_s3 + $0x150] sm:$0xff] %v1097_v10  ;;  %v1003_v17 = vadd.f32 %v1699_v1, %v530_v15  ;;  %v1035_v18 = vadd.f32 %v1699_v1, %v690_v16 }
  0xf3   :  { %v1068_v19 = vmax.f32 %v1004_v13, 0.0  ;;  %v1100_v20 = vmax.f32 %v1036_v14, 0.0 }
  0xf4   :  { %v1067_v21 = vmax.f32 %v1003_v17, 0.0  ;;  %v1099_v22 = vmax.f32 %v1035_v18, 0.0  ;;  %v1342_v23 = vpop.f32.mrb[14].mxu0  ;;  %v1390_v24 = vpop.f32.mrb[14].mxu1 }
  0xf5   :  { %1132 = vst [vmem:[%s1960_s3 + $0x68] sm:$0xff] %v1068_v19  ;;  %1164 = vst [vmem:[%s1960_s3 + $0x168] sm:$0xff] %v1100_v20  ;;  %v1006_v25 = vadd.f32 %v1342_v23, %v1699_v1  ;;  %v1038_v26 = vadd.f32 %v1390_v24, %v1699_v1  ;;  %v540_v27 = vpop.f32.mrb[15].mxu0  ;;  %v700_v28 = vpop.f32.mrb[15].mxu1 }
  0xf6   :  { %1131 = vst [vmem:[%s1960_s3 + $0x60] sm:$0xff] %v1067_v21  ;;  %1163 = vst [vmem:[%s1960_s3 + $0x160] sm:$0xff] %v1099_v22  ;;  %v1005_v29 = vadd.f32 %v1699_v1, %v540_v27  ;;  %v1037_v30 = vadd.f32 %v1699_v1, %v700_v28 }
  0xf7   :  { %v1070_v31 = vmax.f32 %v1006_v25, 0.0  ;;  %v1102_v32 = vmax.f32 %v1038_v26, 0.0 }
  0xf8   :  { %v1069_v33 = vmax.f32 %v1005_v29, 0.0  ;;  %v1101_v34 = vmax.f32 %v1037_v30, 0.0  ;;  %v1345_v35 = vpop.f32.mrb[16].mxu0  ;;  %v1393_v36 = vpop.f32.mrb[16].mxu1 }
  0xf9   :  { %1134 = vst [vmem:[%s1960_s3 + $0x78] sm:$0xff] %v1070_v31  ;;  %1166 = vst [vmem:[%s1960_s3 + $0x178] sm:$0xff] %v1102_v32  ;;  %v1008_v37 = vadd.f32 %v1345_v35, %v1699_v1  ;;  %v1040_v38 = vadd.f32 %v1393_v36, %v1699_v1  ;;  %v550_v39 = vpop.f32.mrb[17].mxu0  ;;  %v710_v40 = vpop.f32.mrb[17].mxu1 }
  0xfa   :  { %1133 = vst [vmem:[%s1960_s3 + $0x70] sm:$0xff] %v1069_v33  ;;  %1165 = vst [vmem:[%s1960_s3 + $0x170] sm:$0xff] %v1101_v34  ;;  %v1007_v41 = vadd.f32 %v1699_v1, %v550_v39  ;;  %v1039_v42 = vadd.f32 %v1699_v1, %v710_v40 }
  0xfb   :  { %v1072_v43 = vmax.f32 %v1008_v37, 0.0  ;;  %v1104_v44 = vmax.f32 %v1040_v38, 0.0 }
  0xfc   :  { %v1071_v45 = vmax.f32 %v1007_v41, 0.0  ;;  %v1103_v46 = vmax.f32 %v1039_v42, 0.0  ;;  %v1348_v47 = vpop.f32.mrb[18].mxu0  ;;  %v1396_v48 = vpop.f32.mrb[18].mxu1 }
  0xfd   :  { %1136 = vst [vmem:[%s1960_s3 + $0x88] sm:$0xff] %v1072_v43  ;;  %1168 = vst [vmem:[%s1960_s3 + $0x188] sm:$0xff] %v1104_v44  ;;  %v1010_v49 = vadd.f32 %v1348_v47, %v1699_v1  ;;  %v1042_v50 = vadd.f32 %v1396_v48, %v1699_v1  ;;  %v560_v51 = vpop.f32.mrb[19].mxu0  ;;  %v720_v52 = vpop.f32.mrb[19].mxu1 }
  0xfe   :  { %1135 = vst [vmem:[%s1960_s3 + $0x80] sm:$0xff] %v1071_v45  ;;  %1167 = vst [vmem:[%s1960_s3 + $0x180] sm:$0xff] %v1103_v46  ;;  %v1009_v53 = vadd.f32 %v1699_v1, %v560_v51  ;;  %v1041_v54 = vadd.f32 %v1699_v1, %v720_v52 }
  0xff   :  { %v1074_v55 = vmax.f32 %v1010_v49, 0.0  ;;  %v1106_v56 = vmax.f32 %v1042_v50, 0.0 }
 0x100   :  { %v1073_v57 = vmax.f32 %v1009_v53, 0.0  ;;  %v1105_v58 = vmax.f32 %v1041_v54, 0.0  ;;  %v1351_v59 = vpop.f32.mrb[20].mxu0  ;;  %v1399_v60 = vpop.f32.mrb[20].mxu1 }
 0x101   :  { %1138 = vst [vmem:[%s1960_s3 + $0x98] sm:$0xff] %v1074_v55  ;;  %1170 = vst [vmem:[%s1960_s3 + $0x198] sm:$0xff] %v1106_v56  ;;  %v1012_v61 = vadd.f32 %v1351_v59, %v1699_v1  ;;  %v1044_v62 = vadd.f32 %v1399_v60, %v1699_v1  ;;  %v570_v63 = vpop.f32.mrb[21].mxu0  ;;  %v730_v0 = vpop.f32.mrb[21].mxu1 }
 0x102   :  { %1137 = vst [vmem:[%s1960_s3 + $0x90] sm:$0xff] %v1073_v57  ;;  %1169 = vst [vmem:[%s1960_s3 + $0x190] sm:$0xff] %v1105_v58  ;;  %v1011_v2 = vadd.f32 %v1699_v1, %v570_v63  ;;  %v1043_v3 = vadd.f32 %v1699_v1, %v730_v0 }
 0x103   :  { %v1076_v4 = vmax.f32 %v1012_v61, 0.0  ;;  %v1108_v5 = vmax.f32 %v1044_v62, 0.0 }
 0x104   :  { %v1075_v6 = vmax.f32 %v1011_v2, 0.0  ;;  %v1107_v7 = vmax.f32 %v1043_v3, 0.0  ;;  %v1354_v8 = vpop.f32.mrb[22].mxu0  ;;  %v1402_v9 = vpop.f32.mrb[22].mxu1 }
 0x105   :  { %1140 = vst [vmem:[%s1960_s3 + $0xa8] sm:$0xff] %v1076_v4  ;;  %1172 = vst [vmem:[%s1960_s3 + $0x1a8] sm:$0xff] %v1108_v5  ;;  %v1014_v10 = vadd.f32 %v1354_v8, %v1699_v1  ;;  %v1046_v11 = vadd.f32 %v1402_v9, %v1699_v1  ;;  %v580_v12 = vpop.f32.mrb[23].mxu0  ;;  %v740_v13 = vpop.f32.mrb[23].mxu1 }
 0x106   :  { %1139 = vst [vmem:[%s1960_s3 + $0xa0] sm:$0xff] %v1075_v6  ;;  %1171 = vst [vmem:[%s1960_s3 + $0x1a0] sm:$0xff] %v1107_v7  ;;  %v1013_v14 = vadd.f32 %v1699_v1, %v580_v12  ;;  %v1045_v15 = vadd.f32 %v1699_v1, %v740_v13 }
 0x107   :  { %v1078_v16 = vmax.f32 %v1014_v10, 0.0  ;;  %v1110_v17 = vmax.f32 %v1046_v11, 0.0 }
 0x108   :  { %v1077_v18 = vmax.f32 %v1013_v14, 0.0  ;;  %v1109_v19 = vmax.f32 %v1045_v15, 0.0  ;;  %v1357_v20 = vpop.f32.mrb[24].mxu0  ;;  %v1405_v21 = vpop.f32.mrb[24].mxu1 }
 0x109   :  { %1142 = vst [vmem:[%s1960_s3 + $0xb8] sm:$0xff] %v1078_v16  ;;  %1174 = vst [vmem:[%s1960_s3 + $0x1b8] sm:$0xff] %v1110_v17  ;;  %v1016_v22 = vadd.f32 %v1357_v20, %v1699_v1  ;;  %v1048_v23 = vadd.f32 %v1405_v21, %v1699_v1  ;;  %v590_v24 = vpop.f32.mrb[25].mxu0  ;;  %v750_v25 = vpop.f32.mrb[25].mxu1 }
 0x10a   :  { %1141 = vst [vmem:[%s1960_s3 + $0xb0] sm:$0xff] %v1077_v18  ;;  %1173 = vst [vmem:[%s1960_s3 + $0x1b0] sm:$0xff] %v1109_v19  ;;  %v1015_v26 = vadd.f32 %v1699_v1, %v590_v24  ;;  %v1047_v27 = vadd.f32 %v1699_v1, %v750_v25 }
 0x10b   :  { %v1080_v28 = vmax.f32 %v1016_v22, 0.0  ;;  %v1112_v29 = vmax.f32 %v1048_v23, 0.0 }
 0x10c   :  { %v1079_v30 = vmax.f32 %v1015_v26, 0.0  ;;  %v1111_v31 = vmax.f32 %v1047_v27, 0.0  ;;  %v1360_v32 = vpop.f32.mrb[26].mxu0  ;;  %v1408_v33 = vpop.f32.mrb[26].mxu1 }
 0x10d   :  { %1144 = vst [vmem:[%s1960_s3 + $0xc8] sm:$0xff] %v1080_v28  ;;  %1176 = vst [vmem:[%s1960_s3 + $0x1c8] sm:$0xff] %v1112_v29  ;;  %v1018_v34 = vadd.f32 %v1360_v32, %v1699_v1  ;;  %v1050_v35 = vadd.f32 %v1408_v33, %v1699_v1  ;;  %v600_v36 = vpop.f32.mrb[27].mxu0  ;;  %v760_v37 = vpop.f32.mrb[27].mxu1 }
 0x10e   :  { %1143 = vst [vmem:[%s1960_s3 + $0xc0] sm:$0xff] %v1079_v30  ;;  %1175 = vst [vmem:[%s1960_s3 + $0x1c0] sm:$0xff] %v1111_v31  ;;  %v1017_v38 = vadd.f32 %v1699_v1, %v600_v36  ;;  %v1049_v39 = vadd.f32 %v1699_v1, %v760_v37 }
 0x10f   :  { %v1082_v40 = vmax.f32 %v1018_v34, 0.0  ;;  %v1114_v41 = vmax.f32 %v1050_v35, 0.0 }
 0x110   :  { %v1081_v42 = vmax.f32 %v1017_v38, 0.0  ;;  %v1113_v43 = vmax.f32 %v1049_v39, 0.0  ;;  %v1363_v44 = vpop.f32.mrb[28].mxu0  ;;  %v1411_v45 = vpop.f32.mrb[28].mxu1 }
 0x111   :  { %1146 = vst [vmem:[%s1960_s3 + $0xd8] sm:$0xff] %v1082_v40  ;;  %1178 = vst [vmem:[%s1960_s3 + $0x1d8] sm:$0xff] %v1114_v41  ;;  %v1020_v46 = vadd.f32 %v1363_v44, %v1699_v1  ;;  %v1052_v47 = vadd.f32 %v1411_v45, %v1699_v1  ;;  %v610_v48 = vpop.f32.mrb[29].mxu0  ;;  %v770_v49 = vpop.f32.mrb[29].mxu1 }
 0x112   :  { %1145 = vst [vmem:[%s1960_s3 + $0xd0] sm:$0xff] %v1081_v42  ;;  %1177 = vst [vmem:[%s1960_s3 + $0x1d0] sm:$0xff] %v1113_v43  ;;  %v1019_v50 = vadd.f32 %v1699_v1, %v610_v48  ;;  %v1051_v51 = vadd.f32 %v1699_v1, %v770_v49 }
 0x113   :  { %v1084_v52 = vmax.f32 %v1020_v46, 0.0  ;;  %v1116_v53 = vmax.f32 %v1052_v47, 0.0 }
 0x114   :  { %v1083_v54 = vmax.f32 %v1019_v50, 0.0  ;;  %v1115_v55 = vmax.f32 %v1051_v51, 0.0  ;;  %v1366_v56 = vpop.f32.mrb[30].mxu0  ;;  %v1414_v57 = vpop.f32.mrb[30].mxu1 }
 0x115   :  { %1148 = vst [vmem:[%s1960_s3 + $0xe8] sm:$0xff] %v1084_v52  ;;  %1180 = vst [vmem:[%s1960_s3 + $0x1e8] sm:$0xff] %v1116_v53  ;;  %v1022_v58 = vadd.f32 %v1366_v56, %v1699_v1  ;;  %v1054_v59 = vadd.f32 %v1414_v57, %v1699_v1  ;;  %v620_v60 = vpop.f32.mrb[31].mxu0  ;;  %v780_v61 = vpop.f32.mrb[31].mxu1 }
 0x116   :  { %1147 = vst [vmem:[%s1960_s3 + $0xe0] sm:$0xff] %v1083_v54  ;;  %1179 = vst [vmem:[%s1960_s3 + $0x1e0] sm:$0xff] %v1115_v55  ;;  %v1021_v62 = vadd.f32 %v1699_v1, %v620_v60  ;;  %v1053_v63 = vadd.f32 %v1699_v1, %v780_v61 }
 0x117   :  { %v1086_v0 = vmax.f32 %v1022_v58, 0.0  ;;  %v1118_v2 = vmax.f32 %v1054_v59, 0.0 }
 0x118   :  { %v1085_v3 = vmax.f32 %v1021_v62, 0.0  ;;  %v1117_v4 = vmax.f32 %v1053_v63, 0.0 }
 0x119   :  { %1150 = vst [vmem:[%s1960_s3 + $0xf8] sm:$0xff] %v1086_v0  ;;  %1182 = vst [vmem:[%s1960_s3 + $0x1f8] sm:$0xff] %v1118_v2 }
 0x11a   :  { %1149 = vst [vmem:[%s1960_s3 + $0xf0] sm:$0xff] %v1085_v3  ;;  %1181 = vst [vmem:[%s1960_s3 + $0x1f0] sm:$0xff] %v1117_v4 }

// kernel: _lambda_.14
= control target key start
LH: loop header
LB: loop body
LE: loop exit
PB: predicated region body
PF: predicated region fallthrough
CT: control target
= control target key end

     0   :  { %vm211_vm0 = vcmask 64512   ;;  %s1893_s1 = inlined_call_operand.vmem [shape: f32[8,128], index: 1, kind: input, shape index: {}]   ;;  %s1894_s0 = inlined_call_operand.vmem [shape: f32[512,8], index: 0, kind: input, shape index: {}]   ;;  %s1895_s2 = inlined_call_operand.vmem [shape: f32[1,128], index: 2, kind: input, shape index: {}]   ;;  %s1896_s3 = inlined_call_operand.vmem [shape: f32[512,128], index: 3, kind: output, shape index: {}]  }
   0x1   :  { %v210_v0 = vld [vmem:[%s1893_s1] sm:$0xff]  ;;  %v147_v3 = vld [vmem:[%s1894_s0 + $0x8] sm:$0xff]  ;;  %v148_v5 = vld [vmem:[%s1894_s0 + $0x10] sm:$0xff] }
   0x2   :  { %v146_v1 = vld [vmem:[%s1894_s0] sm:$0xff]  ;;  %1253 = vmatprep.subr.mxu0 %v210_v0  ;;  %1351 = vmatprep.subr.mxu1 %v210_v0  ;;  %v179_v4 = vld [vmem:[%s1894_s0 + $0x108] sm:$0xff]  ;;  %v180_v6 = vld [vmem:[%s1894_s0 + $0x110] sm:$0xff] }
   0x3   :  { %v178_v2 = vld [vmem:[%s1894_s0 + $0x100] sm:$0xff]  ;;  %1254 = vmatpush3.msra.mxu0 %v210_v0  ;;  %1352 = vmatpush3.msra.mxu1 %v210_v0  ;;  %v149_v7 = vld [vmem:[%s1894_s0 + $0x18] sm:$0xff]  ;;  %v151_v11 = vld [vmem:[%s1894_s0 + $0x28] sm:$0xff] }
   0x4   :  { %1255 = vmatprep.mubr.msk.f32.mxu0 %vm211_vm0, %v146_v1  ;;  %1303 = vmatprep.mubr.msk.f32.mxu1 %vm211_vm0, %v178_v2  ;;  %v181_v8 = vld [vmem:[%s1894_s0 + $0x118] sm:$0xff]  ;;  %v150_v9 = vld [vmem:[%s1894_s0 + $0x20] sm:$0xff]  ;;  %v183_v12 = vld [vmem:[%s1894_s0 + $0x128] sm:$0xff] }
   0x5   :  { %1256 = vmatmul.mubr.msk.f32.vlgmr.msra.gmra.mrb[0].mxu0 %vm211_vm0, %v147_v3  ;;  %1304 = vmatmul.mubr.msk.f32.vlgmr.msra.gmra.mrb[0].mxu1 %vm211_vm0, %v179_v4  ;;  %v182_v10 = vld [vmem:[%s1894_s0 + $0x120] sm:$0xff]  ;;  %v152_v13 = vld [vmem:[%s1894_s0 + $0x30] sm:$0xff]  ;;  %v153_v15 = vld [vmem:[%s1894_s0 + $0x38] sm:$0xff] }
   0x6   :  { %1258 = vmatprep.mubr.msk.f32.mxu0 %vm211_vm0, %v148_v5  ;;  %1306 = vmatprep.mubr.msk.f32.mxu1 %vm211_vm0, %v180_v6  ;;  %v184_v14 = vld [vmem:[%s1894_s0 + $0x130] sm:$0xff]  ;;  %v185_v16 = vld [vmem:[%s1894_s0 + $0x138] sm:$0xff]  ;;  %v154_v17 = vld [vmem:[%s1894_s0 + $0x40] sm:$0xff] }
   0x7   :  { %v186_v18 = vld [vmem:[%s1894_s0 + $0x140] sm:$0xff]  ;;  %v155_v19 = vld [vmem:[%s1894_s0 + $0x48] sm:$0xff]  ;;  %v156_v21 = vld [vmem:[%s1894_s0 + $0x50] sm:$0xff] }
   0x8   :  { %v187_v20 = vld [vmem:[%s1894_s0 + $0x148] sm:$0xff]  ;;  %v188_v22 = vld [vmem:[%s1894_s0 + $0x150] sm:$0xff]  ;;  %v157_v23 = vld [vmem:[%s1894_s0 + $0x58] sm:$0xff] }
   0x9   :  { %1259 = vmatmul.mubr.msk.f32.gmra.mrb[2].mxu0 %vm211_vm0, %v149_v7  ;;  %1307 = vmatmul.mubr.msk.f32.gmra.mrb[2].mxu1 %vm211_vm0, %v181_v8  ;;  %v189_v24 = vld [vmem:[%s1894_s0 + $0x158] sm:$0xff]  ;;  %v158_v25 = vld [vmem:[%s1894_s0 + $0x60] sm:$0xff]  ;;  %v159_v27 = vld [vmem:[%s1894_s0 + $0x68] sm:$0xff] }
   0xa   :  { %1261 = vmatprep.mubr.msk.f32.mxu0 %vm211_vm0, %v150_v9  ;;  %1309 = vmatprep.mubr.msk.f32.mxu1 %vm211_vm0, %v182_v10  ;;  %v190_v26 = vld [vmem:[%s1894_s0 + $0x160] sm:$0xff]  ;;  %v191_v28 = vld [vmem:[%s1894_s0 + $0x168] sm:$0xff]  ;;  %v160_v29 = vld [vmem:[%s1894_s0 + $0x70] sm:$0xff] }
   0xb   :  { %v192_v30 = vld [vmem:[%s1894_s0 + $0x170] sm:$0xff]  ;;  %v161_v31 = vld [vmem:[%s1894_s0 + $0x78] sm:$0xff]  ;;  %v162_v33 = vld [vmem:[%s1894_s0 + $0x80] sm:$0xff] }
   0xc   :  { %v193_v32 = vld [vmem:[%s1894_s0 + $0x178] sm:$0xff]  ;;  %v194_v34 = vld [vmem:[%s1894_s0 + $0x180] sm:$0xff]  ;;  %v163_v35 = vld [vmem:[%s1894_s0 + $0x88] sm:$0xff] }
   0xd   :  { %1262 = vmatmul.mubr.msk.f32.gmra.mrb[4].mxu0 %vm211_vm0, %v151_v11  ;;  %1310 = vmatmul.mubr.msk.f32.gmra.mrb[4].mxu1 %vm211_vm0, %v183_v12  ;;  %v195_v36 = vld [vmem:[%s1894_s0 + $0x188] sm:$0xff]  ;;  %v164_v37 = vld [vmem:[%s1894_s0 + $0x90] sm:$0xff]  ;;  %v165_v39 = vld [vmem:[%s1894_s0 + $0x98] sm:$0xff] }
   0xe   :  { %1264 = vmatprep.mubr.msk.f32.mxu0 %vm211_vm0, %v152_v13  ;;  %1312 = vmatprep.mubr.msk.f32.mxu1 %vm211_vm0, %v184_v14  ;;  %v196_v38 = vld [vmem:[%s1894_s0 + $0x190] sm:$0xff]  ;;  %v197_v40 = vld [vmem:[%s1894_s0 + $0x198] sm:$0xff]  ;;  %v166_v41 = vld [vmem:[%s1894_s0 + $0xa0] sm:$0xff] }
   0xf   :  { %v198_v42 = vld [vmem:[%s1894_s0 + $0x1a0] sm:$0xff]  ;;  %v167_v43 = vld [vmem:[%s1894_s0 + $0xa8] sm:$0xff]  ;;  %v168_v45 = vld [vmem:[%s1894_s0 + $0xb0] sm:$0xff] }
  0x10   :  { %v199_v44 = vld [vmem:[%s1894_s0 + $0x1a8] sm:$0xff]  ;;  %v200_v46 = vld [vmem:[%s1894_s0 + $0x1b0] sm:$0xff]  ;;  %v169_v47 = vld [vmem:[%s1894_s0 + $0xb8] sm:$0xff] }
  0x11   :  { %1265 = vmatmul.mubr.msk.f32.gmra.mrb[6].mxu0 %vm211_vm0, %v153_v15  ;;  %1313 = vmatmul.mubr.msk.f32.gmra.mrb[6].mxu1 %vm211_vm0, %v185_v16  ;;  %v201_v48 = vld [vmem:[%s1894_s0 + $0x1b8] sm:$0xff]  ;;  %v170_v49 = vld [vmem:[%s1894_s0 + $0xc0] sm:$0xff]  ;;  %v171_v51 = vld [vmem:[%s1894_s0 + $0xc8] sm:$0xff] }
  0x12   :  { %1267 = vmatprep.mubr.msk.f32.mxu0 %vm211_vm0, %v154_v17  ;;  %1315 = vmatprep.mubr.msk.f32.mxu1 %vm211_vm0, %v186_v18  ;;  %v202_v50 = vld [vmem:[%s1894_s0 + $0x1c0] sm:$0xff]  ;;  %v203_v52 = vld [vmem:[%s1894_s0 + $0x1c8] sm:$0xff]  ;;  %v172_v53 = vld [vmem:[%s1894_s0 + $0xd0] sm:$0xff] }
  0x13   :  { %v204_v54 = vld [vmem:[%s1894_s0 + $0x1d0] sm:$0xff]  ;;  %v173_v55 = vld [vmem:[%s1894_s0 + $0xd8] sm:$0xff]  ;;  %v174_v57 = vld [vmem:[%s1894_s0 + $0xe0] sm:$0xff] }
  0x14   :  { %v205_v56 = vld [vmem:[%s1894_s0 + $0x1d8] sm:$0xff]  ;;  %v206_v58 = vld [vmem:[%s1894_s0 + $0x1e0] sm:$0xff]  ;;  %v175_v59 = vld [vmem:[%s1894_s0 + $0xe8] sm:$0xff] }
  0x15   :  { %1268 = vmatmul.mubr.msk.f32.gmra.mrb[8].mxu0 %vm211_vm0, %v155_v19  ;;  %1316 = vmatmul.mubr.msk.f32.gmra.mrb[8].mxu1 %vm211_vm0, %v187_v20  ;;  %v207_v60 = vld [vmem:[%s1894_s0 + $0x1e8] sm:$0xff]  ;;  %v176_v61 = vld [vmem:[%s1894_s0 + $0xf0] sm:$0xff]  ;;  %v177_v63 = vld [vmem:[%s1894_s0 + $0xf8] sm:$0xff] }
  0x16   :  { %1270 = vmatprep.mubr.msk.f32.mxu0 %vm211_vm0, %v156_v21  ;;  %1318 = vmatprep.mubr.msk.f32.mxu1 %vm211_vm0, %v188_v22  ;;  %v208_v62 = vld [vmem:[%s1894_s0 + $0x1f0] sm:$0xff]  ;;  %v209_v0 = vld [vmem:[%s1894_s0 + $0x1f8] sm:$0xff]  ;;  %v1635_v1 = vld [vmem:[%s1895_s2] ss:$0 sm:$0xff] }
  0x19   :  { %1271 = vmatmul.mubr.msk.f32.gmra.mrb[10].mxu0 %vm211_vm0, %v157_v23  ;;  %1319 = vmatmul.mubr.msk.f32.gmra.mrb[10].mxu1 %vm211_vm0, %v189_v24 }
  0x1a   :  { %1273 = vmatprep.mubr.msk.f32.mxu0 %vm211_vm0, %v158_v25  ;;  %1321 = vmatprep.mubr.msk.f32.mxu1 %vm211_vm0, %v190_v26 }
  0x1d   :  { %1274 = vmatmul.mubr.msk.f32.gmra.mrb[12].mxu0 %vm211_vm0, %v159_v27  ;;  %1322 = vmatmul.mubr.msk.f32.gmra.mrb[12].mxu1 %vm211_vm0, %v191_v28 }
  0x1e   :  { %1276 = vmatprep.mubr.msk.f32.mxu0 %vm211_vm0, %v160_v29  ;;  %1324 = vmatprep.mubr.msk.f32.mxu1 %vm211_vm0, %v192_v30 }
  0x21   :  { %1277 = vmatmul.mubr.msk.f32.gmra.mrb[14].mxu0 %vm211_vm0, %v161_v31  ;;  %1325 = vmatmul.mubr.msk.f32.gmra.mrb[14].mxu1 %vm211_vm0, %v193_v32 }
  0x22   :  { %1279 = vmatprep.mubr.msk.f32.mxu0 %vm211_vm0, %v162_v33  ;;  %1327 = vmatprep.mubr.msk.f32.mxu1 %vm211_vm0, %v194_v34 }
  0x25   :  { %1280 = vmatmul.mubr.msk.f32.gmra.mrb[16].mxu0 %vm211_vm0, %v163_v35  ;;  %1328 = vmatmul.mubr.msk.f32.gmra.mrb[16].mxu1 %vm211_vm0, %v195_v36 }
  0x26   :  { %1282 = vmatprep.mubr.msk.f32.mxu0 %vm211_vm0, %v164_v37  ;;  %1330 = vmatprep.mubr.msk.f32.mxu1 %vm211_vm0, %v196_v38 }
  0x29   :  { %1283 = vmatmul.mubr.msk.f32.gmra.mrb[18].mxu0 %vm211_vm0, %v165_v39  ;;  %1331 = vmatmul.mubr.msk.f32.gmra.mrb[18].mxu1 %vm211_vm0, %v197_v40 }
  0x2a   :  { %1285 = vmatprep.mubr.msk.f32.mxu0 %vm211_vm0, %v166_v41  ;;  %1333 = vmatprep.mubr.msk.f32.mxu1 %vm211_vm0, %v198_v42 }
  0x2d   :  { %1286 = vmatmul.mubr.msk.f32.gmra.mrb[20].mxu0 %vm211_vm0, %v167_v43  ;;  %1334 = vmatmul.mubr.msk.f32.gmra.mrb[20].mxu1 %vm211_vm0, %v199_v44 }
  0x2e   :  { %1288 = vmatprep.mubr.msk.f32.mxu0 %vm211_vm0, %v168_v45  ;;  %1336 = vmatprep.mubr.msk.f32.mxu1 %vm211_vm0, %v200_v46 }
  0x31   :  { %1289 = vmatmul.mubr.msk.f32.gmra.mrb[22].mxu0 %vm211_vm0, %v169_v47  ;;  %1337 = vmatmul.mubr.msk.f32.gmra.mrb[22].mxu1 %vm211_vm0, %v201_v48 }
  0x32   :  { %1291 = vmatprep.mubr.msk.f32.mxu0 %vm211_vm0, %v170_v49  ;;  %1339 = vmatprep.mubr.msk.f32.mxu1 %vm211_vm0, %v202_v50 }
  0x35   :  { %1292 = vmatmul.mubr.msk.f32.gmra.mrb[24].mxu0 %vm211_vm0, %v171_v51  ;;  %1340 = vmatmul.mubr.msk.f32.gmra.mrb[24].mxu1 %vm211_vm0, %v203_v52 }
  0x36   :  { %1294 = vmatprep.mubr.msk.f32.mxu0 %vm211_vm0, %v172_v53  ;;  %1342 = vmatprep.mubr.msk.f32.mxu1 %vm211_vm0, %v204_v54 }
  0x39   :  { %1295 = vmatmul.mubr.msk.f32.gmra.mrb[26].mxu0 %vm211_vm0, %v173_v55  ;;  %1343 = vmatmul.mubr.msk.f32.gmra.mrb[26].mxu1 %vm211_vm0, %v205_v56 }
  0x3a   :  { %1297 = vmatprep.mubr.msk.f32.mxu0 %vm211_vm0, %v174_v57  ;;  %1345 = vmatprep.mubr.msk.f32.mxu1 %vm211_vm0, %v206_v58 }
  0x3d   :  { %1298 = vmatmul.mubr.msk.f32.gmra.mrb[28].mxu0 %vm211_vm0, %v175_v59  ;;  %1346 = vmatmul.mubr.msk.f32.gmra.mrb[28].mxu1 %vm211_vm0, %v207_v60 }
  0x3e   :  { %1300 = vmatprep.mubr.msk.f32.mxu0 %vm211_vm0, %v176_v61  ;;  %1348 = vmatprep.mubr.msk.f32.mxu1 %vm211_vm0, %v208_v62 }
  0x41   :  { %1301 = vmatmul.mubr.msk.f32.gmra.mrb[30].mxu0 %vm211_vm0, %v177_v63  ;;  %1349 = vmatmul.mubr.msk.f32.gmra.mrb[30].mxu1 %vm211_vm0, %v209_v0 }
  0xd8   :  { %v1257_v2 = vpop.f32.mrb[0].mxu0  ;;  %v1305_v3 = vpop.f32.mrb[0].mxu1 }
  0xd9   :  { %v992_v4 = vadd.f32 %v1257_v2, %v1635_v1  ;;  %v1024_v5 = vadd.f32 %v1305_v3, %v1635_v1  ;;  %v470_v6 = vpop.f32.mrb[1].mxu0  ;;  %v630_v7 = vpop.f32.mrb[1].mxu1 }
  0xda   :  { %v991_v8 = vadd.f32 %v1635_v1, %v470_v6  ;;  %v1023_v9 = vadd.f32 %v1635_v1, %v630_v7 }
  0xdb   :  { %1056 = vst [vmem:[%s1896_s3 + $0x8] sm:$0xff] %v992_v4  ;;  %1088 = vst [vmem:[%s1896_s3 + $0x108] sm:$0xff] %v1024_v5 }
  0xdc   :  { %1055 = vst [vmem:[%s1896_s3] sm:$0xff] %v991_v8  ;;  %1087 = vst [vmem:[%s1896_s3 + $0x100] sm:$0xff] %v1023_v9  ;;  %v1260_v10 = vpop.f32.mrb[2].mxu0  ;;  %v1308_v11 = vpop.f32.mrb[2].mxu1 }
  0xdd   :  { %v994_v12 = vadd.f32 %v1260_v10, %v1635_v1  ;;  %v1026_v13 = vadd.f32 %v1308_v11, %v1635_v1  ;;  %v480_v14 = vpop.f32.mrb[3].mxu0  ;;  %v640_v15 = vpop.f32.mrb[3].mxu1 }
  0xde   :  { %v993_v16 = vadd.f32 %v1635_v1, %v480_v14  ;;  %v1025_v17 = vadd.f32 %v1635_v1, %v640_v15 }
  0xdf   :  { %1058 = vst [vmem:[%s1896_s3 + $0x18] sm:$0xff] %v994_v12  ;;  %1090 = vst [vmem:[%s1896_s3 + $0x118] sm:$0xff] %v1026_v13 }
  0xe0   :  { %1057 = vst [vmem:[%s1896_s3 + $0x10] sm:$0xff] %v993_v16  ;;  %1089 = vst [vmem:[%s1896_s3 + $0x110] sm:$0xff] %v1025_v17  ;;  %v1263_v18 = vpop.f32.mrb[4].mxu0  ;;  %v1311_v19 = vpop.f32.mrb[4].mxu1 }
  0xe1   :  { %v996_v20 = vadd.f32 %v1263_v18, %v1635_v1  ;;  %v1028_v21 = vadd.f32 %v1311_v19, %v1635_v1  ;;  %v490_v22 = vpop.f32.mrb[5].mxu0  ;;  %v650_v23 = vpop.f32.mrb[5].mxu1 }
  0xe2   :  { %v995_v24 = vadd.f32 %v1635_v1, %v490_v22  ;;  %v1027_v25 = vadd.f32 %v1635_v1, %v650_v23 }
  0xe3   :  { %1060 = vst [vmem:[%s1896_s3 + $0x28] sm:$0xff] %v996_v20  ;;  %1092 = vst [vmem:[%s1896_s3 + $0x128] sm:$0xff] %v1028_v21 }
  0xe4   :  { %1059 = vst [vmem:[%s1896_s3 + $0x20] sm:$0xff] %v995_v24  ;;  %1091 = vst [vmem:[%s1896_s3 + $0x120] sm:$0xff] %v1027_v25  ;;  %v1266_v26 = vpop.f32.mrb[6].mxu0  ;;  %v1314_v27 = vpop.f32.mrb[6].mxu1 }
  0xe5   :  { %v998_v28 = vadd.f32 %v1266_v26, %v1635_v1  ;;  %v1030_v29 = vadd.f32 %v1314_v27, %v1635_v1  ;;  %v500_v30 = vpop.f32.mrb[7].mxu0  ;;  %v660_v31 = vpop.f32.mrb[7].mxu1 }
  0xe6   :  { %v997_v32 = vadd.f32 %v1635_v1, %v500_v30  ;;  %v1029_v33 = vadd.f32 %v1635_v1, %v660_v31 }
  0xe7   :  { %1062 = vst [vmem:[%s1896_s3 + $0x38] sm:$0xff] %v998_v28  ;;  %1094 = vst [vmem:[%s1896_s3 + $0x138] sm:$0xff] %v1030_v29 }
  0xe8   :  { %1061 = vst [vmem:[%s1896_s3 + $0x30] sm:$0xff] %v997_v32  ;;  %1093 = vst [vmem:[%s1896_s3 + $0x130] sm:$0xff] %v1029_v33  ;;  %v1269_v34 = vpop.f32.mrb[8].mxu0  ;;  %v1317_v35 = vpop.f32.mrb[8].mxu1 }
  0xe9   :  { %v1000_v36 = vadd.f32 %v1269_v34, %v1635_v1  ;;  %v1032_v37 = vadd.f32 %v1317_v35, %v1635_v1  ;;  %v510_v38 = vpop.f32.mrb[9].mxu0  ;;  %v670_v39 = vpop.f32.mrb[9].mxu1 }
  0xea   :  { %v999_v40 = vadd.f32 %v1635_v1, %v510_v38  ;;  %v1031_v41 = vadd.f32 %v1635_v1, %v670_v39 }
  0xeb   :  { %1064 = vst [vmem:[%s1896_s3 + $0x48] sm:$0xff] %v1000_v36  ;;  %1096 = vst [vmem:[%s1896_s3 + $0x148] sm:$0xff] %v1032_v37 }
  0xec   :  { %1063 = vst [vmem:[%s1896_s3 + $0x40] sm:$0xff] %v999_v40  ;;  %1095 = vst [vmem:[%s1896_s3 + $0x140] sm:$0xff] %v1031_v41  ;;  %v1272_v42 = vpop.f32.mrb[10].mxu0  ;;  %v1320_v43 = vpop.f32.mrb[10].mxu1 }
  0xed   :  { %v1002_v44 = vadd.f32 %v1272_v42, %v1635_v1  ;;  %v1034_v45 = vadd.f32 %v1320_v43, %v1635_v1  ;;  %v520_v46 = vpop.f32.mrb[11].mxu0  ;;  %v680_v47 = vpop.f32.mrb[11].mxu1 }
  0xee   :  { %v1001_v48 = vadd.f32 %v1635_v1, %v520_v46  ;;  %v1033_v49 = vadd.f32 %v1635_v1, %v680_v47 }
  0xef   :  { %1066 = vst [vmem:[%s1896_s3 + $0x58] sm:$0xff] %v1002_v44  ;;  %1098 = vst [vmem:[%s1896_s3 + $0x158] sm:$0xff] %v1034_v45 }
  0xf0   :  { %1065 = vst [vmem:[%s1896_s3 + $0x50] sm:$0xff] %v1001_v48  ;;  %1097 = vst [vmem:[%s1896_s3 + $0x150] sm:$0xff] %v1033_v49  ;;  %v1275_v50 = vpop.f32.mrb[12].mxu0  ;;  %v1323_v51 = vpop.f32.mrb[12].mxu1 }
  0xf1   :  { %v1004_v52 = vadd.f32 %v1275_v50, %v1635_v1  ;;  %v1036_v53 = vadd.f32 %v1323_v51, %v1635_v1  ;;  %v530_v54 = vpop.f32.mrb[13].mxu0  ;;  %v690_v55 = vpop.f32.mrb[13].mxu1 }
  0xf2   :  { %v1003_v56 = vadd.f32 %v1635_v1, %v530_v54  ;;  %v1035_v57 = vadd.f32 %v1635_v1, %v690_v55 }
  0xf3   :  { %1068 = vst [vmem:[%s1896_s3 + $0x68] sm:$0xff] %v1004_v52  ;;  %1100 = vst [vmem:[%s1896_s3 + $0x168] sm:$0xff] %v1036_v53 }
  0xf4   :  { %1067 = vst [vmem:[%s1896_s3 + $0x60] sm:$0xff] %v1003_v56  ;;  %1099 = vst [vmem:[%s1896_s3 + $0x160] sm:$0xff] %v1035_v57  ;;  %v1278_v58 = vpop.f32.mrb[14].mxu0  ;;  %v1326_v59 = vpop.f32.mrb[14].mxu1 }
  0xf5   :  { %v1006_v60 = vadd.f32 %v1278_v58, %v1635_v1  ;;  %v1038_v61 = vadd.f32 %v1326_v59, %v1635_v1  ;;  %v540_v62 = vpop.f32.mrb[15].mxu0  ;;  %v700_v63 = vpop.f32.mrb[15].mxu1 }
  0xf6   :  { %v1005_v0 = vadd.f32 %v1635_v1, %v540_v62  ;;  %v1037_v2 = vadd.f32 %v1635_v1, %v700_v63 }
  0xf7   :  { %1070 = vst [vmem:[%s1896_s3 + $0x78] sm:$0xff] %v1006_v60  ;;  %1102 = vst [vmem:[%s1896_s3 + $0x178] sm:$0xff] %v1038_v61 }
  0xf8   :  { %1069 = vst [vmem:[%s1896_s3 + $0x70] sm:$0xff] %v1005_v0  ;;  %1101 = vst [vmem:[%s1896_s3 + $0x170] sm:$0xff] %v1037_v2  ;;  %v1281_v3 = vpop.f32.mrb[16].mxu0  ;;  %v1329_v4 = vpop.f32.mrb[16].mxu1 }
  0xf9   :  { %v1008_v5 = vadd.f32 %v1281_v3, %v1635_v1  ;;  %v1040_v6 = vadd.f32 %v1329_v4, %v1635_v1  ;;  %v550_v7 = vpop.f32.mrb[17].mxu0  ;;  %v710_v8 = vpop.f32.mrb[17].mxu1 }
  0xfa   :  { %v1007_v9 = vadd.f32 %v1635_v1, %v550_v7  ;;  %v1039_v10 = vadd.f32 %v1635_v1, %v710_v8 }
  0xfb   :  { %1072 = vst [vmem:[%s1896_s3 + $0x88] sm:$0xff] %v1008_v5  ;;  %1104 = vst [vmem:[%s1896_s3 + $0x188] sm:$0xff] %v1040_v6 }
  0xfc   :  { %1071 = vst [vmem:[%s1896_s3 + $0x80] sm:$0xff] %v1007_v9  ;;  %1103 = vst [vmem:[%s1896_s3 + $0x180] sm:$0xff] %v1039_v10  ;;  %v1284_v11 = vpop.f32.mrb[18].mxu0  ;;  %v1332_v12 = vpop.f32.mrb[18].mxu1 }
  0xfd   :  { %v1010_v13 = vadd.f32 %v1284_v11, %v1635_v1  ;;  %v1042_v14 = vadd.f32 %v1332_v12, %v1635_v1  ;;  %v560_v15 = vpop.f32.mrb[19].mxu0  ;;  %v720_v16 = vpop.f32.mrb[19].mxu1 }
  0xfe   :  { %v1009_v17 = vadd.f32 %v1635_v1, %v560_v15  ;;  %v1041_v18 = vadd.f32 %v1635_v1, %v720_v16 }
  0xff   :  { %1074 = vst [vmem:[%s1896_s3 + $0x98] sm:$0xff] %v1010_v13  ;;  %1106 = vst [vmem:[%s1896_s3 + $0x198] sm:$0xff] %v1042_v14 }
 0x100   :  { %1073 = vst [vmem:[%s1896_s3 + $0x90] sm:$0xff] %v1009_v17  ;;  %1105 = vst [vmem:[%s1896_s3 + $0x190] sm:$0xff] %v1041_v18  ;;  %v1287_v19 = vpop.f32.mrb[20].mxu0  ;;  %v1335_v20 = vpop.f32.mrb[20].mxu1 }
 0x101   :  { %v1012_v21 = vadd.f32 %v1287_v19, %v1635_v1  ;;  %v1044_v22 = vadd.f32 %v1335_v20, %v1635_v1  ;;  %v570_v23 = vpop.f32.mrb[21].mxu0  ;;  %v730_v24 = vpop.f32.mrb[21].mxu1 }
 0x102   :  { %v1011_v25 = vadd.f32 %v1635_v1, %v570_v23  ;;  %v1043_v26 = vadd.f32 %v1635_v1, %v730_v24 }
 0x103   :  { %1076 = vst [vmem:[%s1896_s3 + $0xa8] sm:$0xff] %v1012_v21  ;;  %1108 = vst [vmem:[%s1896_s3 + $0x1a8] sm:$0xff] %v1044_v22 }
 0x104   :  { %1075 = vst [vmem:[%s1896_s3 + $0xa0] sm:$0xff] %v1011_v25  ;;  %1107 = vst [vmem:[%s1896_s3 + $0x1a0] sm:$0xff] %v1043_v26  ;;  %v1290_v27 = vpop.f32.mrb[22].mxu0  ;;  %v1338_v28 = vpop.f32.mrb[22].mxu1 }
 0x105   :  { %v1014_v29 = vadd.f32 %v1290_v27, %v1635_v1  ;;  %v1046_v30 = vadd.f32 %v1338_v28, %v1635_v1  ;;  %v580_v31 = vpop.f32.mrb[23].mxu0  ;;  %v740_v32 = vpop.f32.mrb[23].mxu1 }
 0x106   :  { %v1013_v33 = vadd.f32 %v1635_v1, %v580_v31  ;;  %v1045_v34 = vadd.f32 %v1635_v1, %v740_v32 }
 0x107   :  { %1078 = vst [vmem:[%s1896_s3 + $0xb8] sm:$0xff] %v1014_v29  ;;  %1110 = vst [vmem:[%s1896_s3 + $0x1b8] sm:$0xff] %v1046_v30 }
 0x108   :  { %1077 = vst [vmem:[%s1896_s3 + $0xb0] sm:$0xff] %v1013_v33  ;;  %1109 = vst [vmem:[%s1896_s3 + $0x1b0] sm:$0xff] %v1045_v34  ;;  %v1293_v35 = vpop.f32.mrb[24].mxu0  ;;  %v1341_v36 = vpop.f32.mrb[24].mxu1 }
 0x109   :  { %v1016_v37 = vadd.f32 %v1293_v35, %v1635_v1  ;;  %v1048_v38 = vadd.f32 %v1341_v36, %v1635_v1  ;;  %v590_v39 = vpop.f32.mrb[25].mxu0  ;;  %v750_v40 = vpop.f32.mrb[25].mxu1 }
 0x10a   :  { %v1015_v41 = vadd.f32 %v1635_v1, %v590_v39  ;;  %v1047_v42 = vadd.f32 %v1635_v1, %v750_v40 }
 0x10b   :  { %1080 = vst [vmem:[%s1896_s3 + $0xc8] sm:$0xff] %v1016_v37  ;;  %1112 = vst [vmem:[%s1896_s3 + $0x1c8] sm:$0xff] %v1048_v38 }
 0x10c   :  { %1079 = vst [vmem:[%s1896_s3 + $0xc0] sm:$0xff] %v1015_v41  ;;  %1111 = vst [vmem:[%s1896_s3 + $0x1c0] sm:$0xff] %v1047_v42  ;;  %v1296_v43 = vpop.f32.mrb[26].mxu0  ;;  %v1344_v44 = vpop.f32.mrb[26].mxu1 }
 0x10d   :  { %v1018_v45 = vadd.f32 %v1296_v43, %v1635_v1  ;;  %v1050_v46 = vadd.f32 %v1344_v44, %v1635_v1  ;;  %v600_v47 = vpop.f32.mrb[27].mxu0  ;;  %v760_v48 = vpop.f32.mrb[27].mxu1 }
 0x10e   :  { %v1017_v49 = vadd.f32 %v1635_v1, %v600_v47  ;;  %v1049_v50 = vadd.f32 %v1635_v1, %v760_v48 }
 0x10f   :  { %1082 = vst [vmem:[%s1896_s3 + $0xd8] sm:$0xff] %v1018_v45  ;;  %1114 = vst [vmem:[%s1896_s3 + $0x1d8] sm:$0xff] %v1050_v46 }
 0x110   :  { %1081 = vst [vmem:[%s1896_s3 + $0xd0] sm:$0xff] %v1017_v49  ;;  %1113 = vst [vmem:[%s1896_s3 + $0x1d0] sm:$0xff] %v1049_v50  ;;  %v1299_v51 = vpop.f32.mrb[28].mxu0  ;;  %v1347_v52 = vpop.f32.mrb[28].mxu1 }
 0x111   :  { %v1020_v53 = vadd.f32 %v1299_v51, %v1635_v1  ;;  %v1052_v54 = vadd.f32 %v1347_v52, %v1635_v1  ;;  %v610_v55 = vpop.f32.mrb[29].mxu0  ;;  %v770_v56 = vpop.f32.mrb[29].mxu1 }
 0x112   :  { %v1019_v57 = vadd.f32 %v1635_v1, %v610_v55  ;;  %v1051_v58 = vadd.f32 %v1635_v1, %v770_v56 }
 0x113   :  { %1084 = vst [vmem:[%s1896_s3 + $0xe8] sm:$0xff] %v1020_v53  ;;  %1116 = vst [vmem:[%s1896_s3 + $0x1e8] sm:$0xff] %v1052_v54 }
 0x114   :  { %1083 = vst [vmem:[%s1896_s3 + $0xe0] sm:$0xff] %v1019_v57  ;;  %1115 = vst [vmem:[%s1896_s3 + $0x1e0] sm:$0xff] %v1051_v58  ;;  %v1302_v59 = vpop.f32.mrb[30].mxu0  ;;  %v1350_v60 = vpop.f32.mrb[30].mxu1 }
 0x115   :  { %v1022_v61 = vadd.f32 %v1302_v59, %v1635_v1  ;;  %v1054_v62 = vadd.f32 %v1350_v60, %v1635_v1  ;;  %v620_v63 = vpop.f32.mrb[31].mxu0  ;;  %v780_v0 = vpop.f32.mrb[31].mxu1 }
 0x116   :  { %v1021_v2 = vadd.f32 %v1635_v1, %v620_v63  ;;  %v1053_v3 = vadd.f32 %v1635_v1, %v780_v0 }
 0x117   :  { %1086 = vst [vmem:[%s1896_s3 + $0xf8] sm:$0xff] %v1022_v61  ;;  %1118 = vst [vmem:[%s1896_s3 + $0x1f8] sm:$0xff] %v1054_v62 }
 0x118   :  { %1085 = vst [vmem:[%s1896_s3 + $0xf0] sm:$0xff] %v1021_v2  ;;  %1117 = vst [vmem:[%s1896_s3 + $0x1f0] sm:$0xff] %v1053_v3 }

// kernel: _lambda_.21
= control target key start
LH: loop header
LB: loop body
LE: loop exit
PB: predicated region body
PF: predicated region fallthrough
CT: control target
= control target key end

     0   :  { %vm68_vm0 = vcmask 130048   ;;  %s566_s1 = inlined_call_operand.vmem [shape: f32[16,128], index: 1, kind: input, shape index: {}]   ;;  %s567_s0 = inlined_call_operand.vmem [shape: f32[128,16], index: 0, kind: input, shape index: {}]   ;;  %s568_s2 = inlined_call_operand.vmem [shape: f32[1,128], index: 2, kind: input, shape index: {}]   ;;  %s569_s3 = inlined_call_operand.vmem [shape: f32[128,128], index: 3, kind: output, shape index: {}]  }
   0x1   :  { %v66_v0 = vld [vmem:[%s566_s1] sm:$0xff]  ;;  %v67_v1 = vld [vmem:[%s566_s1 + $0x8] sm:$0xff]  ;;  %v52_v7 = vld [vmem:[%s567_s0 + $0x10] sm:$0xff] }
   0x2   :  { %v50_v2 = vld [vmem:[%s567_s0] sm:$0xff]  ;;  %v419_v3 = vpack.c.bf16 %v67_v1, %v66_v0  ;;  %v51_v5 = vld [vmem:[%s567_s0 + $0x8] sm:$0xff]  ;;  %v60_v8 = vld [vmem:[%s567_s0 + $0x50] sm:$0xff] }
   0x3   :  { %395 = vmatprep.mubr.msk.f32.mxu0 %vm68_vm0, %v50_v2  ;;  %v58_v4 = vld [vmem:[%s567_s0 + $0x40] sm:$0xff]  ;;  %v59_v6 = vld [vmem:[%s567_s0 + $0x48] sm:$0xff]  ;;  %v53_v9 = vld [vmem:[%s567_s0 + $0x18] sm:$0xff] }
   0x4   :  { %407 = vmatprep.mubr.msk.f32.mxu1 %vm68_vm0, %v58_v4  ;;  %420 = vmatprep.subr.bf16.mxu0 %v419_v3  ;;  %v61_v10 = vld [vmem:[%s567_s0 + $0x58] sm:$0xff]  ;;  %v54_v11 = vld [vmem:[%s567_s0 + $0x20] sm:$0xff]  ;;  %v55_v13 = vld [vmem:[%s567_s0 + $0x28] sm:$0xff] }
   0x5   :  { %423 = vmatprep.subr.bf16.mxu1 %v419_v3  ;;  %422 = vmatpush3.bf16.msra.mxu0 %v419_v3  ;;  %v62_v12 = vld [vmem:[%s567_s0 + $0x60] sm:$0xff]  ;;  %v63_v14 = vld [vmem:[%s567_s0 + $0x68] sm:$0xff]  ;;  %v56_v15 = vld [vmem:[%s567_s0 + $0x30] sm:$0xff] }
   0x6   :  { %424 = vmatpush3.bf16.msra.mxu1 %v419_v3  ;;  %v64_v16 = vld [vmem:[%s567_s0 + $0x70] sm:$0xff]  ;;  %v57_v17 = vld [vmem:[%s567_s0 + $0x38] sm:$0xff]  ;;  %v372_v19 = vld [vmem:[%s568_s2] ss:$0 sm:$0xff] }
   0x7   :  { %v65_v18 = vld [vmem:[%s567_s0 + $0x78] sm:$0xff] }
   0x8   :  { %396 = vmatmul.mubr.msk.f32.vlgmr.msra.gmra.mrb[0].mxu0 %vm68_vm0, %v51_v5 }
   0x9   :  { %408 = vmatmul.mubr.msk.f32.vlgmr.msra.gmra.mrb[0].mxu1 %vm68_vm0, %v59_v6  ;;  %398 = vmatprep.mubr.msk.f32.mxu0 %vm68_vm0, %v52_v7 }
   0xa   :  { %410 = vmatprep.mubr.msk.f32.mxu1 %vm68_vm0, %v60_v8 }
   0xc   :  { %399 = vmatmul.mubr.msk.f32.gmra.mrb[2].mxu0 %vm68_vm0, %v53_v9 }
   0xd   :  { %411 = vmatmul.mubr.msk.f32.gmra.mrb[2].mxu1 %vm68_vm0, %v61_v10  ;;  %401 = vmatprep.mubr.msk.f32.mxu0 %vm68_vm0, %v54_v11 }
   0xe   :  { %413 = vmatprep.mubr.msk.f32.mxu1 %vm68_vm0, %v62_v12 }
  0x10   :  { %402 = vmatmul.mubr.msk.f32.gmra.mrb[4].mxu0 %vm68_vm0, %v55_v13 }
  0x11   :  { %414 = vmatmul.mubr.msk.f32.gmra.mrb[4].mxu1 %vm68_vm0, %v63_v14  ;;  %404 = vmatprep.mubr.msk.f32.mxu0 %vm68_vm0, %v56_v15 }
  0x12   :  { %416 = vmatprep.mubr.msk.f32.mxu1 %vm68_vm0, %v64_v16 }
  0x14   :  { %405 = vmatmul.mubr.msk.f32.gmra.mrb[6].mxu0 %vm68_vm0, %v57_v17 }
  0x15   :  { %417 = vmatmul.mubr.msk.f32.gmra.mrb[6].mxu1 %vm68_vm0, %v65_v18 }
  0xdb   :  { %v397_v20 = vpop.f32.mrb[0].mxu0 }
  0xdc   :  { %v409_v21 = vpop.f32.mrb[0].mxu1  ;;  %v321_v22 = vadd.f32 %v397_v20, %v372_v19  ;;  %v183_v24 = vpop.f32.mrb[1].mxu0 }
  0xdd   :  { %v329_v23 = vadd.f32 %v409_v21, %v372_v19  ;;  %v223_v25 = vpop.f32.mrb[1].mxu1  ;;  %v320_v26 = vadd.f32 %v372_v19, %v183_v24 }
  0xde   :  { %v328_v27 = vadd.f32 %v372_v19, %v223_v25  ;;  %337 = vst [vmem:[%s569_s3 + $0x8] sm:$0xff] %v321_v22 }
  0xdf   :  { %345 = vst [vmem:[%s569_s3 + $0x48] sm:$0xff] %v329_v23  ;;  %336 = vst [vmem:[%s569_s3] sm:$0xff] %v320_v26  ;;  %v400_v28 = vpop.f32.mrb[2].mxu0 }
  0xe0   :  { %344 = vst [vmem:[%s569_s3 + $0x40] sm:$0xff] %v328_v27  ;;  %v412_v29 = vpop.f32.mrb[2].mxu1  ;;  %v323_v30 = vadd.f32 %v400_v28, %v372_v19  ;;  %v193_v32 = vpop.f32.mrb[3].mxu0 }
  0xe1   :  { %v331_v31 = vadd.f32 %v412_v29, %v372_v19  ;;  %v233_v33 = vpop.f32.mrb[3].mxu1  ;;  %v322_v34 = vadd.f32 %v372_v19, %v193_v32 }
  0xe2   :  { %v330_v35 = vadd.f32 %v372_v19, %v233_v33  ;;  %339 = vst [vmem:[%s569_s3 + $0x18] sm:$0xff] %v323_v30 }
  0xe3   :  { %347 = vst [vmem:[%s569_s3 + $0x58] sm:$0xff] %v331_v31  ;;  %338 = vst [vmem:[%s569_s3 + $0x10] sm:$0xff] %v322_v34  ;;  %v403_v36 = vpop.f32.mrb[4].mxu0 }
  0xe4   :  { %346 = vst [vmem:[%s569_s3 + $0x50] sm:$0xff] %v330_v35  ;;  %v415_v37 = vpop.f32.mrb[4].mxu1  ;;  %v325_v38 = vadd.f32 %v403_v36, %v372_v19  ;;  %v203_v40 = vpop.f32.mrb[5].mxu0 }
  0xe5   :  { %v333_v39 = vadd.f32 %v415_v37, %v372_v19  ;;  %v243_v41 = vpop.f32.mrb[5].mxu1  ;;  %v324_v42 = vadd.f32 %v372_v19, %v203_v40 }
  0xe6   :  { %v332_v43 = vadd.f32 %v372_v19, %v243_v41  ;;  %341 = vst [vmem:[%s569_s3 + $0x28] sm:$0xff] %v325_v38 }
  0xe7   :  { %349 = vst [vmem:[%s569_s3 + $0x68] sm:$0xff] %v333_v39  ;;  %340 = vst [vmem:[%s569_s3 + $0x20] sm:$0xff] %v324_v42  ;;  %v406_v44 = vpop.f32.mrb[6].mxu0 }
  0xe8   :  { %348 = vst [vmem:[%s569_s3 + $0x60] sm:$0xff] %v332_v43  ;;  %v418_v45 = vpop.f32.mrb[6].mxu1  ;;  %v327_v46 = vadd.f32 %v406_v44, %v372_v19  ;;  %v213_v48 = vpop.f32.mrb[7].mxu0 }
  0xe9   :  { %v335_v47 = vadd.f32 %v418_v45, %v372_v19  ;;  %v253_v49 = vpop.f32.mrb[7].mxu1  ;;  %v326_v50 = vadd.f32 %v372_v19, %v213_v48 }
  0xea   :  { %v334_v51 = vadd.f32 %v372_v19, %v253_v49  ;;  %343 = vst [vmem:[%s569_s3 + $0x38] sm:$0xff] %v327_v46 }
  0xeb   :  { %351 = vst [vmem:[%s569_s3 + $0x78] sm:$0xff] %v335_v47  ;;  %342 = vst [vmem:[%s569_s3 + $0x30] sm:$0xff] %v326_v50 }
  0xec   :  { %350 = vst [vmem:[%s569_s3 + $0x70] sm:$0xff] %v334_v51 }

// kernel: _lambda_.16
= control target key start
LH: loop header
LB: loop body
LE: loop exit
PB: predicated region body
PF: predicated region fallthrough
CT: control target
= control target key end

     0   :  { %vm215_vm0 = vcmask 293888   ;;  %vm408_vm1 = vcmask 1043456   ;;  %s2002_s1 = inlined_call_operand.vmem [shape: f32[36,128], index: 1, kind: input, shape index: {}]   ;;  %s2003_s0 = inlined_call_operand.vmem [shape: f32[512,36], index: 0, kind: input, shape index: {}]   ;;  %s2004_s2 = inlined_call_operand.vmem [shape: f32[1,128], index: 2, kind: input, shape index: {}]   ;;  %s2005_s3 = inlined_call_operand.vmem [shape: f32[512,128], index: 3, kind: output, shape index: {}]  }
   0x1   :  { %v210_v0 = vld [vmem:[%s2002_s1] sm:$0xff]  ;;  %v211_v1 = vld [vmem:[%s2002_s1 + $0x8] sm:$0xff]  ;;  %v212_v2 = vld [vmem:[%s2002_s1 + $0x10] sm:$0xff] }
   0x2   :  { %v1436_v3 = vpack.c.bf16 %v211_v1, %v210_v0  ;;  %v213_v4 = vld [vmem:[%s2002_s1 + $0x18] sm:$0xff]  ;;  %v146_v5 = vld [vmem:[%s2003_s0] sm:$0xff]  ;;  %v147_v9 = vld [vmem:[%s2003_s0 + $0x8] sm:$0xff] }
   0x3   :  { %v1440_v6 = vpack.c.bf16 %v213_v4, %v212_v2  ;;  %1340 = vmatprep.mubr.msk.f32.mxu0 %vm215_vm0, %v146_v5  ;;  %v178_v7 = vld [vmem:[%s2003_s0 + $0x100] sm:$0xff]  ;;  %v179_v10 = vld [vmem:[%s2003_s0 + $0x108] sm:$0xff]  ;;  %v148_v11 = vld [vmem:[%s2003_s0 + $0x10] sm:$0xff] }
   0x4   :  { %1437 = vmatprep.subr.bf16.mxu0 %v1436_v3  ;;  %1444 = vmatprep.subr.bf16.mxu1 %v1436_v3  ;;  %v214_v8 = vld [vmem:[%s2002_s1 + $0x20] sm:$0xf]  ;;  %v180_v12 = vld [vmem:[%s2003_s0 + $0x110] sm:$0xff]  ;;  %v149_v13 = vld [vmem:[%s2003_s0 + $0x18] sm:$0xff] }
   0x5   :  { %1439 = vmatpush3.bf16.msra.mxu0 %v1436_v3  ;;  %1447 = vmatpush3.bf16.msra.mxu1 %v1436_v3  ;;  %v181_v14 = vld [vmem:[%s2003_s0 + $0x118] sm:$0xff]  ;;  %v150_v15 = vld [vmem:[%s2003_s0 + $0x20] sm:$0xff]  ;;  %v151_v17 = vld [vmem:[%s2003_s0 + $0x28] sm:$0xff] }
   0x6   :  { %1441 = vmatprep.subr.bf16.mxu0 %v1440_v6  ;;  %1445 = vmatprep.subr.bf16.mxu1 %v1440_v6  ;;  %v182_v16 = vld [vmem:[%s2003_s0 + $0x120] sm:$0xff]  ;;  %v183_v18 = vld [vmem:[%s2003_s0 + $0x128] sm:$0xff]  ;;  %v152_v19 = vld [vmem:[%s2003_s0 + $0x30] sm:$0xff] }
   0x7   :  { %1388 = vmatprep.mubr.msk.f32.mxu1 %vm215_vm0, %v178_v7  ;;  %v184_v20 = vld [vmem:[%s2003_s0 + $0x130] sm:$0xff]  ;;  %v153_v21 = vld [vmem:[%s2003_s0 + $0x38] sm:$0xff]  ;;  %v154_v23 = vld [vmem:[%s2003_s0 + $0x40] sm:$0xff] }
   0x8   :  { %v185_v22 = vld [vmem:[%s2003_s0 + $0x138] sm:$0xff]  ;;  %v186_v24 = vld [vmem:[%s2003_s0 + $0x140] sm:$0xff]  ;;  %v155_v25 = vld [vmem:[%s2003_s0 + $0x48] sm:$0xff] }
   0x9   :  { %1443 = vmatpush3.bf16.msra.mxu0 %v1440_v6  ;;  %1448 = vmatpush3.bf16.msra.mxu1 %v1440_v6  ;;  %v187_v26 = vld [vmem:[%s2003_s0 + $0x148] sm:$0xff]  ;;  %v156_v27 = vld [vmem:[%s2003_s0 + $0x50] sm:$0xff]  ;;  %v157_v29 = vld [vmem:[%s2003_s0 + $0x58] sm:$0xff] }
   0xa   :  { %1338 = vmatprep.subr.msk.mxu0 %vm408_vm1, %v214_v8  ;;  %1446 = vmatprep.subr.msk.mxu1 %vm408_vm1, %v214_v8  ;;  %v188_v28 = vld [vmem:[%s2003_s0 + $0x150] sm:$0xff]  ;;  %v189_v30 = vld [vmem:[%s2003_s0 + $0x158] sm:$0xff]  ;;  %v158_v31 = vld [vmem:[%s2003_s0 + $0x60] sm:$0xff] }
   0xb   :  { %v190_v32 = vld [vmem:[%s2003_s0 + $0x160] sm:$0xff]  ;;  %v159_v33 = vld [vmem:[%s2003_s0 + $0x68] sm:$0xff]  ;;  %v160_v35 = vld [vmem:[%s2003_s0 + $0x70] sm:$0xff] }
   0xc   :  { %v191_v34 = vld [vmem:[%s2003_s0 + $0x168] sm:$0xff]  ;;  %v192_v36 = vld [vmem:[%s2003_s0 + $0x170] sm:$0xff]  ;;  %v161_v37 = vld [vmem:[%s2003_s0 + $0x78] sm:$0xff] }
   0xd   :  { %1339 = vmatpush3.msk.msra.mxu0 %vm408_vm1, %v214_v8  ;;  %1449 = vmatpush3.msk.msra.mxu1 %vm408_vm1, %v214_v8  ;;  %v193_v38 = vld [vmem:[%s2003_s0 + $0x178] sm:$0xff]  ;;  %v162_v39 = vld [vmem:[%s2003_s0 + $0x80] sm:$0xff]  ;;  %v163_v41 = vld [vmem:[%s2003_s0 + $0x88] sm:$0xff] }
   0xe   :  { %1341 = vmatmul.mubr.msk.f32.vlgmr.msra.gmra.mrb[0].mxu0 %vm215_vm0, %v147_v9  ;;  %1389 = vmatmul.mubr.msk.f32.vlgmr.msra.gmra.mrb[0].mxu1 %vm215_vm0, %v179_v10  ;;  %v194_v40 = vld [vmem:[%s2003_s0 + $0x180] sm:$0xff]  ;;  %v195_v42 = vld [vmem:[%s2003_s0 + $0x188] sm:$0xff]  ;;  %v164_v43 = vld [vmem:[%s2003_s0 + $0x90] sm:$0xff] }
   0xf   :  { %1343 = vmatprep.mubr.msk.f32.mxu0 %vm215_vm0, %v148_v11  ;;  %1391 = vmatprep.mubr.msk.f32.mxu1 %vm215_vm0, %v180_v12  ;;  %v196_v44 = vld [vmem:[%s2003_s0 + $0x190] sm:$0xff]  ;;  %v165_v45 = vld [vmem:[%s2003_s0 + $0x98] sm:$0xff]  ;;  %v166_v47 = vld [vmem:[%s2003_s0 + $0xa0] sm:$0xff] }
  0x10   :  { %v197_v46 = vld [vmem:[%s2003_s0 + $0x198] sm:$0xff]  ;;  %v198_v48 = vld [vmem:[%s2003_s0 + $0x1a0] sm:$0xff]  ;;  %v167_v49 = vld [vmem:[%s2003_s0 + $0xa8] sm:$0xff] }
  0x11   :  { %v199_v50 = vld [vmem:[%s2003_s0 + $0x1a8] sm:$0xff]  ;;  %v168_v51 = vld [vmem:[%s2003_s0 + $0xb0] sm:$0xff]  ;;  %v169_v53 = vld [vmem:[%s2003_s0 + $0xb8] sm:$0xff] }
  0x12   :  { %1344 = vmatmul.mubr.msk.f32.gmra.mrb[2].mxu0 %vm215_vm0, %v149_v13  ;;  %1392 = vmatmul.mubr.msk.f32.gmra.mrb[2].mxu1 %vm215_vm0, %v181_v14  ;;  %v200_v52 = vld [vmem:[%s2003_s0 + $0x1b0] sm:$0xff]  ;;  %v201_v54 = vld [vmem:[%s2003_s0 + $0x1b8] sm:$0xff]  ;;  %v170_v55 = vld [vmem:[%s2003_s0 + $0xc0] sm:$0xff] }
  0x13   :  { %1346 = vmatprep.mubr.msk.f32.mxu0 %vm215_vm0, %v150_v15  ;;  %1394 = vmatprep.mubr.msk.f32.mxu1 %vm215_vm0, %v182_v16  ;;  %v202_v56 = vld [vmem:[%s2003_s0 + $0x1c0] sm:$0xff]  ;;  %v171_v57 = vld [vmem:[%s2003_s0 + $0xc8] sm:$0xff]  ;;  %v172_v59 = vld [vmem:[%s2003_s0 + $0xd0] sm:$0xff] }
  0x14   :  { %v203_v58 = vld [vmem:[%s2003_s0 + $0x1c8] sm:$0xff]  ;;  %v204_v60 = vld [vmem:[%s2003_s0 + $0x1d0] sm:$0xff]  ;;  %v173_v61 = vld [vmem:[%s2003_s0 + $0xd8] sm:$0xff] }
  0x15   :  { %v205_v62 = vld [vmem:[%s2003_s0 + $0x1d8] sm:$0xff]  ;;  %v174_v63 = vld [vmem:[%s2003_s0 + $0xe0] sm:$0xff]  ;;  %v175_v1 = vld [vmem:[%s2003_s0 + $0xe8] sm:$0xff] }
  0x16   :  { %1347 = vmatmul.mubr.msk.f32.gmra.mrb[4].mxu0 %vm215_vm0, %v151_v17  ;;  %1395 = vmatmul.mubr.msk.f32.gmra.mrb[4].mxu1 %vm215_vm0, %v183_v18  ;;  %v206_v0 = vld [vmem:[%s2003_s0 + $0x1e0] sm:$0xff]  ;;  %v207_v2 = vld [vmem:[%s2003_s0 + $0x1e8] sm:$0xff]  ;;  %v176_v3 = vld [vmem:[%s2003_s0 + $0xf0] sm:$0xff] }
  0x17   :  { %1349 = vmatprep.mubr.msk.f32.mxu0 %vm215_vm0, %v152_v19  ;;  %1397 = vmatprep.mubr.msk.f32.mxu1 %vm215_vm0, %v184_v20  ;;  %v208_v4 = vld [vmem:[%s2003_s0 + $0x1f0] sm:$0xff]  ;;  %v177_v5 = vld [vmem:[%s2003_s0 + $0xf8] sm:$0xff]  ;;  %v1744_v7 = vld [vmem:[%s2004_s2] ss:$0 sm:$0xff] }
  0x18   :  { %v209_v6 = vld [vmem:[%s2003_s0 + $0x1f8] sm:$0xff] }
  0x1a   :  { %1350 = vmatmul.mubr.msk.f32.gmra.mrb[6].mxu0 %vm215_vm0, %v153_v21  ;;  %1398 = vmatmul.mubr.msk.f32.gmra.mrb[6].mxu1 %vm215_vm0, %v185_v22 }
  0x1b   :  { %1352 = vmatprep.mubr.msk.f32.mxu0 %vm215_vm0, %v154_v23  ;;  %1400 = vmatprep.mubr.msk.f32.mxu1 %vm215_vm0, %v186_v24 }
  0x1e   :  { %1353 = vmatmul.mubr.msk.f32.gmra.mrb[8].mxu0 %vm215_vm0, %v155_v25  ;;  %1401 = vmatmul.mubr.msk.f32.gmra.mrb[8].mxu1 %vm215_vm0, %v187_v26 }
  0x1f   :  { %1355 = vmatprep.mubr.msk.f32.mxu0 %vm215_vm0, %v156_v27  ;;  %1403 = vmatprep.mubr.msk.f32.mxu1 %vm215_vm0, %v188_v28 }
  0x22   :  { %1356 = vmatmul.mubr.msk.f32.gmra.mrb[10].mxu0 %vm215_vm0, %v157_v29  ;;  %1404 = vmatmul.mubr.msk.f32.gmra.mrb[10].mxu1 %vm215_vm0, %v189_v30 }
  0x23   :  { %1358 = vmatprep.mubr.msk.f32.mxu0 %vm215_vm0, %v158_v31  ;;  %1406 = vmatprep.mubr.msk.f32.mxu1 %vm215_vm0, %v190_v32 }
  0x26   :  { %1359 = vmatmul.mubr.msk.f32.gmra.mrb[12].mxu0 %vm215_vm0, %v159_v33  ;;  %1407 = vmatmul.mubr.msk.f32.gmra.mrb[12].mxu1 %vm215_vm0, %v191_v34 }
  0x27   :  { %1361 = vmatprep.mubr.msk.f32.mxu0 %vm215_vm0, %v160_v35  ;;  %1409 = vmatprep.mubr.msk.f32.mxu1 %vm215_vm0, %v192_v36 }
  0x2a   :  { %1362 = vmatmul.mubr.msk.f32.gmra.mrb[14].mxu0 %vm215_vm0, %v161_v37  ;;  %1410 = vmatmul.mubr.msk.f32.gmra.mrb[14].mxu1 %vm215_vm0, %v193_v38 }
  0x2b   :  { %1364 = vmatprep.mubr.msk.f32.mxu0 %vm215_vm0, %v162_v39  ;;  %1412 = vmatprep.mubr.msk.f32.mxu1 %vm215_vm0, %v194_v40 }
  0x2e   :  { %1365 = vmatmul.mubr.msk.f32.gmra.mrb[16].mxu0 %vm215_vm0, %v163_v41  ;;  %1413 = vmatmul.mubr.msk.f32.gmra.mrb[16].mxu1 %vm215_vm0, %v195_v42 }
  0x2f   :  { %1367 = vmatprep.mubr.msk.f32.mxu0 %vm215_vm0, %v164_v43  ;;  %1415 = vmatprep.mubr.msk.f32.mxu1 %vm215_vm0, %v196_v44 }
  0x32   :  { %1368 = vmatmul.mubr.msk.f32.gmra.mrb[18].mxu0 %vm215_vm0, %v165_v45  ;;  %1416 = vmatmul.mubr.msk.f32.gmra.mrb[18].mxu1 %vm215_vm0, %v197_v46 }
  0x33   :  { %1370 = vmatprep.mubr.msk.f32.mxu0 %vm215_vm0, %v166_v47  ;;  %1418 = vmatprep.mubr.msk.f32.mxu1 %vm215_vm0, %v198_v48 }
  0x36   :  { %1371 = vmatmul.mubr.msk.f32.gmra.mrb[20].mxu0 %vm215_vm0, %v167_v49  ;;  %1419 = vmatmul.mubr.msk.f32.gmra.mrb[20].mxu1 %vm215_vm0, %v199_v50 }
  0x37   :  { %1373 = vmatprep.mubr.msk.f32.mxu0 %vm215_vm0, %v168_v51  ;;  %1421 = vmatprep.mubr.msk.f32.mxu1 %vm215_vm0, %v200_v52 }
  0x3a   :  { %1374 = vmatmul.mubr.msk.f32.gmra.mrb[22].mxu0 %vm215_vm0, %v169_v53  ;;  %1422 = vmatmul.mubr.msk.f32.gmra.mrb[22].mxu1 %vm215_vm0, %v201_v54 }
  0x3b   :  { %1376 = vmatprep.mubr.msk.f32.mxu0 %vm215_vm0, %v170_v55  ;;  %1424 = vmatprep.mubr.msk.f32.mxu1 %vm215_vm0, %v202_v56 }
  0x3e   :  { %1377 = vmatmul.mubr.msk.f32.gmra.mrb[24].mxu0 %vm215_vm0, %v171_v57  ;;  %1425 = vmatmul.mubr.msk.f32.gmra.mrb[24].mxu1 %vm215_vm0, %v203_v58 }
  0x3f   :  { %1379 = vmatprep.mubr.msk.f32.mxu0 %vm215_vm0, %v172_v59  ;;  %1427 = vmatprep.mubr.msk.f32.mxu1 %vm215_vm0, %v204_v60 }
  0x42   :  { %1380 = vmatmul.mubr.msk.f32.gmra.mrb[26].mxu0 %vm215_vm0, %v173_v61  ;;  %1428 = vmatmul.mubr.msk.f32.gmra.mrb[26].mxu1 %vm215_vm0, %v205_v62 }
  0x43   :  { %1382 = vmatprep.mubr.msk.f32.mxu0 %vm215_vm0, %v174_v63  ;;  %1430 = vmatprep.mubr.msk.f32.mxu1 %vm215_vm0, %v206_v0 }
  0x46   :  { %1383 = vmatmul.mubr.msk.f32.gmra.mrb[28].mxu0 %vm215_vm0, %v175_v1  ;;  %1431 = vmatmul.mubr.msk.f32.gmra.mrb[28].mxu1 %vm215_vm0, %v207_v2 }
  0x47   :  { %1385 = vmatprep.mubr.msk.f32.mxu0 %vm215_vm0, %v176_v3  ;;  %1433 = vmatprep.mubr.msk.f32.mxu1 %vm215_vm0, %v208_v4 }
  0x4a   :  { %1386 = vmatmul.mubr.msk.f32.gmra.mrb[30].mxu0 %vm215_vm0, %v177_v5  ;;  %1434 = vmatmul.mubr.msk.f32.gmra.mrb[30].mxu1 %vm215_vm0, %v209_v6 }
  0xe1   :  { %v1342_v8 = vpop.f32.mrb[0].mxu0  ;;  %v1390_v9 = vpop.f32.mrb[0].mxu1 }
  0xe2   :  { %v1000_v10 = vadd.f32 %v1342_v8, %v1744_v7  ;;  %v1032_v11 = vadd.f32 %v1390_v9, %v1744_v7  ;;  %v478_v12 = vpop.f32.mrb[1].mxu0  ;;  %v638_v13 = vpop.f32.mrb[1].mxu1 }
  0xe3   :  { %v999_v14 = vadd.f32 %v1744_v7, %v478_v12  ;;  %v1031_v15 = vadd.f32 %v1744_v7, %v638_v13 }
  0xe4   :  { %v1064_v16 = vmax.f32 %v1000_v10, 0.0  ;;  %v1096_v17 = vmax.f32 %v1032_v11, 0.0 }
  0xe5   :  { %v1063_v18 = vmax.f32 %v999_v14, 0.0  ;;  %v1095_v19 = vmax.f32 %v1031_v15, 0.0  ;;  %v1345_v20 = vpop.f32.mrb[2].mxu0  ;;  %v1393_v21 = vpop.f32.mrb[2].mxu1 }
  0xe6   :  { %1128 = vst [vmem:[%s2005_s3 + $0x8] sm:$0xff] %v1064_v16  ;;  %1160 = vst [vmem:[%s2005_s3 + $0x108] sm:$0xff] %v1096_v17  ;;  %v1002_v22 = vadd.f32 %v1345_v20, %v1744_v7  ;;  %v1034_v23 = vadd.f32 %v1393_v21, %v1744_v7  ;;  %v488_v24 = vpop.f32.mrb[3].mxu0  ;;  %v648_v25 = vpop.f32.mrb[3].mxu1 }
  0xe7   :  { %1127 = vst [vmem:[%s2005_s3] sm:$0xff] %v1063_v18  ;;  %1159 = vst [vmem:[%s2005_s3 + $0x100] sm:$0xff] %v1095_v19  ;;  %v1001_v26 = vadd.f32 %v1744_v7, %v488_v24  ;;  %v1033_v27 = vadd.f32 %v1744_v7, %v648_v25 }
  0xe8   :  { %v1066_v28 = vmax.f32 %v1002_v22, 0.0  ;;  %v1098_v29 = vmax.f32 %v1034_v23, 0.0 }
  0xe9   :  { %v1065_v30 = vmax.f32 %v1001_v26, 0.0  ;;  %v1097_v31 = vmax.f32 %v1033_v27, 0.0  ;;  %v1348_v32 = vpop.f32.mrb[4].mxu0  ;;  %v1396_v33 = vpop.f32.mrb[4].mxu1 }
  0xea   :  { %1130 = vst [vmem:[%s2005_s3 + $0x18] sm:$0xff] %v1066_v28  ;;  %1162 = vst [vmem:[%s2005_s3 + $0x118] sm:$0xff] %v1098_v29  ;;  %v1004_v34 = vadd.f32 %v1348_v32, %v1744_v7  ;;  %v1036_v35 = vadd.f32 %v1396_v33, %v1744_v7  ;;  %v498_v36 = vpop.f32.mrb[5].mxu0  ;;  %v658_v37 = vpop.f32.mrb[5].mxu1 }
  0xeb   :  { %1129 = vst [vmem:[%s2005_s3 + $0x10] sm:$0xff] %v1065_v30  ;;  %1161 = vst [vmem:[%s2005_s3 + $0x110] sm:$0xff] %v1097_v31  ;;  %v1003_v38 = vadd.f32 %v1744_v7, %v498_v36  ;;  %v1035_v39 = vadd.f32 %v1744_v7, %v658_v37 }
  0xec   :  { %v1068_v40 = vmax.f32 %v1004_v34, 0.0  ;;  %v1100_v41 = vmax.f32 %v1036_v35, 0.0 }
  0xed   :  { %v1067_v42 = vmax.f32 %v1003_v38, 0.0  ;;  %v1099_v43 = vmax.f32 %v1035_v39, 0.0  ;;  %v1351_v44 = vpop.f32.mrb[6].mxu0  ;;  %v1399_v45 = vpop.f32.mrb[6].mxu1 }
  0xee   :  { %1132 = vst [vmem:[%s2005_s3 + $0x28] sm:$0xff] %v1068_v40  ;;  %1164 = vst [vmem:[%s2005_s3 + $0x128] sm:$0xff] %v1100_v41  ;;  %v1006_v46 = vadd.f32 %v1351_v44, %v1744_v7  ;;  %v1038_v47 = vadd.f32 %v1399_v45, %v1744_v7  ;;  %v508_v48 = vpop.f32.mrb[7].mxu0  ;;  %v668_v49 = vpop.f32.mrb[7].mxu1 }
  0xef   :  { %1131 = vst [vmem:[%s2005_s3 + $0x20] sm:$0xff] %v1067_v42  ;;  %1163 = vst [vmem:[%s2005_s3 + $0x120] sm:$0xff] %v1099_v43  ;;  %v1005_v50 = vadd.f32 %v1744_v7, %v508_v48  ;;  %v1037_v51 = vadd.f32 %v1744_v7, %v668_v49 }
  0xf0   :  { %v1070_v52 = vmax.f32 %v1006_v46, 0.0  ;;  %v1102_v53 = vmax.f32 %v1038_v47, 0.0 }
  0xf1   :  { %v1069_v54 = vmax.f32 %v1005_v50, 0.0  ;;  %v1101_v55 = vmax.f32 %v1037_v51, 0.0  ;;  %v1354_v56 = vpop.f32.mrb[8].mxu0  ;;  %v1402_v57 = vpop.f32.mrb[8].mxu1 }
  0xf2   :  { %1134 = vst [vmem:[%s2005_s3 + $0x38] sm:$0xff] %v1070_v52  ;;  %1166 = vst [vmem:[%s2005_s3 + $0x138] sm:$0xff] %v1102_v53  ;;  %v1008_v58 = vadd.f32 %v1354_v56, %v1744_v7  ;;  %v1040_v59 = vadd.f32 %v1402_v57, %v1744_v7  ;;  %v518_v60 = vpop.f32.mrb[9].mxu0  ;;  %v678_v61 = vpop.f32.mrb[9].mxu1 }
  0xf3   :  { %1133 = vst [vmem:[%s2005_s3 + $0x30] sm:$0xff] %v1069_v54  ;;  %1165 = vst [vmem:[%s2005_s3 + $0x130] sm:$0xff] %v1101_v55  ;;  %v1007_v62 = vadd.f32 %v1744_v7, %v518_v60  ;;  %v1039_v63 = vadd.f32 %v1744_v7, %v678_v61 }
  0xf4   :  { %v1072_v0 = vmax.f32 %v1008_v58, 0.0  ;;  %v1104_v1 = vmax.f32 %v1040_v59, 0.0 }
  0xf5   :  { %v1071_v2 = vmax.f32 %v1007_v62, 0.0  ;;  %v1103_v3 = vmax.f32 %v1039_v63, 0.0  ;;  %v1357_v4 = vpop.f32.mrb[10].mxu0  ;;  %v1405_v5 = vpop.f32.mrb[10].mxu1 }
  0xf6   :  { %1136 = vst [vmem:[%s2005_s3 + $0x48] sm:$0xff] %v1072_v0  ;;  %1168 = vst [vmem:[%s2005_s3 + $0x148] sm:$0xff] %v1104_v1  ;;  %v1010_v6 = vadd.f32 %v1357_v4, %v1744_v7  ;;  %v1042_v8 = vadd.f32 %v1405_v5, %v1744_v7  ;;  %v528_v9 = vpop.f32.mrb[11].mxu0  ;;  %v688_v10 = vpop.f32.mrb[11].mxu1 }
  0xf7   :  { %1135 = vst [vmem:[%s2005_s3 + $0x40] sm:$0xff] %v1071_v2  ;;  %1167 = vst [vmem:[%s2005_s3 + $0x140] sm:$0xff] %v1103_v3  ;;  %v1009_v11 = vadd.f32 %v1744_v7, %v528_v9  ;;  %v1041_v12 = vadd.f32 %v1744_v7, %v688_v10 }
  0xf8   :  { %v1074_v13 = vmax.f32 %v1010_v6, 0.0  ;;  %v1106_v14 = vmax.f32 %v1042_v8, 0.0 }
  0xf9   :  { %v1073_v15 = vmax.f32 %v1009_v11, 0.0  ;;  %v1105_v16 = vmax.f32 %v1041_v12, 0.0  ;;  %v1360_v17 = vpop.f32.mrb[12].mxu0  ;;  %v1408_v18 = vpop.f32.mrb[12].mxu1 }
  0xfa   :  { %1138 = vst [vmem:[%s2005_s3 + $0x58] sm:$0xff] %v1074_v13  ;;  %1170 = vst [vmem:[%s2005_s3 + $0x158] sm:$0xff] %v1106_v14  ;;  %v1012_v19 = vadd.f32 %v1360_v17, %v1744_v7  ;;  %v1044_v20 = vadd.f32 %v1408_v18, %v1744_v7  ;;  %v538_v21 = vpop.f32.mrb[13].mxu0  ;;  %v698_v22 = vpop.f32.mrb[13].mxu1 }
  0xfb   :  { %1137 = vst [vmem:[%s2005_s3 + $0x50] sm:$0xff] %v1073_v15  ;;  %1169 = vst [vmem:[%s2005_s3 + $0x150] sm:$0xff] %v1105_v16  ;;  %v1011_v23 = vadd.f32 %v1744_v7, %v538_v21  ;;  %v1043_v24 = vadd.f32 %v1744_v7, %v698_v22 }
  0xfc   :  { %v1076_v25 = vmax.f32 %v1012_v19, 0.0  ;;  %v1108_v26 = vmax.f32 %v1044_v20, 0.0 }
  0xfd   :  { %v1075_v27 = vmax.f32 %v1011_v23, 0.0  ;;  %v1107_v28 = vmax.f32 %v1043_v24, 0.0  ;;  %v1363_v29 = vpop.f32.mrb[14].mxu0  ;;  %v1411_v30 = vpop.f32.mrb[14].mxu1 }
  0xfe   :  { %1140 = vst [vmem:[%s2005_s3 + $0x68] sm:$0xff] %v1076_v25  ;;  %1172 = vst [vmem:[%s2005_s3 + $0x168] sm:$0xff] %v1108_v26  ;;  %v1014_v31 = vadd.f32 %v1363_v29, %v1744_v7  ;;  %v1046_v32 = vadd.f32 %v1411_v30, %v1744_v7  ;;  %v548_v33 = vpop.f32.mrb[15].mxu0  ;;  %v708_v34 = vpop.f32.mrb[15].mxu1 }
  0xff   :  { %1139 = vst [vmem:[%s2005_s3 + $0x60] sm:$0xff] %v1075_v27  ;;  %1171 = vst [vmem:[%s2005_s3 + $0x160] sm:$0xff] %v1107_v28  ;;  %v1013_v35 = vadd.f32 %v1744_v7, %v548_v33  ;;  %v1045_v36 = vadd.f32 %v1744_v7, %v708_v34 }
 0x100   :  { %v1078_v37 = vmax.f32 %v1014_v31, 0.0  ;;  %v1110_v38 = vmax.f32 %v1046_v32, 0.0 }
 0x101   :  { %v1077_v39 = vmax.f32 %v1013_v35, 0.0  ;;  %v1109_v40 = vmax.f32 %v1045_v36, 0.0  ;;  %v1366_v41 = vpop.f32.mrb[16].mxu0  ;;  %v1414_v42 = vpop.f32.mrb[16].mxu1 }
 0x102   :  { %1142 = vst [vmem:[%s2005_s3 + $0x78] sm:$0xff] %v1078_v37  ;;  %1174 = vst [vmem:[%s2005_s3 + $0x178] sm:$0xff] %v1110_v38  ;;  %v1016_v43 = vadd.f32 %v1366_v41, %v1744_v7  ;;  %v1048_v44 = vadd.f32 %v1414_v42, %v1744_v7  ;;  %v558_v45 = vpop.f32.mrb[17].mxu0  ;;  %v718_v46 = vpop.f32.mrb[17].mxu1 }
 0x103   :  { %1141 = vst [vmem:[%s2005_s3 + $0x70] sm:$0xff] %v1077_v39  ;;  %1173 = vst [vmem:[%s2005_s3 + $0x170] sm:$0xff] %v1109_v40  ;;  %v1015_v47 = vadd.f32 %v1744_v7, %v558_v45  ;;  %v1047_v48 = vadd.f32 %v1744_v7, %v718_v46 }
 0x104   :  { %v1080_v49 = vmax.f32 %v1016_v43, 0.0  ;;  %v1112_v50 = vmax.f32 %v1048_v44, 0.0 }
 0x105   :  { %v1079_v51 = vmax.f32 %v1015_v47, 0.0  ;;  %v1111_v52 = vmax.f32 %v1047_v48, 0.0  ;;  %v1369_v53 = vpop.f32.mrb[18].mxu0  ;;  %v1417_v54 = vpop.f32.mrb[18].mxu1 }
 0x106   :  { %1144 = vst [vmem:[%s2005_s3 + $0x88] sm:$0xff] %v1080_v49  ;;  %1176 = vst [vmem:[%s2005_s3 + $0x188] sm:$0xff] %v1112_v50  ;;  %v1018_v55 = vadd.f32 %v1369_v53, %v1744_v7  ;;  %v1050_v56 = vadd.f32 %v1417_v54, %v1744_v7  ;;  %v568_v57 = vpop.f32.mrb[19].mxu0  ;;  %v728_v58 = vpop.f32.mrb[19].mxu1 }
 0x107   :  { %1143 = vst [vmem:[%s2005_s3 + $0x80] sm:$0xff] %v1079_v51  ;;  %1175 = vst [vmem:[%s2005_s3 + $0x180] sm:$0xff] %v1111_v52  ;;  %v1017_v59 = vadd.f32 %v1744_v7, %v568_v57  ;;  %v1049_v60 = vadd.f32 %v1744_v7, %v728_v58 }
 0x108   :  { %v1082_v61 = vmax.f32 %v1018_v55, 0.0  ;;  %v1114_v62 = vmax.f32 %v1050_v56, 0.0 }
 0x109   :  { %v1081_v63 = vmax.f32 %v1017_v59, 0.0  ;;  %v1113_v0 = vmax.f32 %v1049_v60, 0.0  ;;  %v1372_v1 = vpop.f32.mrb[20].mxu0  ;;  %v1420_v2 = vpop.f32.mrb[20].mxu1 }
 0x10a   :  { %1146 = vst [vmem:[%s2005_s3 + $0x98] sm:$0xff] %v1082_v61  ;;  %1178 = vst [vmem:[%s2005_s3 + $0x198] sm:$0xff] %v1114_v62  ;;  %v1020_v3 = vadd.f32 %v1372_v1, %v1744_v7  ;;  %v1052_v4 = vadd.f32 %v1420_v2, %v1744_v7  ;;  %v578_v5 = vpop.f32.mrb[21].mxu0  ;;  %v738_v6 = vpop.f32.mrb[21].mxu1 }
 0x10b   :  { %1145 = vst [vmem:[%s2005_s3 + $0x90] sm:$0xff] %v1081_v63  ;;  %1177 = vst [vmem:[%s2005_s3 + $0x190] sm:$0xff] %v1113_v0  ;;  %v1019_v8 = vadd.f32 %v1744_v7, %v578_v5  ;;  %v1051_v9 = vadd.f32 %v1744_v7, %v738_v6 }
 0x10c   :  { %v1084_v10 = vmax.f32 %v1020_v3, 0.0  ;;  %v1116_v11 = vmax.f32 %v1052_v4, 0.0 }
 0x10d   :  { %v1083_v12 = vmax.f32 %v1019_v8, 0.0  ;;  %v1115_v13 = vmax.f32 %v1051_v9, 0.0  ;;  %v1375_v14 = vpop.f32.mrb[22].mxu0  ;;  %v1423_v15 = vpop.f32.mrb[22].mxu1 }
 0x10e   :  { %1148 = vst [vmem:[%s2005_s3 + $0xa8] sm:$0xff] %v1084_v10  ;;  %1180 = vst [vmem:[%s2005_s3 + $0x1a8] sm:$0xff] %v1116_v11  ;;  %v1022_v16 = vadd.f32 %v1375_v14, %v1744_v7  ;;  %v1054_v17 = vadd.f32 %v1423_v15, %v1744_v7  ;;  %v588_v18 = vpop.f32.mrb[23].mxu0  ;;  %v748_v19 = vpop.f32.mrb[23].mxu1 }
 0x10f   :  { %1147 = vst [vmem:[%s2005_s3 + $0xa0] sm:$0xff] %v1083_v12  ;;  %1179 = vst [vmem:[%s2005_s3 + $0x1a0] sm:$0xff] %v1115_v13  ;;  %v1021_v20 = vadd.f32 %v1744_v7, %v588_v18  ;;  %v1053_v21 = vadd.f32 %v1744_v7, %v748_v19 }
 0x110   :  { %v1086_v22 = vmax.f32 %v1022_v16, 0.0  ;;  %v1118_v23 = vmax.f32 %v1054_v17, 0.0 }
 0x111   :  { %v1085_v24 = vmax.f32 %v1021_v20, 0.0  ;;  %v1117_v25 = vmax.f32 %v1053_v21, 0.0  ;;  %v1378_v26 = vpop.f32.mrb[24].mxu0  ;;  %v1426_v27 = vpop.f32.mrb[24].mxu1 }
 0x112   :  { %1150 = vst [vmem:[%s2005_s3 + $0xb8] sm:$0xff] %v1086_v22  ;;  %1182 = vst [vmem:[%s2005_s3 + $0x1b8] sm:$0xff] %v1118_v23  ;;  %v1024_v28 = vadd.f32 %v1378_v26, %v1744_v7  ;;  %v1056_v29 = vadd.f32 %v1426_v27, %v1744_v7  ;;  %v598_v30 = vpop.f32.mrb[25].mxu0  ;;  %v758_v31 = vpop.f32.mrb[25].mxu1 }
 0x113   :  { %1149 = vst [vmem:[%s2005_s3 + $0xb0] sm:$0xff] %v1085_v24  ;;  %1181 = vst [vmem:[%s2005_s3 + $0x1b0] sm:$0xff] %v1117_v25  ;;  %v1023_v32 = vadd.f32 %v1744_v7, %v598_v30  ;;  %v1055_v33 = vadd.f32 %v1744_v7, %v758_v31 }
 0x114   :  { %v1088_v34 = vmax.f32 %v1024_v28, 0.0  ;;  %v1120_v35 = vmax.f32 %v1056_v29, 0.0 }
 0x115   :  { %v1087_v36 = vmax.f32 %v1023_v32, 0.0  ;;  %v1119_v37 = vmax.f32 %v1055_v33, 0.0  ;;  %v1381_v38 = vpop.f32.mrb[26].mxu0  ;;  %v1429_v39 = vpop.f32.mrb[26].mxu1 }
 0x116   :  { %1152 = vst [vmem:[%s2005_s3 + $0xc8] sm:$0xff] %v1088_v34  ;;  %1184 = vst [vmem:[%s2005_s3 + $0x1c8] sm:$0xff] %v1120_v35  ;;  %v1026_v40 = vadd.f32 %v1381_v38, %v1744_v7  ;;  %v1058_v41 = vadd.f32 %v1429_v39, %v1744_v7  ;;  %v608_v42 = vpop.f32.mrb[27].mxu0  ;;  %v768_v43 = vpop.f32.mrb[27].mxu1 }
 0x117   :  { %1151 = vst [vmem:[%s2005_s3 + $0xc0] sm:$0xff] %v1087_v36  ;;  %1183 = vst [vmem:[%s2005_s3 + $0x1c0] sm:$0xff] %v1119_v37  ;;  %v1025_v44 = vadd.f32 %v1744_v7, %v608_v42  ;;  %v1057_v45 = vadd.f32 %v1744_v7, %v768_v43 }
 0x118   :  { %v1090_v46 = vmax.f32 %v1026_v40, 0.0  ;;  %v1122_v47 = vmax.f32 %v1058_v41, 0.0 }
 0x119   :  { %v1089_v48 = vmax.f32 %v1025_v44, 0.0  ;;  %v1121_v49 = vmax.f32 %v1057_v45, 0.0  ;;  %v1384_v50 = vpop.f32.mrb[28].mxu0  ;;  %v1432_v51 = vpop.f32.mrb[28].mxu1 }
 0x11a   :  { %1154 = vst [vmem:[%s2005_s3 + $0xd8] sm:$0xff] %v1090_v46  ;;  %1186 = vst [vmem:[%s2005_s3 + $0x1d8] sm:$0xff] %v1122_v47  ;;  %v1028_v52 = vadd.f32 %v1384_v50, %v1744_v7  ;;  %v1060_v53 = vadd.f32 %v1432_v51, %v1744_v7  ;;  %v618_v54 = vpop.f32.mrb[29].mxu0  ;;  %v778_v55 = vpop.f32.mrb[29].mxu1 }
 0x11b   :  { %1153 = vst [vmem:[%s2005_s3 + $0xd0] sm:$0xff] %v1089_v48  ;;  %1185 = vst [vmem:[%s2005_s3 + $0x1d0] sm:$0xff] %v1121_v49  ;;  %v1027_v56 = vadd.f32 %v1744_v7, %v618_v54  ;;  %v1059_v57 = vadd.f32 %v1744_v7, %v778_v55 }
 0x11c   :  { %v1092_v58 = vmax.f32 %v1028_v52, 0.0  ;;  %v1124_v59 = vmax.f32 %v1060_v53, 0.0 }
 0x11d   :  { %v1091_v60 = vmax.f32 %v1027_v56, 0.0  ;;  %v1123_v61 = vmax.f32 %v1059_v57, 0.0  ;;  %v1387_v62 = vpop.f32.mrb[30].mxu0  ;;  %v1435_v63 = vpop.f32.mrb[30].mxu1 }
 0x11e   :  { %1156 = vst [vmem:[%s2005_s3 + $0xe8] sm:$0xff] %v1092_v58  ;;  %1188 = vst [vmem:[%s2005_s3 + $0x1e8] sm:$0xff] %v1124_v59  ;;  %v1030_v0 = vadd.f32 %v1387_v62, %v1744_v7  ;;  %v1062_v1 = vadd.f32 %v1435_v63, %v1744_v7  ;;  %v628_v2 = vpop.f32.mrb[31].mxu0  ;;  %v788_v3 = vpop.f32.mrb[31].mxu1 }
 0x11f   :  { %1155 = vst [vmem:[%s2005_s3 + $0xe0] sm:$0xff] %v1091_v60  ;;  %1187 = vst [vmem:[%s2005_s3 + $0x1e0] sm:$0xff] %v1123_v61  ;;  %v1029_v4 = vadd.f32 %v1744_v7, %v628_v2  ;;  %v1061_v5 = vadd.f32 %v1744_v7, %v788_v3 }
 0x120   :  { %v1094_v6 = vmax.f32 %v1030_v0, 0.0  ;;  %v1126_v8 = vmax.f32 %v1062_v1, 0.0 }
 0x121   :  { %v1093_v9 = vmax.f32 %v1029_v4, 0.0  ;;  %v1125_v10 = vmax.f32 %v1061_v5, 0.0 }
 0x122   :  { %1158 = vst [vmem:[%s2005_s3 + $0xf8] sm:$0xff] %v1094_v6  ;;  %1190 = vst [vmem:[%s2005_s3 + $0x1f8] sm:$0xff] %v1126_v8 }
 0x123   :  { %1157 = vst [vmem:[%s2005_s3 + $0xf0] sm:$0xff] %v1093_v9  ;;  %1189 = vst [vmem:[%s2005_s3 + $0x1f0] sm:$0xff] %v1125_v10 }

// kernel: _lambda_.17
= control target key start
LH: loop header
LB: loop body
LE: loop exit
PB: predicated region body
PF: predicated region fallthrough
CT: control target
= control target key end

     0   :  { %vm407_vm0 = vcmask 1043456   ;;  %vm214_vm1 = vcmask 31744   ;;  %s2290_s1 = inlined_call_operand.vmem [shape: f32[4,128], index: 1, kind: input, shape index: {}]   ;;  %s2291_s0 = inlined_call_operand.vmem [shape: f32[512,4], index: 0, kind: input, shape index: {}]   ;;  %s2292_s2 = inlined_call_operand.vmem [shape: f32[1,128], index: 2, kind: input, shape index: {}]   ;;  %s2293_s3 = inlined_call_operand.vmem [shape: f32[512,128], index: 3, kind: input, shape index: {}]   ;;  %s2294_s4 = inlined_call_operand.vmem [shape: f32[512,128], index: 4, kind: output, shape index: {}]  }
   0x1   :  { %v213_v0 = vld [vmem:[%s2290_s1] sm:$0xf]  ;;  %v150_v3 = vld [vmem:[%s2291_s0 + $0x8] sm:$0xff]  ;;  %v151_v5 = vld [vmem:[%s2291_s0 + $0x10] sm:$0xff] }
   0x2   :  { %v149_v1 = vld [vmem:[%s2291_s0] sm:$0xff]  ;;  %1453 = vmatprep.subr.msk.mxu0 %vm407_vm0, %v213_v0  ;;  %1551 = vmatprep.subr.msk.mxu1 %vm407_vm0, %v213_v0  ;;  %v182_v4 = vld [vmem:[%s2291_s0 + $0x108] sm:$0xff]  ;;  %v183_v6 = vld [vmem:[%s2291_s0 + $0x110] sm:$0xff] }
   0x3   :  { %v181_v2 = vld [vmem:[%s2291_s0 + $0x100] sm:$0xff]  ;;  %1454 = vmatpush3.msk.msra.mxu0 %vm407_vm0, %v213_v0  ;;  %1552 = vmatpush3.msk.msra.mxu1 %vm407_vm0, %v213_v0  ;;  %v152_v7 = vld [vmem:[%s2291_s0 + $0x18] sm:$0xff]  ;;  %v154_v11 = vld [vmem:[%s2291_s0 + $0x28] sm:$0xff] }
   0x4   :  { %1455 = vmatprep.mubr.msk.f32.mxu0 %vm214_vm1, %v149_v1  ;;  %1503 = vmatprep.mubr.msk.f32.mxu1 %vm214_vm1, %v181_v2  ;;  %v184_v8 = vld [vmem:[%s2291_s0 + $0x118] sm:$0xff]  ;;  %v153_v9 = vld [vmem:[%s2291_s0 + $0x20] sm:$0xff]  ;;  %v186_v12 = vld [vmem:[%s2291_s0 + $0x128] sm:$0xff] }
   0x5   :  { %1456 = vmatmul.mubr.msk.f32.vlgmr.msra.gmra.mrb[0].mxu0 %vm214_vm1, %v150_v3  ;;  %1504 = vmatmul.mubr.msk.f32.vlgmr.msra.gmra.mrb[0].mxu1 %vm214_vm1, %v182_v4  ;;  %v185_v10 = vld [vmem:[%s2291_s0 + $0x120] sm:$0xff]  ;;  %v155_v13 = vld [vmem:[%s2291_s0 + $0x30] sm:$0xff]  ;;  %v156_v15 = vld [vmem:[%s2291_s0 + $0x38] sm:$0xff] }
   0x6   :  { %1458 = vmatprep.mubr.msk.f32.mxu0 %vm214_vm1, %v151_v5  ;;  %1506 = vmatprep.mubr.msk.f32.mxu1 %vm214_vm1, %v183_v6  ;;  %v187_v14 = vld [vmem:[%s2291_s0 + $0x130] sm:$0xff]  ;;  %v188_v16 = vld [vmem:[%s2291_s0 + $0x138] sm:$0xff]  ;;  %v157_v17 = vld [vmem:[%s2291_s0 + $0x40] sm:$0xff] }
   0x7   :  { %v189_v18 = vld [vmem:[%s2291_s0 + $0x140] sm:$0xff]  ;;  %v158_v19 = vld [vmem:[%s2291_s0 + $0x48] sm:$0xff]  ;;  %v159_v21 = vld [vmem:[%s2291_s0 + $0x50] sm:$0xff] }
   0x8   :  { %v190_v20 = vld [vmem:[%s2291_s0 + $0x148] sm:$0xff]  ;;  %v191_v22 = vld [vmem:[%s2291_s0 + $0x150] sm:$0xff]  ;;  %v160_v23 = vld [vmem:[%s2291_s0 + $0x58] sm:$0xff] }
   0x9   :  { %1459 = vmatmul.mubr.msk.f32.gmra.mrb[2].mxu0 %vm214_vm1, %v152_v7  ;;  %1507 = vmatmul.mubr.msk.f32.gmra.mrb[2].mxu1 %vm214_vm1, %v184_v8  ;;  %v192_v24 = vld [vmem:[%s2291_s0 + $0x158] sm:$0xff]  ;;  %v161_v25 = vld [vmem:[%s2291_s0 + $0x60] sm:$0xff]  ;;  %v162_v27 = vld [vmem:[%s2291_s0 + $0x68] sm:$0xff] }
   0xa   :  { %1461 = vmatprep.mubr.msk.f32.mxu0 %vm214_vm1, %v153_v9  ;;  %1509 = vmatprep.mubr.msk.f32.mxu1 %vm214_vm1, %v185_v10  ;;  %v193_v26 = vld [vmem:[%s2291_s0 + $0x160] sm:$0xff]  ;;  %v194_v28 = vld [vmem:[%s2291_s0 + $0x168] sm:$0xff]  ;;  %v163_v29 = vld [vmem:[%s2291_s0 + $0x70] sm:$0xff] }
   0xb   :  { %v195_v30 = vld [vmem:[%s2291_s0 + $0x170] sm:$0xff]  ;;  %v164_v31 = vld [vmem:[%s2291_s0 + $0x78] sm:$0xff]  ;;  %v165_v33 = vld [vmem:[%s2291_s0 + $0x80] sm:$0xff] }
   0xc   :  { %v196_v32 = vld [vmem:[%s2291_s0 + $0x178] sm:$0xff]  ;;  %v197_v34 = vld [vmem:[%s2291_s0 + $0x180] sm:$0xff]  ;;  %v166_v35 = vld [vmem:[%s2291_s0 + $0x88] sm:$0xff] }
   0xd   :  { %1462 = vmatmul.mubr.msk.f32.gmra.mrb[4].mxu0 %vm214_vm1, %v154_v11  ;;  %1510 = vmatmul.mubr.msk.f32.gmra.mrb[4].mxu1 %vm214_vm1, %v186_v12  ;;  %v198_v36 = vld [vmem:[%s2291_s0 + $0x188] sm:$0xff]  ;;  %v167_v37 = vld [vmem:[%s2291_s0 + $0x90] sm:$0xff]  ;;  %v168_v39 = vld [vmem:[%s2291_s0 + $0x98] sm:$0xff] }
   0xe   :  { %1464 = vmatprep.mubr.msk.f32.mxu0 %vm214_vm1, %v155_v13  ;;  %1512 = vmatprep.mubr.msk.f32.mxu1 %vm214_vm1, %v187_v14  ;;  %v199_v38 = vld [vmem:[%s2291_s0 + $0x190] sm:$0xff]  ;;  %v200_v40 = vld [vmem:[%s2291_s0 + $0x198] sm:$0xff]  ;;  %v169_v41 = vld [vmem:[%s2291_s0 + $0xa0] sm:$0xff] }
   0xf   :  { %v201_v42 = vld [vmem:[%s2291_s0 + $0x1a0] sm:$0xff]  ;;  %v170_v43 = vld [vmem:[%s2291_s0 + $0xa8] sm:$0xff]  ;;  %v171_v45 = vld [vmem:[%s2291_s0 + $0xb0] sm:$0xff] }
  0x10   :  { %v202_v44 = vld [vmem:[%s2291_s0 + $0x1a8] sm:$0xff]  ;;  %v203_v46 = vld [vmem:[%s2291_s0 + $0x1b0] sm:$0xff]  ;;  %v172_v47 = vld [vmem:[%s2291_s0 + $0xb8] sm:$0xff] }
  0x11   :  { %1465 = vmatmul.mubr.msk.f32.gmra.mrb[6].mxu0 %vm214_vm1, %v156_v15  ;;  %1513 = vmatmul.mubr.msk.f32.gmra.mrb[6].mxu1 %vm214_vm1, %v188_v16  ;;  %v204_v48 = vld [vmem:[%s2291_s0 + $0x1b8] sm:$0xff]  ;;  %v173_v49 = vld [vmem:[%s2291_s0 + $0xc0] sm:$0xff]  ;;  %v174_v51 = vld [vmem:[%s2291_s0 + $0xc8] sm:$0xff] }
  0x12   :  { %1467 = vmatprep.mubr.msk.f32.mxu0 %vm214_vm1, %v157_v17  ;;  %1515 = vmatprep.mubr.msk.f32.mxu1 %vm214_vm1, %v189_v18  ;;  %v205_v50 = vld [vmem:[%s2291_s0 + $0x1c0] sm:$0xff]  ;;  %v206_v52 = vld [vmem:[%s2291_s0 + $0x1c8] sm:$0xff]  ;;  %v175_v53 = vld [vmem:[%s2291_s0 + $0xd0] sm:$0xff] }
  0x13   :  { %v207_v54 = vld [vmem:[%s2291_s0 + $0x1d0] sm:$0xff]  ;;  %v176_v55 = vld [vmem:[%s2291_s0 + $0xd8] sm:$0xff]  ;;  %v177_v57 = vld [vmem:[%s2291_s0 + $0xe0] sm:$0xff] }
  0x14   :  { %v208_v56 = vld [vmem:[%s2291_s0 + $0x1d8] sm:$0xff]  ;;  %v209_v58 = vld [vmem:[%s2291_s0 + $0x1e0] sm:$0xff]  ;;  %v178_v59 = vld [vmem:[%s2291_s0 + $0xe8] sm:$0xff] }
  0x15   :  { %1468 = vmatmul.mubr.msk.f32.gmra.mrb[8].mxu0 %vm214_vm1, %v158_v19  ;;  %1516 = vmatmul.mubr.msk.f32.gmra.mrb[8].mxu1 %vm214_vm1, %v190_v20  ;;  %v210_v60 = vld [vmem:[%s2291_s0 + $0x1e8] sm:$0xff]  ;;  %v179_v61 = vld [vmem:[%s2291_s0 + $0xf0] sm:$0xff]  ;;  %v180_v63 = vld [vmem:[%s2291_s0 + $0xf8] sm:$0xff] }
  0x16   :  { %1470 = vmatprep.mubr.msk.f32.mxu0 %vm214_vm1, %v159_v21  ;;  %1518 = vmatprep.mubr.msk.f32.mxu1 %vm214_vm1, %v191_v22  ;;  %v211_v62 = vld [vmem:[%s2291_s0 + $0x1f0] sm:$0xff]  ;;  %v212_v0 = vld [vmem:[%s2291_s0 + $0x1f8] sm:$0xff]  ;;  %v1840_v1 = vld [vmem:[%s2292_s2] ss:$0 sm:$0xff] }
  0x17   :  { %v1063_v3 = vld [vmem:[%s2293_s3 + $0x8] sm:$0xff]  ;;  %v1062_v9 = vld [vmem:[%s2293_s3] sm:$0xff]  ;;  %v1065_v19 = vld [vmem:[%s2293_s3 + $0x18] sm:$0xff] }
  0x18   :  { %v1095_v5 = vld [vmem:[%s2293_s3 + $0x108] sm:$0xff]  ;;  %v1094_v11 = vld [vmem:[%s2293_s3 + $0x100] sm:$0xff]  ;;  %v1097_v21 = vld [vmem:[%s2293_s3 + $0x118] sm:$0xff] }
  0x19   :  { %1471 = vmatmul.mubr.msk.f32.gmra.mrb[10].mxu0 %vm214_vm1, %v160_v23  ;;  %1519 = vmatmul.mubr.msk.f32.gmra.mrb[10].mxu1 %vm214_vm1, %v192_v24 }
  0x1a   :  { %1473 = vmatprep.mubr.msk.f32.mxu0 %vm214_vm1, %v161_v25  ;;  %1521 = vmatprep.mubr.msk.f32.mxu1 %vm214_vm1, %v193_v26 }
  0x1d   :  { %1474 = vmatmul.mubr.msk.f32.gmra.mrb[12].mxu0 %vm214_vm1, %v162_v27  ;;  %1522 = vmatmul.mubr.msk.f32.gmra.mrb[12].mxu1 %vm214_vm1, %v194_v28  ;;  %v1064_v27 = vld [vmem:[%s2293_s3 + $0x10] sm:$0xff] }
  0x1e   :  { %1476 = vmatprep.mubr.msk.f32.mxu0 %vm214_vm1, %v163_v29  ;;  %1524 = vmatprep.mubr.msk.f32.mxu1 %vm214_vm1, %v195_v30  ;;  %v1096_v29 = vld [vmem:[%s2293_s3 + $0x110] sm:$0xff] }
  0x21   :  { %1477 = vmatmul.mubr.msk.f32.gmra.mrb[14].mxu0 %vm214_vm1, %v164_v31  ;;  %1525 = vmatmul.mubr.msk.f32.gmra.mrb[14].mxu1 %vm214_vm1, %v196_v32 }
  0x22   :  { %1479 = vmatprep.mubr.msk.f32.mxu0 %vm214_vm1, %v165_v33  ;;  %1527 = vmatprep.mubr.msk.f32.mxu1 %vm214_vm1, %v197_v34 }
  0x25   :  { %1480 = vmatmul.mubr.msk.f32.gmra.mrb[16].mxu0 %vm214_vm1, %v166_v35  ;;  %1528 = vmatmul.mubr.msk.f32.gmra.mrb[16].mxu1 %vm214_vm1, %v198_v36 }
  0x26   :  { %1482 = vmatprep.mubr.msk.f32.mxu0 %vm214_vm1, %v167_v37  ;;  %1530 = vmatprep.mubr.msk.f32.mxu1 %vm214_vm1, %v199_v38 }
  0x29   :  { %1483 = vmatmul.mubr.msk.f32.gmra.mrb[18].mxu0 %vm214_vm1, %v168_v39  ;;  %1531 = vmatmul.mubr.msk.f32.gmra.mrb[18].mxu1 %vm214_vm1, %v200_v40  ;;  %v1067_v39 = vld [vmem:[%s2293_s3 + $0x28] sm:$0xff] }
  0x2a   :  { %1485 = vmatprep.mubr.msk.f32.mxu0 %vm214_vm1, %v169_v41  ;;  %1533 = vmatprep.mubr.msk.f32.mxu1 %vm214_vm1, %v201_v42  ;;  %v1099_v41 = vld [vmem:[%s2293_s3 + $0x128] sm:$0xff] }
  0x2d   :  { %1486 = vmatmul.mubr.msk.f32.gmra.mrb[20].mxu0 %vm214_vm1, %v170_v43  ;;  %1534 = vmatmul.mubr.msk.f32.gmra.mrb[20].mxu1 %vm214_vm1, %v202_v44 }
  0x2e   :  { %1488 = vmatprep.mubr.msk.f32.mxu0 %vm214_vm1, %v171_v45  ;;  %1536 = vmatprep.mubr.msk.f32.mxu1 %vm214_vm1, %v203_v46 }
  0x31   :  { %1489 = vmatmul.mubr.msk.f32.gmra.mrb[22].mxu0 %vm214_vm1, %v172_v47  ;;  %1537 = vmatmul.mubr.msk.f32.gmra.mrb[22].mxu1 %vm214_vm1, %v204_v48  ;;  %v1066_v47 = vld [vmem:[%s2293_s3 + $0x20] sm:$0xff] }
  0x32   :  { %1491 = vmatprep.mubr.msk.f32.mxu0 %vm214_vm1, %v173_v49  ;;  %1539 = vmatprep.mubr.msk.f32.mxu1 %vm214_vm1, %v205_v50  ;;  %v1098_v49 = vld [vmem:[%s2293_s3 + $0x120] sm:$0xff] }
  0x35   :  { %1492 = vmatmul.mubr.msk.f32.gmra.mrb[24].mxu0 %vm214_vm1, %v174_v51  ;;  %1540 = vmatmul.mubr.msk.f32.gmra.mrb[24].mxu1 %vm214_vm1, %v206_v52 }
  0x36   :  { %1494 = vmatprep.mubr.msk.f32.mxu0 %vm214_vm1, %v175_v53  ;;  %1542 = vmatprep.mubr.msk.f32.mxu1 %vm214_vm1, %v207_v54 }
  0x39   :  { %1495 = vmatmul.mubr.msk.f32.gmra.mrb[26].mxu0 %vm214_vm1, %v176_v55  ;;  %1543 = vmatmul.mubr.msk.f32.gmra.mrb[26].mxu1 %vm214_vm1, %v208_v56 }
  0x3a   :  { %1497 = vmatprep.mubr.msk.f32.mxu0 %vm214_vm1, %v177_v57  ;;  %1545 = vmatprep.mubr.msk.f32.mxu1 %vm214_vm1, %v209_v58 }
  0x3d   :  { %1498 = vmatmul.mubr.msk.f32.gmra.mrb[28].mxu0 %vm214_vm1, %v178_v59  ;;  %1546 = vmatmul.mubr.msk.f32.gmra.mrb[28].mxu1 %vm214_vm1, %v210_v60  ;;  %v1069_v59 = vld [vmem:[%s2293_s3 + $0x38] sm:$0xff] }
  0x3e   :  { %1500 = vmatprep.mubr.msk.f32.mxu0 %vm214_vm1, %v179_v61  ;;  %1548 = vmatprep.mubr.msk.f32.mxu1 %vm214_vm1, %v211_v62  ;;  %v1101_v61 = vld [vmem:[%s2293_s3 + $0x138] sm:$0xff] }
  0x41   :  { %1501 = vmatmul.mubr.msk.f32.gmra.mrb[30].mxu0 %vm214_vm1, %v180_v63  ;;  %1549 = vmatmul.mubr.msk.f32.gmra.mrb[30].mxu1 %vm214_vm1, %v212_v0 }
  0xd8   :  { %v1457_v2 = vpop.f32.mrb[0].mxu0  ;;  %v1505_v4 = vpop.f32.mrb[0].mxu1 }
  0xd9   :  { %v999_v6 = vadd.f32 %v1457_v2, %v1840_v1  ;;  %v1031_v7 = vadd.f32 %v1505_v4, %v1840_v1  ;;  %v477_v8 = vpop.f32.mrb[1].mxu0  ;;  %v637_v10 = vpop.f32.mrb[1].mxu1  ;;  %v1068_v4 = vld [vmem:[%s2293_s3 + $0x30] sm:$0xff] }
  0xda   :  { %v998_v12 = vadd.f32 %v1840_v1, %v477_v8  ;;  %v1030_v13 = vadd.f32 %v1840_v1, %v637_v10 }
  0xdb   :  { %v1127_v14 = vadd.f32 %v1063_v3, %v999_v6  ;;  %v1159_v15 = vadd.f32 %v1095_v5, %v1031_v7  ;;  %v1100_v6 = vld [vmem:[%s2293_s3 + $0x130] sm:$0xff] }
  0xdc   :  { %v1126_v16 = vadd.f32 %v1062_v9, %v998_v12  ;;  %v1158_v17 = vadd.f32 %v1094_v11, %v1030_v13  ;;  %v1460_v18 = vpop.f32.mrb[2].mxu0  ;;  %v1508_v20 = vpop.f32.mrb[2].mxu1 }
  0xdd   :  { %v1191_v22 = vmax.f32 %v1127_v14, 0.0  ;;  %v1223_v23 = vmax.f32 %v1159_v15, 0.0  ;;  %v1001_v24 = vadd.f32 %v1460_v18, %v1840_v1  ;;  %v1033_v25 = vadd.f32 %v1508_v20, %v1840_v1  ;;  %v487_v26 = vpop.f32.mrb[3].mxu0  ;;  %v647_v28 = vpop.f32.mrb[3].mxu1  ;;  %v1103_v18 = vld [vmem:[%s2293_s3 + $0x148] sm:$0xff] }
  0xde   :  { %v1190_v30 = vmax.f32 %v1126_v16, 0.0  ;;  %v1222_v31 = vmax.f32 %v1158_v17, 0.0  ;;  %v1000_v32 = vadd.f32 %v1840_v1, %v487_v26  ;;  %v1032_v33 = vadd.f32 %v1840_v1, %v647_v28  ;;  %v1071_v16 = vld [vmem:[%s2293_s3 + $0x48] sm:$0xff]  ;;  %v1102_v26 = vld [vmem:[%s2293_s3 + $0x140] sm:$0xff] }
  0xdf   :  { %1255 = vst [vmem:[%s2294_s4 + $0x8] sm:$0xff] %v1191_v22  ;;  %1287 = vst [vmem:[%s2294_s4 + $0x108] sm:$0xff] %v1223_v23  ;;  %v1129_v34 = vadd.f32 %v1065_v19, %v1001_v24  ;;  %v1161_v35 = vadd.f32 %v1097_v21, %v1033_v25  ;;  %v1070_v24 = vld [vmem:[%s2293_s3 + $0x40] sm:$0xff] }
  0xe0   :  { %1254 = vst [vmem:[%s2294_s4] sm:$0xff] %v1190_v30  ;;  %1286 = vst [vmem:[%s2294_s4 + $0x100] sm:$0xff] %v1222_v31  ;;  %v1128_v36 = vadd.f32 %v1064_v27, %v1000_v32  ;;  %v1160_v37 = vadd.f32 %v1096_v29, %v1032_v33  ;;  %v1463_v38 = vpop.f32.mrb[4].mxu0  ;;  %v1511_v40 = vpop.f32.mrb[4].mxu1 }
  0xe1   :  { %v1193_v42 = vmax.f32 %v1129_v34, 0.0  ;;  %v1225_v43 = vmax.f32 %v1161_v35, 0.0  ;;  %v1003_v44 = vadd.f32 %v1463_v38, %v1840_v1  ;;  %v1035_v45 = vadd.f32 %v1511_v40, %v1840_v1  ;;  %v497_v46 = vpop.f32.mrb[5].mxu0  ;;  %v657_v48 = vpop.f32.mrb[5].mxu1  ;;  %v1105_v38 = vld [vmem:[%s2293_s3 + $0x158] sm:$0xff] }
  0xe2   :  { %v1192_v50 = vmax.f32 %v1128_v36, 0.0  ;;  %v1224_v51 = vmax.f32 %v1160_v37, 0.0  ;;  %v1002_v52 = vadd.f32 %v1840_v1, %v497_v46  ;;  %v1034_v53 = vadd.f32 %v1840_v1, %v657_v48  ;;  %v1073_v36 = vld [vmem:[%s2293_s3 + $0x58] sm:$0xff]  ;;  %v1104_v46 = vld [vmem:[%s2293_s3 + $0x150] sm:$0xff] }
  0xe3   :  { %1257 = vst [vmem:[%s2294_s4 + $0x18] sm:$0xff] %v1193_v42  ;;  %1289 = vst [vmem:[%s2294_s4 + $0x118] sm:$0xff] %v1225_v43  ;;  %v1131_v54 = vadd.f32 %v1067_v39, %v1003_v44  ;;  %v1163_v55 = vadd.f32 %v1099_v41, %v1035_v45  ;;  %v1072_v44 = vld [vmem:[%s2293_s3 + $0x50] sm:$0xff] }
  0xe4   :  { %1256 = vst [vmem:[%s2294_s4 + $0x10] sm:$0xff] %v1192_v50  ;;  %1288 = vst [vmem:[%s2294_s4 + $0x110] sm:$0xff] %v1224_v51  ;;  %v1130_v56 = vadd.f32 %v1066_v47, %v1002_v52  ;;  %v1162_v57 = vadd.f32 %v1098_v49, %v1034_v53  ;;  %v1466_v58 = vpop.f32.mrb[6].mxu0  ;;  %v1514_v60 = vpop.f32.mrb[6].mxu1 }
  0xe5   :  { %v1195_v62 = vmax.f32 %v1131_v54, 0.0  ;;  %v1227_v63 = vmax.f32 %v1163_v55, 0.0  ;;  %v1005_v0 = vadd.f32 %v1466_v58, %v1840_v1  ;;  %v1037_v2 = vadd.f32 %v1514_v60, %v1840_v1  ;;  %v507_v3 = vpop.f32.mrb[7].mxu0  ;;  %v667_v5 = vpop.f32.mrb[7].mxu1  ;;  %v1107_v58 = vld [vmem:[%s2293_s3 + $0x168] sm:$0xff] }
  0xe6   :  { %v1194_v7 = vmax.f32 %v1130_v56, 0.0  ;;  %v1226_v8 = vmax.f32 %v1162_v57, 0.0  ;;  %v1004_v9 = vadd.f32 %v1840_v1, %v507_v3  ;;  %v1036_v10 = vadd.f32 %v1840_v1, %v667_v5  ;;  %v1075_v56 = vld [vmem:[%s2293_s3 + $0x68] sm:$0xff]  ;;  %v1106_v3 = vld [vmem:[%s2293_s3 + $0x160] sm:$0xff] }
  0xe7   :  { %1259 = vst [vmem:[%s2294_s4 + $0x28] sm:$0xff] %v1195_v62  ;;  %1291 = vst [vmem:[%s2294_s4 + $0x128] sm:$0xff] %v1227_v63  ;;  %v1133_v11 = vadd.f32 %v1069_v59, %v1005_v0  ;;  %v1165_v12 = vadd.f32 %v1101_v61, %v1037_v2  ;;  %v1074_v0 = vld [vmem:[%s2293_s3 + $0x60] sm:$0xff] }
  0xe8   :  { %1258 = vst [vmem:[%s2294_s4 + $0x20] sm:$0xff] %v1194_v7  ;;  %1290 = vst [vmem:[%s2294_s4 + $0x120] sm:$0xff] %v1226_v8  ;;  %v1132_v13 = vadd.f32 %v1068_v4, %v1004_v9  ;;  %v1164_v14 = vadd.f32 %v1100_v6, %v1036_v10  ;;  %v1469_v15 = vpop.f32.mrb[8].mxu0  ;;  %v1517_v17 = vpop.f32.mrb[8].mxu1 }
  0xe9   :  { %v1197_v19 = vmax.f32 %v1133_v11, 0.0  ;;  %v1229_v20 = vmax.f32 %v1165_v12, 0.0  ;;  %v1007_v21 = vadd.f32 %v1469_v15, %v1840_v1  ;;  %v1039_v22 = vadd.f32 %v1517_v17, %v1840_v1  ;;  %v517_v23 = vpop.f32.mrb[9].mxu0  ;;  %v677_v25 = vpop.f32.mrb[9].mxu1  ;;  %v1109_v15 = vld [vmem:[%s2293_s3 + $0x178] sm:$0xff] }
  0xea   :  { %v1196_v27 = vmax.f32 %v1132_v13, 0.0  ;;  %v1228_v28 = vmax.f32 %v1164_v14, 0.0  ;;  %v1006_v29 = vadd.f32 %v1840_v1, %v517_v23  ;;  %v1038_v30 = vadd.f32 %v1840_v1, %v677_v25  ;;  %v1077_v13 = vld [vmem:[%s2293_s3 + $0x78] sm:$0xff]  ;;  %v1108_v23 = vld [vmem:[%s2293_s3 + $0x170] sm:$0xff] }
  0xeb   :  { %1261 = vst [vmem:[%s2294_s4 + $0x38] sm:$0xff] %v1197_v19  ;;  %1293 = vst [vmem:[%s2294_s4 + $0x138] sm:$0xff] %v1229_v20  ;;  %v1135_v31 = vadd.f32 %v1071_v16, %v1007_v21  ;;  %v1167_v32 = vadd.f32 %v1103_v18, %v1039_v22  ;;  %v1076_v21 = vld [vmem:[%s2293_s3 + $0x70] sm:$0xff] }
  0xec   :  { %1260 = vst [vmem:[%s2294_s4 + $0x30] sm:$0xff] %v1196_v27  ;;  %1292 = vst [vmem:[%s2294_s4 + $0x130] sm:$0xff] %v1228_v28  ;;  %v1134_v33 = vadd.f32 %v1070_v24, %v1006_v29  ;;  %v1166_v34 = vadd.f32 %v1102_v26, %v1038_v30  ;;  %v1472_v35 = vpop.f32.mrb[10].mxu0  ;;  %v1520_v37 = vpop.f32.mrb[10].mxu1 }
  0xed   :  { %v1199_v39 = vmax.f32 %v1135_v31, 0.0  ;;  %v1231_v40 = vmax.f32 %v1167_v32, 0.0  ;;  %v1009_v41 = vadd.f32 %v1472_v35, %v1840_v1  ;;  %v1041_v42 = vadd.f32 %v1520_v37, %v1840_v1  ;;  %v527_v43 = vpop.f32.mrb[11].mxu0  ;;  %v687_v45 = vpop.f32.mrb[11].mxu1  ;;  %v1111_v35 = vld [vmem:[%s2293_s3 + $0x188] sm:$0xff] }
  0xee   :  { %v1198_v47 = vmax.f32 %v1134_v33, 0.0  ;;  %v1230_v48 = vmax.f32 %v1166_v34, 0.0  ;;  %v1008_v49 = vadd.f32 %v1840_v1, %v527_v43  ;;  %v1040_v50 = vadd.f32 %v1840_v1, %v687_v45  ;;  %v1079_v33 = vld [vmem:[%s2293_s3 + $0x88] sm:$0xff]  ;;  %v1110_v43 = vld [vmem:[%s2293_s3 + $0x180] sm:$0xff] }
  0xef   :  { %1263 = vst [vmem:[%s2294_s4 + $0x48] sm:$0xff] %v1199_v39  ;;  %1295 = vst [vmem:[%s2294_s4 + $0x148] sm:$0xff] %v1231_v40  ;;  %v1137_v51 = vadd.f32 %v1073_v36, %v1009_v41  ;;  %v1169_v52 = vadd.f32 %v1105_v38, %v1041_v42  ;;  %v1078_v41 = vld [vmem:[%s2293_s3 + $0x80] sm:$0xff] }
  0xf0   :  { %1262 = vst [vmem:[%s2294_s4 + $0x40] sm:$0xff] %v1198_v47  ;;  %1294 = vst [vmem:[%s2294_s4 + $0x140] sm:$0xff] %v1230_v48  ;;  %v1136_v53 = vadd.f32 %v1072_v44, %v1008_v49  ;;  %v1168_v54 = vadd.f32 %v1104_v46, %v1040_v50  ;;  %v1475_v55 = vpop.f32.mrb[12].mxu0  ;;  %v1523_v57 = vpop.f32.mrb[12].mxu1 }
  0xf1   :  { %v1201_v59 = vmax.f32 %v1137_v51, 0.0  ;;  %v1233_v60 = vmax.f32 %v1169_v52, 0.0  ;;  %v1011_v61 = vadd.f32 %v1475_v55, %v1840_v1  ;;  %v1043_v62 = vadd.f32 %v1523_v57, %v1840_v1  ;;  %v537_v63 = vpop.f32.mrb[13].mxu0  ;;  %v697_v2 = vpop.f32.mrb[13].mxu1  ;;  %v1113_v55 = vld [vmem:[%s2293_s3 + $0x198] sm:$0xff] }
  0xf2   :  { %v1200_v4 = vmax.f32 %v1136_v53, 0.0  ;;  %v1232_v5 = vmax.f32 %v1168_v54, 0.0  ;;  %v1010_v6 = vadd.f32 %v1840_v1, %v537_v63  ;;  %v1042_v7 = vadd.f32 %v1840_v1, %v697_v2  ;;  %v1081_v53 = vld [vmem:[%s2293_s3 + $0x98] sm:$0xff]  ;;  %v1112_v63 = vld [vmem:[%s2293_s3 + $0x190] sm:$0xff] }
  0xf3   :  { %1265 = vst [vmem:[%s2294_s4 + $0x58] sm:$0xff] %v1201_v59  ;;  %1297 = vst [vmem:[%s2294_s4 + $0x158] sm:$0xff] %v1233_v60  ;;  %v1139_v8 = vadd.f32 %v1075_v56, %v1011_v61  ;;  %v1171_v9 = vadd.f32 %v1107_v58, %v1043_v62  ;;  %v1080_v61 = vld [vmem:[%s2293_s3 + $0x90] sm:$0xff] }
  0xf4   :  { %1264 = vst [vmem:[%s2294_s4 + $0x50] sm:$0xff] %v1200_v4  ;;  %1296 = vst [vmem:[%s2294_s4 + $0x150] sm:$0xff] %v1232_v5  ;;  %v1138_v10 = vadd.f32 %v1074_v0, %v1010_v6  ;;  %v1170_v11 = vadd.f32 %v1106_v3, %v1042_v7  ;;  %v1478_v12 = vpop.f32.mrb[14].mxu0  ;;  %v1526_v14 = vpop.f32.mrb[14].mxu1 }
  0xf5   :  { %v1203_v16 = vmax.f32 %v1139_v8, 0.0  ;;  %v1235_v17 = vmax.f32 %v1171_v9, 0.0  ;;  %v1013_v18 = vadd.f32 %v1478_v12, %v1840_v1  ;;  %v1045_v19 = vadd.f32 %v1526_v14, %v1840_v1  ;;  %v547_v20 = vpop.f32.mrb[15].mxu0  ;;  %v707_v22 = vpop.f32.mrb[15].mxu1  ;;  %v1115_v12 = vld [vmem:[%s2293_s3 + $0x1a8] sm:$0xff] }
  0xf6   :  { %v1202_v24 = vmax.f32 %v1138_v10, 0.0  ;;  %v1234_v25 = vmax.f32 %v1170_v11, 0.0  ;;  %v1012_v26 = vadd.f32 %v1840_v1, %v547_v20  ;;  %v1044_v27 = vadd.f32 %v1840_v1, %v707_v22  ;;  %v1083_v10 = vld [vmem:[%s2293_s3 + $0xa8] sm:$0xff]  ;;  %v1114_v20 = vld [vmem:[%s2293_s3 + $0x1a0] sm:$0xff] }
  0xf7   :  { %1267 = vst [vmem:[%s2294_s4 + $0x68] sm:$0xff] %v1203_v16  ;;  %1299 = vst [vmem:[%s2294_s4 + $0x168] sm:$0xff] %v1235_v17  ;;  %v1141_v28 = vadd.f32 %v1077_v13, %v1013_v18  ;;  %v1173_v29 = vadd.f32 %v1109_v15, %v1045_v19  ;;  %v1082_v18 = vld [vmem:[%s2293_s3 + $0xa0] sm:$0xff] }
  0xf8   :  { %1266 = vst [vmem:[%s2294_s4 + $0x60] sm:$0xff] %v1202_v24  ;;  %1298 = vst [vmem:[%s2294_s4 + $0x160] sm:$0xff] %v1234_v25  ;;  %v1140_v30 = vadd.f32 %v1076_v21, %v1012_v26  ;;  %v1172_v31 = vadd.f32 %v1108_v23, %v1044_v27  ;;  %v1481_v32 = vpop.f32.mrb[16].mxu0  ;;  %v1529_v34 = vpop.f32.mrb[16].mxu1 }
  0xf9   :  { %v1205_v36 = vmax.f32 %v1141_v28, 0.0  ;;  %v1237_v37 = vmax.f32 %v1173_v29, 0.0  ;;  %v1015_v38 = vadd.f32 %v1481_v32, %v1840_v1  ;;  %v1047_v39 = vadd.f32 %v1529_v34, %v1840_v1  ;;  %v557_v40 = vpop.f32.mrb[17].mxu0  ;;  %v717_v42 = vpop.f32.mrb[17].mxu1  ;;  %v1117_v32 = vld [vmem:[%s2293_s3 + $0x1b8] sm:$0xff] }
  0xfa   :  { %v1204_v44 = vmax.f32 %v1140_v30, 0.0  ;;  %v1236_v45 = vmax.f32 %v1172_v31, 0.0  ;;  %v1014_v46 = vadd.f32 %v1840_v1, %v557_v40  ;;  %v1046_v47 = vadd.f32 %v1840_v1, %v717_v42  ;;  %v1085_v30 = vld [vmem:[%s2293_s3 + $0xb8] sm:$0xff]  ;;  %v1116_v40 = vld [vmem:[%s2293_s3 + $0x1b0] sm:$0xff] }
  0xfb   :  { %1269 = vst [vmem:[%s2294_s4 + $0x78] sm:$0xff] %v1205_v36  ;;  %1301 = vst [vmem:[%s2294_s4 + $0x178] sm:$0xff] %v1237_v37  ;;  %v1143_v48 = vadd.f32 %v1079_v33, %v1015_v38  ;;  %v1175_v49 = vadd.f32 %v1111_v35, %v1047_v39  ;;  %v1084_v38 = vld [vmem:[%s2293_s3 + $0xb0] sm:$0xff] }
  0xfc   :  { %1268 = vst [vmem:[%s2294_s4 + $0x70] sm:$0xff] %v1204_v44  ;;  %1300 = vst [vmem:[%s2294_s4 + $0x170] sm:$0xff] %v1236_v45  ;;  %v1142_v50 = vadd.f32 %v1078_v41, %v1014_v46  ;;  %v1174_v51 = vadd.f32 %v1110_v43, %v1046_v47  ;;  %v1484_v52 = vpop.f32.mrb[18].mxu0  ;;  %v1532_v54 = vpop.f32.mrb[18].mxu1 }
  0xfd   :  { %v1207_v56 = vmax.f32 %v1143_v48, 0.0  ;;  %v1239_v57 = vmax.f32 %v1175_v49, 0.0  ;;  %v1017_v58 = vadd.f32 %v1484_v52, %v1840_v1  ;;  %v1049_v59 = vadd.f32 %v1532_v54, %v1840_v1  ;;  %v567_v60 = vpop.f32.mrb[19].mxu0  ;;  %v727_v62 = vpop.f32.mrb[19].mxu1  ;;  %v1119_v52 = vld [vmem:[%s2293_s3 + $0x1c8] sm:$0xff] }
  0xfe   :  { %v1206_v0 = vmax.f32 %v1142_v50, 0.0  ;;  %v1238_v2 = vmax.f32 %v1174_v51, 0.0  ;;  %v1016_v3 = vadd.f32 %v1840_v1, %v567_v60  ;;  %v1048_v4 = vadd.f32 %v1840_v1, %v727_v62  ;;  %v1087_v50 = vld [vmem:[%s2293_s3 + $0xc8] sm:$0xff]  ;;  %v1118_v60 = vld [vmem:[%s2293_s3 + $0x1c0] sm:$0xff] }
  0xff   :  { %1271 = vst [vmem:[%s2294_s4 + $0x88] sm:$0xff] %v1207_v56  ;;  %1303 = vst [vmem:[%s2294_s4 + $0x188] sm:$0xff] %v1239_v57  ;;  %v1145_v5 = vadd.f32 %v1081_v53, %v1017_v58  ;;  %v1177_v6 = vadd.f32 %v1113_v55, %v1049_v59  ;;  %v1086_v58 = vld [vmem:[%s2293_s3 + $0xc0] sm:$0xff] }
 0x100   :  { %1270 = vst [vmem:[%s2294_s4 + $0x80] sm:$0xff] %v1206_v0  ;;  %1302 = vst [vmem:[%s2294_s4 + $0x180] sm:$0xff] %v1238_v2  ;;  %v1144_v7 = vadd.f32 %v1080_v61, %v1016_v3  ;;  %v1176_v8 = vadd.f32 %v1112_v63, %v1048_v4  ;;  %v1487_v9 = vpop.f32.mrb[20].mxu0  ;;  %v1535_v11 = vpop.f32.mrb[20].mxu1 }
 0x101   :  { %v1209_v13 = vmax.f32 %v1145_v5, 0.0  ;;  %v1241_v14 = vmax.f32 %v1177_v6, 0.0  ;;  %v1019_v15 = vadd.f32 %v1487_v9, %v1840_v1  ;;  %v1051_v16 = vadd.f32 %v1535_v11, %v1840_v1  ;;  %v577_v17 = vpop.f32.mrb[21].mxu0  ;;  %v737_v19 = vpop.f32.mrb[21].mxu1  ;;  %v1121_v9 = vld [vmem:[%s2293_s3 + $0x1d8] sm:$0xff] }
 0x102   :  { %v1208_v21 = vmax.f32 %v1144_v7, 0.0  ;;  %v1240_v22 = vmax.f32 %v1176_v8, 0.0  ;;  %v1018_v23 = vadd.f32 %v1840_v1, %v577_v17  ;;  %v1050_v24 = vadd.f32 %v1840_v1, %v737_v19  ;;  %v1089_v7 = vld [vmem:[%s2293_s3 + $0xd8] sm:$0xff]  ;;  %v1120_v17 = vld [vmem:[%s2293_s3 + $0x1d0] sm:$0xff] }
 0x103   :  { %1273 = vst [vmem:[%s2294_s4 + $0x98] sm:$0xff] %v1209_v13  ;;  %1305 = vst [vmem:[%s2294_s4 + $0x198] sm:$0xff] %v1241_v14  ;;  %v1147_v25 = vadd.f32 %v1083_v10, %v1019_v15  ;;  %v1179_v26 = vadd.f32 %v1115_v12, %v1051_v16  ;;  %v1088_v15 = vld [vmem:[%s2293_s3 + $0xd0] sm:$0xff] }
 0x104   :  { %1272 = vst [vmem:[%s2294_s4 + $0x90] sm:$0xff] %v1208_v21  ;;  %1304 = vst [vmem:[%s2294_s4 + $0x190] sm:$0xff] %v1240_v22  ;;  %v1146_v27 = vadd.f32 %v1082_v18, %v1018_v23  ;;  %v1178_v28 = vadd.f32 %v1114_v20, %v1050_v24  ;;  %v1490_v29 = vpop.f32.mrb[22].mxu0  ;;  %v1538_v31 = vpop.f32.mrb[22].mxu1 }
 0x105   :  { %v1211_v33 = vmax.f32 %v1147_v25, 0.0  ;;  %v1243_v34 = vmax.f32 %v1179_v26, 0.0  ;;  %v1021_v35 = vadd.f32 %v1490_v29, %v1840_v1  ;;  %v1053_v36 = vadd.f32 %v1538_v31, %v1840_v1  ;;  %v587_v37 = vpop.f32.mrb[23].mxu0  ;;  %v747_v39 = vpop.f32.mrb[23].mxu1  ;;  %v1123_v29 = vld [vmem:[%s2293_s3 + $0x1e8] sm:$0xff] }
 0x106   :  { %v1210_v41 = vmax.f32 %v1146_v27, 0.0  ;;  %v1242_v42 = vmax.f32 %v1178_v28, 0.0  ;;  %v1020_v43 = vadd.f32 %v1840_v1, %v587_v37  ;;  %v1052_v44 = vadd.f32 %v1840_v1, %v747_v39  ;;  %v1091_v27 = vld [vmem:[%s2293_s3 + $0xe8] sm:$0xff]  ;;  %v1122_v37 = vld [vmem:[%s2293_s3 + $0x1e0] sm:$0xff] }
 0x107   :  { %1275 = vst [vmem:[%s2294_s4 + $0xa8] sm:$0xff] %v1211_v33  ;;  %1307 = vst [vmem:[%s2294_s4 + $0x1a8] sm:$0xff] %v1243_v34  ;;  %v1149_v45 = vadd.f32 %v1085_v30, %v1021_v35  ;;  %v1181_v46 = vadd.f32 %v1117_v32, %v1053_v36  ;;  %v1090_v35 = vld [vmem:[%s2293_s3 + $0xe0] sm:$0xff] }
 0x108   :  { %1274 = vst [vmem:[%s2294_s4 + $0xa0] sm:$0xff] %v1210_v41  ;;  %1306 = vst [vmem:[%s2294_s4 + $0x1a0] sm:$0xff] %v1242_v42  ;;  %v1148_v47 = vadd.f32 %v1084_v38, %v1020_v43  ;;  %v1180_v48 = vadd.f32 %v1116_v40, %v1052_v44  ;;  %v1493_v49 = vpop.f32.mrb[24].mxu0  ;;  %v1541_v51 = vpop.f32.mrb[24].mxu1 }
 0x109   :  { %v1213_v53 = vmax.f32 %v1149_v45, 0.0  ;;  %v1245_v54 = vmax.f32 %v1181_v46, 0.0  ;;  %v1023_v55 = vadd.f32 %v1493_v49, %v1840_v1  ;;  %v1055_v56 = vadd.f32 %v1541_v51, %v1840_v1  ;;  %v597_v57 = vpop.f32.mrb[25].mxu0  ;;  %v757_v59 = vpop.f32.mrb[25].mxu1  ;;  %v1125_v49 = vld [vmem:[%s2293_s3 + $0x1f8] sm:$0xff] }
 0x10a   :  { %v1212_v61 = vmax.f32 %v1148_v47, 0.0  ;;  %v1244_v62 = vmax.f32 %v1180_v48, 0.0  ;;  %v1022_v63 = vadd.f32 %v1840_v1, %v597_v57  ;;  %v1054_v0 = vadd.f32 %v1840_v1, %v757_v59  ;;  %v1093_v47 = vld [vmem:[%s2293_s3 + $0xf8] sm:$0xff]  ;;  %v1124_v57 = vld [vmem:[%s2293_s3 + $0x1f0] sm:$0xff] }
 0x10b   :  { %1277 = vst [vmem:[%s2294_s4 + $0xb8] sm:$0xff] %v1213_v53  ;;  %1309 = vst [vmem:[%s2294_s4 + $0x1b8] sm:$0xff] %v1245_v54  ;;  %v1151_v2 = vadd.f32 %v1087_v50, %v1023_v55  ;;  %v1183_v3 = vadd.f32 %v1119_v52, %v1055_v56  ;;  %v1092_v55 = vld [vmem:[%s2293_s3 + $0xf0] sm:$0xff] }
 0x10c   :  { %1276 = vst [vmem:[%s2294_s4 + $0xb0] sm:$0xff] %v1212_v61  ;;  %1308 = vst [vmem:[%s2294_s4 + $0x1b0] sm:$0xff] %v1244_v62  ;;  %v1150_v4 = vadd.f32 %v1086_v58, %v1022_v63  ;;  %v1182_v5 = vadd.f32 %v1118_v60, %v1054_v0  ;;  %v1496_v6 = vpop.f32.mrb[26].mxu0  ;;  %v1544_v8 = vpop.f32.mrb[26].mxu1 }
 0x10d   :  { %v1215_v10 = vmax.f32 %v1151_v2, 0.0  ;;  %v1247_v11 = vmax.f32 %v1183_v3, 0.0  ;;  %v1025_v12 = vadd.f32 %v1496_v6, %v1840_v1  ;;  %v1057_v13 = vadd.f32 %v1544_v8, %v1840_v1  ;;  %v607_v14 = vpop.f32.mrb[27].mxu0  ;;  %v767_v16 = vpop.f32.mrb[27].mxu1 }
 0x10e   :  { %v1214_v18 = vmax.f32 %v1150_v4, 0.0  ;;  %v1246_v19 = vmax.f32 %v1182_v5, 0.0  ;;  %v1024_v20 = vadd.f32 %v1840_v1, %v607_v14  ;;  %v1056_v21 = vadd.f32 %v1840_v1, %v767_v16 }
 0x10f   :  { %1279 = vst [vmem:[%s2294_s4 + $0xc8] sm:$0xff] %v1215_v10  ;;  %1311 = vst [vmem:[%s2294_s4 + $0x1c8] sm:$0xff] %v1247_v11  ;;  %v1153_v22 = vadd.f32 %v1089_v7, %v1025_v12  ;;  %v1185_v23 = vadd.f32 %v1121_v9, %v1057_v13 }
 0x110   :  { %1278 = vst [vmem:[%s2294_s4 + $0xc0] sm:$0xff] %v1214_v18  ;;  %1310 = vst [vmem:[%s2294_s4 + $0x1c0] sm:$0xff] %v1246_v19  ;;  %v1152_v24 = vadd.f32 %v1088_v15, %v1024_v20  ;;  %v1184_v25 = vadd.f32 %v1120_v17, %v1056_v21  ;;  %v1499_v26 = vpop.f32.mrb[28].mxu0  ;;  %v1547_v28 = vpop.f32.mrb[28].mxu1 }
 0x111   :  { %v1217_v30 = vmax.f32 %v1153_v22, 0.0  ;;  %v1249_v31 = vmax.f32 %v1185_v23, 0.0  ;;  %v1027_v32 = vadd.f32 %v1499_v26, %v1840_v1  ;;  %v1059_v33 = vadd.f32 %v1547_v28, %v1840_v1  ;;  %v617_v34 = vpop.f32.mrb[29].mxu0  ;;  %v777_v36 = vpop.f32.mrb[29].mxu1 }
 0x112   :  { %v1216_v38 = vmax.f32 %v1152_v24, 0.0  ;;  %v1248_v39 = vmax.f32 %v1184_v25, 0.0  ;;  %v1026_v40 = vadd.f32 %v1840_v1, %v617_v34  ;;  %v1058_v41 = vadd.f32 %v1840_v1, %v777_v36 }
 0x113   :  { %1281 = vst [vmem:[%s2294_s4 + $0xd8] sm:$0xff] %v1217_v30  ;;  %1313 = vst [vmem:[%s2294_s4 + $0x1d8] sm:$0xff] %v1249_v31  ;;  %v1155_v42 = vadd.f32 %v1091_v27, %v1027_v32  ;;  %v1187_v43 = vadd.f32 %v1123_v29, %v1059_v33 }
 0x114   :  { %1280 = vst [vmem:[%s2294_s4 + $0xd0] sm:$0xff] %v1216_v38  ;;  %1312 = vst [vmem:[%s2294_s4 + $0x1d0] sm:$0xff] %v1248_v39  ;;  %v1154_v44 = vadd.f32 %v1090_v35, %v1026_v40  ;;  %v1186_v45 = vadd.f32 %v1122_v37, %v1058_v41  ;;  %v1502_v46 = vpop.f32.mrb[30].mxu0  ;;  %v1550_v48 = vpop.f32.mrb[30].mxu1 }
 0x115   :  { %v1219_v50 = vmax.f32 %v1155_v42, 0.0  ;;  %v1251_v51 = vmax.f32 %v1187_v43, 0.0  ;;  %v1029_v52 = vadd.f32 %v1502_v46, %v1840_v1  ;;  %v1061_v53 = vadd.f32 %v1550_v48, %v1840_v1  ;;  %v627_v54 = vpop.f32.mrb[31].mxu0  ;;  %v787_v56 = vpop.f32.mrb[31].mxu1 }
 0x116   :  { %v1218_v58 = vmax.f32 %v1154_v44, 0.0  ;;  %v1250_v59 = vmax.f32 %v1186_v45, 0.0  ;;  %v1028_v60 = vadd.f32 %v1840_v1, %v627_v54  ;;  %v1060_v61 = vadd.f32 %v1840_v1, %v787_v56 }
 0x117   :  { %1283 = vst [vmem:[%s2294_s4 + $0xe8] sm:$0xff] %v1219_v50  ;;  %1315 = vst [vmem:[%s2294_s4 + $0x1e8] sm:$0xff] %v1251_v51  ;;  %v1157_v62 = vadd.f32 %v1093_v47, %v1029_v52  ;;  %v1189_v63 = vadd.f32 %v1125_v49, %v1061_v53 }
 0x118   :  { %1282 = vst [vmem:[%s2294_s4 + $0xe0] sm:$0xff] %v1218_v58  ;;  %1314 = vst [vmem:[%s2294_s4 + $0x1e0] sm:$0xff] %v1250_v59  ;;  %v1156_v0 = vadd.f32 %v1092_v55, %v1028_v60  ;;  %v1188_v1 = vadd.f32 %v1124_v57, %v1060_v61 }
 0x119   :  { %v1221_v2 = vmax.f32 %v1157_v62, 0.0  ;;  %v1253_v3 = vmax.f32 %v1189_v63, 0.0 }
 0x11a   :  { %v1220_v4 = vmax.f32 %v1156_v0, 0.0  ;;  %v1252_v5 = vmax.f32 %v1188_v1, 0.0 }
 0x11b   :  { %1285 = vst [vmem:[%s2294_s4 + $0xf8] sm:$0xff] %v1221_v2  ;;  %1317 = vst [vmem:[%s2294_s4 + $0x1f8] sm:$0xff] %v1253_v3 }
 0x11c   :  { %1284 = vst [vmem:[%s2294_s4 + $0xf0] sm:$0xff] %v1220_v4  ;;  %1316 = vst [vmem:[%s2294_s4 + $0x1f0] sm:$0xff] %v1252_v5 }

// kernel: _lambda_.18
= control target key start
LH: loop header
LB: loop body
LE: loop exit
PB: predicated region body
PF: predicated region fallthrough
CT: control target
= control target key end

     0   :  { %vm212_vm0 = vcmask 130048   ;;  %s1968_s1 = inlined_call_operand.vmem [shape: f32[16,128], index: 1, kind: input, shape index: {}]   ;;  %s1969_s0 = inlined_call_operand.vmem [shape: f32[512,16], index: 0, kind: input, shape index: {}]   ;;  %s1970_s2 = inlined_call_operand.vmem [shape: f32[1,128], index: 2, kind: input, shape index: {}]   ;;  %s1971_s3 = inlined_call_operand.vmem [shape: f32[512,128], index: 3, kind: output, shape index: {}]  }
   0x1   :  { %v210_v0 = vld [vmem:[%s1968_s1] sm:$0xff]  ;;  %v211_v1 = vld [vmem:[%s1968_s1 + $0x8] sm:$0xff]  ;;  %v148_v7 = vld [vmem:[%s1969_s0 + $0x10] sm:$0xff] }
   0x2   :  { %v146_v2 = vld [vmem:[%s1969_s0] sm:$0xff]  ;;  %v1419_v3 = vpack.c.bf16 %v211_v1, %v210_v0  ;;  %v147_v5 = vld [vmem:[%s1969_s0 + $0x8] sm:$0xff]  ;;  %v180_v8 = vld [vmem:[%s1969_s0 + $0x110] sm:$0xff] }
   0x3   :  { %1323 = vmatprep.mubr.msk.f32.mxu0 %vm212_vm0, %v146_v2  ;;  %v178_v4 = vld [vmem:[%s1969_s0 + $0x100] sm:$0xff]  ;;  %v179_v6 = vld [vmem:[%s1969_s0 + $0x108] sm:$0xff]  ;;  %v149_v9 = vld [vmem:[%s1969_s0 + $0x18] sm:$0xff] }
   0x4   :  { %1371 = vmatprep.mubr.msk.f32.mxu1 %vm212_vm0, %v178_v4  ;;  %1420 = vmatprep.subr.bf16.mxu0 %v1419_v3  ;;  %v181_v10 = vld [vmem:[%s1969_s0 + $0x118] sm:$0xff]  ;;  %v150_v11 = vld [vmem:[%s1969_s0 + $0x20] sm:$0xff]  ;;  %v151_v13 = vld [vmem:[%s1969_s0 + $0x28] sm:$0xff] }
   0x5   :  { %1423 = vmatprep.subr.bf16.mxu1 %v1419_v3  ;;  %1422 = vmatpush3.bf16.msra.mxu0 %v1419_v3  ;;  %v182_v12 = vld [vmem:[%s1969_s0 + $0x120] sm:$0xff]  ;;  %v183_v14 = vld [vmem:[%s1969_s0 + $0x128] sm:$0xff]  ;;  %v152_v15 = vld [vmem:[%s1969_s0 + $0x30] sm:$0xff] }
   0x6   :  { %1424 = vmatpush3.bf16.msra.mxu1 %v1419_v3  ;;  %v184_v16 = vld [vmem:[%s1969_s0 + $0x130] sm:$0xff]  ;;  %v153_v17 = vld [vmem:[%s1969_s0 + $0x38] sm:$0xff]  ;;  %v154_v19 = vld [vmem:[%s1969_s0 + $0x40] sm:$0xff] }
   0x7   :  { %v185_v18 = vld [vmem:[%s1969_s0 + $0x138] sm:$0xff]  ;;  %v186_v20 = vld [vmem:[%s1969_s0 + $0x140] sm:$0xff]  ;;  %v155_v21 = vld [vmem:[%s1969_s0 + $0x48] sm:$0xff] }
   0x8   :  { %1324 = vmatmul.mubr.msk.f32.vlgmr.msra.gmra.mrb[0].mxu0 %vm212_vm0, %v147_v5  ;;  %v187_v22 = vld [vmem:[%s1969_s0 + $0x148] sm:$0xff]  ;;  %v156_v23 = vld [vmem:[%s1969_s0 + $0x50] sm:$0xff]  ;;  %v157_v25 = vld [vmem:[%s1969_s0 + $0x58] sm:$0xff] }
   0x9   :  { %1372 = vmatmul.mubr.msk.f32.vlgmr.msra.gmra.mrb[0].mxu1 %vm212_vm0, %v179_v6  ;;  %1326 = vmatprep.mubr.msk.f32.mxu0 %vm212_vm0, %v148_v7  ;;  %v188_v24 = vld [vmem:[%s1969_s0 + $0x150] sm:$0xff]  ;;  %v189_v26 = vld [vmem:[%s1969_s0 + $0x158] sm:$0xff]  ;;  %v158_v27 = vld [vmem:[%s1969_s0 + $0x60] sm:$0xff] }
   0xa   :  { %1374 = vmatprep.mubr.msk.f32.mxu1 %vm212_vm0, %v180_v8  ;;  %v190_v28 = vld [vmem:[%s1969_s0 + $0x160] sm:$0xff]  ;;  %v159_v29 = vld [vmem:[%s1969_s0 + $0x68] sm:$0xff]  ;;  %v160_v31 = vld [vmem:[%s1969_s0 + $0x70] sm:$0xff] }
   0xb   :  { %v191_v30 = vld [vmem:[%s1969_s0 + $0x168] sm:$0xff]  ;;  %v192_v32 = vld [vmem:[%s1969_s0 + $0x170] sm:$0xff]  ;;  %v161_v33 = vld [vmem:[%s1969_s0 + $0x78] sm:$0xff] }
   0xc   :  { %1327 = vmatmul.mubr.msk.f32.gmra.mrb[2].mxu0 %vm212_vm0, %v149_v9  ;;  %v193_v34 = vld [vmem:[%s1969_s0 + $0x178] sm:$0xff]  ;;  %v162_v35 = vld [vmem:[%s1969_s0 + $0x80] sm:$0xff]  ;;  %v163_v37 = vld [vmem:[%s1969_s0 + $0x88] sm:$0xff] }
   0xd   :  { %1375 = vmatmul.mubr.msk.f32.gmra.mrb[2].mxu1 %vm212_vm0, %v181_v10  ;;  %1329 = vmatprep.mubr.msk.f32.mxu0 %vm212_vm0, %v150_v11  ;;  %v194_v36 = vld [vmem:[%s1969_s0 + $0x180] sm:$0xff]  ;;  %v195_v38 = vld [vmem:[%s1969_s0 + $0x188] sm:$0xff]  ;;  %v164_v39 = vld [vmem:[%s1969_s0 + $0x90] sm:$0xff] }
   0xe   :  { %1377 = vmatprep.mubr.msk.f32.mxu1 %vm212_vm0, %v182_v12  ;;  %v196_v40 = vld [vmem:[%s1969_s0 + $0x190] sm:$0xff]  ;;  %v165_v41 = vld [vmem:[%s1969_s0 + $0x98] sm:$0xff]  ;;  %v166_v43 = vld [vmem:[%s1969_s0 + $0xa0] sm:$0xff] }
   0xf   :  { %v197_v42 = vld [vmem:[%s1969_s0 + $0x198] sm:$0xff]  ;;  %v198_v44 = vld [vmem:[%s1969_s0 + $0x1a0] sm:$0xff]  ;;  %v167_v45 = vld [vmem:[%s1969_s0 + $0xa8] sm:$0xff] }
  0x10   :  { %1330 = vmatmul.mubr.msk.f32.gmra.mrb[4].mxu0 %vm212_vm0, %v151_v13  ;;  %v199_v46 = vld [vmem:[%s1969_s0 + $0x1a8] sm:$0xff]  ;;  %v168_v47 = vld [vmem:[%s1969_s0 + $0xb0] sm:$0xff]  ;;  %v169_v49 = vld [vmem:[%s1969_s0 + $0xb8] sm:$0xff] }
  0x11   :  { %1378 = vmatmul.mubr.msk.f32.gmra.mrb[4].mxu1 %vm212_vm0, %v183_v14  ;;  %1332 = vmatprep.mubr.msk.f32.mxu0 %vm212_vm0, %v152_v15  ;;  %v200_v48 = vld [vmem:[%s1969_s0 + $0x1b0] sm:$0xff]  ;;  %v201_v50 = vld [vmem:[%s1969_s0 + $0x1b8] sm:$0xff]  ;;  %v170_v51 = vld [vmem:[%s1969_s0 + $0xc0] sm:$0xff] }
  0x12   :  { %1380 = vmatprep.mubr.msk.f32.mxu1 %vm212_vm0, %v184_v16  ;;  %v202_v52 = vld [vmem:[%s1969_s0 + $0x1c0] sm:$0xff]  ;;  %v171_v53 = vld [vmem:[%s1969_s0 + $0xc8] sm:$0xff]  ;;  %v172_v55 = vld [vmem:[%s1969_s0 + $0xd0] sm:$0xff] }
  0x13   :  { %v203_v54 = vld [vmem:[%s1969_s0 + $0x1c8] sm:$0xff]  ;;  %v204_v56 = vld [vmem:[%s1969_s0 + $0x1d0] sm:$0xff]  ;;  %v173_v57 = vld [vmem:[%s1969_s0 + $0xd8] sm:$0xff] }
  0x14   :  { %1333 = vmatmul.mubr.msk.f32.gmra.mrb[6].mxu0 %vm212_vm0, %v153_v17  ;;  %v205_v58 = vld [vmem:[%s1969_s0 + $0x1d8] sm:$0xff]  ;;  %v174_v59 = vld [vmem:[%s1969_s0 + $0xe0] sm:$0xff]  ;;  %v175_v61 = vld [vmem:[%s1969_s0 + $0xe8] sm:$0xff] }
  0x15   :  { %1381 = vmatmul.mubr.msk.f32.gmra.mrb[6].mxu1 %vm212_vm0, %v185_v18  ;;  %1335 = vmatprep.mubr.msk.f32.mxu0 %vm212_vm0, %v154_v19  ;;  %v206_v60 = vld [vmem:[%s1969_s0 + $0x1e0] sm:$0xff]  ;;  %v207_v62 = vld [vmem:[%s1969_s0 + $0x1e8] sm:$0xff]  ;;  %v176_v63 = vld [vmem:[%s1969_s0 + $0xf0] sm:$0xff] }
  0x16   :  { %1383 = vmatprep.mubr.msk.f32.mxu1 %vm212_vm0, %v186_v20  ;;  %v208_v0 = vld [vmem:[%s1969_s0 + $0x1f0] sm:$0xff]  ;;  %v177_v1 = vld [vmem:[%s1969_s0 + $0xf8] sm:$0xff]  ;;  %v1710_v3 = vld [vmem:[%s1970_s2] ss:$0 sm:$0xff] }
  0x17   :  { %v209_v2 = vld [vmem:[%s1969_s0 + $0x1f8] sm:$0xff] }
  0x18   :  { %1336 = vmatmul.mubr.msk.f32.gmra.mrb[8].mxu0 %vm212_vm0, %v155_v21 }
  0x19   :  { %1384 = vmatmul.mubr.msk.f32.gmra.mrb[8].mxu1 %vm212_vm0, %v187_v22  ;;  %1338 = vmatprep.mubr.msk.f32.mxu0 %vm212_vm0, %v156_v23 }
  0x1a   :  { %1386 = vmatprep.mubr.msk.f32.mxu1 %vm212_vm0, %v188_v24 }
  0x1c   :  { %1339 = vmatmul.mubr.msk.f32.gmra.mrb[10].mxu0 %vm212_vm0, %v157_v25 }
  0x1d   :  { %1387 = vmatmul.mubr.msk.f32.gmra.mrb[10].mxu1 %vm212_vm0, %v189_v26  ;;  %1341 = vmatprep.mubr.msk.f32.mxu0 %vm212_vm0, %v158_v27 }
  0x1e   :  { %1389 = vmatprep.mubr.msk.f32.mxu1 %vm212_vm0, %v190_v28 }
  0x20   :  { %1342 = vmatmul.mubr.msk.f32.gmra.mrb[12].mxu0 %vm212_vm0, %v159_v29 }
  0x21   :  { %1390 = vmatmul.mubr.msk.f32.gmra.mrb[12].mxu1 %vm212_vm0, %v191_v30  ;;  %1344 = vmatprep.mubr.msk.f32.mxu0 %vm212_vm0, %v160_v31 }
  0x22   :  { %1392 = vmatprep.mubr.msk.f32.mxu1 %vm212_vm0, %v192_v32 }
  0x24   :  { %1345 = vmatmul.mubr.msk.f32.gmra.mrb[14].mxu0 %vm212_vm0, %v161_v33 }
  0x25   :  { %1393 = vmatmul.mubr.msk.f32.gmra.mrb[14].mxu1 %vm212_vm0, %v193_v34  ;;  %1347 = vmatprep.mubr.msk.f32.mxu0 %vm212_vm0, %v162_v35 }
  0x26   :  { %1395 = vmatprep.mubr.msk.f32.mxu1 %vm212_vm0, %v194_v36 }
  0x28   :  { %1348 = vmatmul.mubr.msk.f32.gmra.mrb[16].mxu0 %vm212_vm0, %v163_v37 }
  0x29   :  { %1396 = vmatmul.mubr.msk.f32.gmra.mrb[16].mxu1 %vm212_vm0, %v195_v38  ;;  %1350 = vmatprep.mubr.msk.f32.mxu0 %vm212_vm0, %v164_v39 }
  0x2a   :  { %1398 = vmatprep.mubr.msk.f32.mxu1 %vm212_vm0, %v196_v40 }
  0x2c   :  { %1351 = vmatmul.mubr.msk.f32.gmra.mrb[18].mxu0 %vm212_vm0, %v165_v41 }
  0x2d   :  { %1399 = vmatmul.mubr.msk.f32.gmra.mrb[18].mxu1 %vm212_vm0, %v197_v42  ;;  %1353 = vmatprep.mubr.msk.f32.mxu0 %vm212_vm0, %v166_v43 }
  0x2e   :  { %1401 = vmatprep.mubr.msk.f32.mxu1 %vm212_vm0, %v198_v44 }
  0x30   :  { %1354 = vmatmul.mubr.msk.f32.gmra.mrb[20].mxu0 %vm212_vm0, %v167_v45 }
  0x31   :  { %1402 = vmatmul.mubr.msk.f32.gmra.mrb[20].mxu1 %vm212_vm0, %v199_v46  ;;  %1356 = vmatprep.mubr.msk.f32.mxu0 %vm212_vm0, %v168_v47 }
  0x32   :  { %1404 = vmatprep.mubr.msk.f32.mxu1 %vm212_vm0, %v200_v48 }
  0x34   :  { %1357 = vmatmul.mubr.msk.f32.gmra.mrb[22].mxu0 %vm212_vm0, %v169_v49 }
  0x35   :  { %1405 = vmatmul.mubr.msk.f32.gmra.mrb[22].mxu1 %vm212_vm0, %v201_v50  ;;  %1359 = vmatprep.mubr.msk.f32.mxu0 %vm212_vm0, %v170_v51 }
  0x36   :  { %1407 = vmatprep.mubr.msk.f32.mxu1 %vm212_vm0, %v202_v52 }
  0x38   :  { %1360 = vmatmul.mubr.msk.f32.gmra.mrb[24].mxu0 %vm212_vm0, %v171_v53 }
  0x39   :  { %1408 = vmatmul.mubr.msk.f32.gmra.mrb[24].mxu1 %vm212_vm0, %v203_v54  ;;  %1362 = vmatprep.mubr.msk.f32.mxu0 %vm212_vm0, %v172_v55 }
  0x3a   :  { %1410 = vmatprep.mubr.msk.f32.mxu1 %vm212_vm0, %v204_v56 }
  0x3c   :  { %1363 = vmatmul.mubr.msk.f32.gmra.mrb[26].mxu0 %vm212_vm0, %v173_v57 }
  0x3d   :  { %1411 = vmatmul.mubr.msk.f32.gmra.mrb[26].mxu1 %vm212_vm0, %v205_v58  ;;  %1365 = vmatprep.mubr.msk.f32.mxu0 %vm212_vm0, %v174_v59 }
  0x3e   :  { %1413 = vmatprep.mubr.msk.f32.mxu1 %vm212_vm0, %v206_v60 }
  0x40   :  { %1366 = vmatmul.mubr.msk.f32.gmra.mrb[28].mxu0 %vm212_vm0, %v175_v61 }
  0x41   :  { %1414 = vmatmul.mubr.msk.f32.gmra.mrb[28].mxu1 %vm212_vm0, %v207_v62  ;;  %1368 = vmatprep.mubr.msk.f32.mxu0 %vm212_vm0, %v176_v63 }
  0x42   :  { %1416 = vmatprep.mubr.msk.f32.mxu1 %vm212_vm0, %v208_v0 }
  0x44   :  { %1369 = vmatmul.mubr.msk.f32.gmra.mrb[30].mxu0 %vm212_vm0, %v177_v1 }
  0x45   :  { %1417 = vmatmul.mubr.msk.f32.gmra.mrb[30].mxu1 %vm212_vm0, %v209_v2 }
  0xdb   :  { %v1325_v4 = vpop.f32.mrb[0].mxu0 }
  0xdc   :  { %v1373_v5 = vpop.f32.mrb[0].mxu1  ;;  %v993_v6 = vadd.f32 %v1325_v4, %v1710_v3  ;;  %v471_v8 = vpop.f32.mrb[1].mxu0 }
  0xdd   :  { %v1025_v7 = vadd.f32 %v1373_v5, %v1710_v3  ;;  %v631_v9 = vpop.f32.mrb[1].mxu1  ;;  %v992_v10 = vadd.f32 %v1710_v3, %v471_v8 }
  0xde   :  { %v1024_v11 = vadd.f32 %v1710_v3, %v631_v9  ;;  %v1057_v12 = vmax.f32 %v993_v6, 0.0 }
  0xdf   :  { %v1089_v13 = vmax.f32 %v1025_v7, 0.0  ;;  %v1056_v14 = vmax.f32 %v992_v10, 0.0  ;;  %v1328_v16 = vpop.f32.mrb[2].mxu0 }
  0xe0   :  { %v1088_v15 = vmax.f32 %v1024_v11, 0.0  ;;  %v1376_v17 = vpop.f32.mrb[2].mxu1  ;;  %1121 = vst [vmem:[%s1971_s3 + $0x8] sm:$0xff] %v1057_v12  ;;  %v995_v18 = vadd.f32 %v1328_v16, %v1710_v3  ;;  %v481_v20 = vpop.f32.mrb[3].mxu0 }
  0xe1   :  { %1153 = vst [vmem:[%s1971_s3 + $0x108] sm:$0xff] %v1089_v13  ;;  %v1027_v19 = vadd.f32 %v1376_v17, %v1710_v3  ;;  %v641_v21 = vpop.f32.mrb[3].mxu1  ;;  %1120 = vst [vmem:[%s1971_s3] sm:$0xff] %v1056_v14  ;;  %v994_v22 = vadd.f32 %v1710_v3, %v481_v20 }
  0xe2   :  { %1152 = vst [vmem:[%s1971_s3 + $0x100] sm:$0xff] %v1088_v15  ;;  %v1026_v23 = vadd.f32 %v1710_v3, %v641_v21  ;;  %v1059_v24 = vmax.f32 %v995_v18, 0.0 }
  0xe3   :  { %v1091_v25 = vmax.f32 %v1027_v19, 0.0  ;;  %v1058_v26 = vmax.f32 %v994_v22, 0.0  ;;  %v1331_v28 = vpop.f32.mrb[4].mxu0 }
  0xe4   :  { %v1090_v27 = vmax.f32 %v1026_v23, 0.0  ;;  %v1379_v29 = vpop.f32.mrb[4].mxu1  ;;  %1123 = vst [vmem:[%s1971_s3 + $0x18] sm:$0xff] %v1059_v24  ;;  %v997_v30 = vadd.f32 %v1331_v28, %v1710_v3  ;;  %v491_v32 = vpop.f32.mrb[5].mxu0 }
  0xe5   :  { %1155 = vst [vmem:[%s1971_s3 + $0x118] sm:$0xff] %v1091_v25  ;;  %v1029_v31 = vadd.f32 %v1379_v29, %v1710_v3  ;;  %v651_v33 = vpop.f32.mrb[5].mxu1  ;;  %1122 = vst [vmem:[%s1971_s3 + $0x10] sm:$0xff] %v1058_v26  ;;  %v996_v34 = vadd.f32 %v1710_v3, %v491_v32 }
  0xe6   :  { %1154 = vst [vmem:[%s1971_s3 + $0x110] sm:$0xff] %v1090_v27  ;;  %v1028_v35 = vadd.f32 %v1710_v3, %v651_v33  ;;  %v1061_v36 = vmax.f32 %v997_v30, 0.0 }
  0xe7   :  { %v1093_v37 = vmax.f32 %v1029_v31, 0.0  ;;  %v1060_v38 = vmax.f32 %v996_v34, 0.0  ;;  %v1334_v40 = vpop.f32.mrb[6].mxu0 }
  0xe8   :  { %v1092_v39 = vmax.f32 %v1028_v35, 0.0  ;;  %v1382_v41 = vpop.f32.mrb[6].mxu1  ;;  %1125 = vst [vmem:[%s1971_s3 + $0x28] sm:$0xff] %v1061_v36  ;;  %v999_v42 = vadd.f32 %v1334_v40, %v1710_v3  ;;  %v501_v44 = vpop.f32.mrb[7].mxu0 }
  0xe9   :  { %1157 = vst [vmem:[%s1971_s3 + $0x128] sm:$0xff] %v1093_v37  ;;  %v1031_v43 = vadd.f32 %v1382_v41, %v1710_v3  ;;  %v661_v45 = vpop.f32.mrb[7].mxu1  ;;  %1124 = vst [vmem:[%s1971_s3 + $0x20] sm:$0xff] %v1060_v38  ;;  %v998_v46 = vadd.f32 %v1710_v3, %v501_v44 }
  0xea   :  { %1156 = vst [vmem:[%s1971_s3 + $0x120] sm:$0xff] %v1092_v39  ;;  %v1030_v47 = vadd.f32 %v1710_v3, %v661_v45  ;;  %v1063_v48 = vmax.f32 %v999_v42, 0.0 }
  0xeb   :  { %v1095_v49 = vmax.f32 %v1031_v43, 0.0  ;;  %v1062_v50 = vmax.f32 %v998_v46, 0.0  ;;  %v1337_v52 = vpop.f32.mrb[8].mxu0 }
  0xec   :  { %v1094_v51 = vmax.f32 %v1030_v47, 0.0  ;;  %v1385_v53 = vpop.f32.mrb[8].mxu1  ;;  %1127 = vst [vmem:[%s1971_s3 + $0x38] sm:$0xff] %v1063_v48  ;;  %v1001_v54 = vadd.f32 %v1337_v52, %v1710_v3  ;;  %v511_v56 = vpop.f32.mrb[9].mxu0 }
  0xed   :  { %1159 = vst [vmem:[%s1971_s3 + $0x138] sm:$0xff] %v1095_v49  ;;  %v1033_v55 = vadd.f32 %v1385_v53, %v1710_v3  ;;  %v671_v57 = vpop.f32.mrb[9].mxu1  ;;  %1126 = vst [vmem:[%s1971_s3 + $0x30] sm:$0xff] %v1062_v50  ;;  %v1000_v58 = vadd.f32 %v1710_v3, %v511_v56 }
  0xee   :  { %1158 = vst [vmem:[%s1971_s3 + $0x130] sm:$0xff] %v1094_v51  ;;  %v1032_v59 = vadd.f32 %v1710_v3, %v671_v57  ;;  %v1065_v60 = vmax.f32 %v1001_v54, 0.0 }
  0xef   :  { %v1097_v61 = vmax.f32 %v1033_v55, 0.0  ;;  %v1064_v62 = vmax.f32 %v1000_v58, 0.0  ;;  %v1340_v0 = vpop.f32.mrb[10].mxu0 }
  0xf0   :  { %v1096_v63 = vmax.f32 %v1032_v59, 0.0  ;;  %v1388_v1 = vpop.f32.mrb[10].mxu1  ;;  %1129 = vst [vmem:[%s1971_s3 + $0x48] sm:$0xff] %v1065_v60  ;;  %v1003_v2 = vadd.f32 %v1340_v0, %v1710_v3  ;;  %v521_v5 = vpop.f32.mrb[11].mxu0 }
  0xf1   :  { %1161 = vst [vmem:[%s1971_s3 + $0x148] sm:$0xff] %v1097_v61  ;;  %v1035_v4 = vadd.f32 %v1388_v1, %v1710_v3  ;;  %v681_v6 = vpop.f32.mrb[11].mxu1  ;;  %1128 = vst [vmem:[%s1971_s3 + $0x40] sm:$0xff] %v1064_v62  ;;  %v1002_v7 = vadd.f32 %v1710_v3, %v521_v5 }
  0xf2   :  { %1160 = vst [vmem:[%s1971_s3 + $0x140] sm:$0xff] %v1096_v63  ;;  %v1034_v8 = vadd.f32 %v1710_v3, %v681_v6  ;;  %v1067_v9 = vmax.f32 %v1003_v2, 0.0 }
  0xf3   :  { %v1099_v10 = vmax.f32 %v1035_v4, 0.0  ;;  %v1066_v11 = vmax.f32 %v1002_v7, 0.0  ;;  %v1343_v13 = vpop.f32.mrb[12].mxu0 }
  0xf4   :  { %v1098_v12 = vmax.f32 %v1034_v8, 0.0  ;;  %v1391_v14 = vpop.f32.mrb[12].mxu1  ;;  %1131 = vst [vmem:[%s1971_s3 + $0x58] sm:$0xff] %v1067_v9  ;;  %v1005_v15 = vadd.f32 %v1343_v13, %v1710_v3  ;;  %v531_v17 = vpop.f32.mrb[13].mxu0 }
  0xf5   :  { %1163 = vst [vmem:[%s1971_s3 + $0x158] sm:$0xff] %v1099_v10  ;;  %v1037_v16 = vadd.f32 %v1391_v14, %v1710_v3  ;;  %v691_v18 = vpop.f32.mrb[13].mxu1  ;;  %1130 = vst [vmem:[%s1971_s3 + $0x50] sm:$0xff] %v1066_v11  ;;  %v1004_v19 = vadd.f32 %v1710_v3, %v531_v17 }
  0xf6   :  { %1162 = vst [vmem:[%s1971_s3 + $0x150] sm:$0xff] %v1098_v12  ;;  %v1036_v20 = vadd.f32 %v1710_v3, %v691_v18  ;;  %v1069_v21 = vmax.f32 %v1005_v15, 0.0 }
  0xf7   :  { %v1101_v22 = vmax.f32 %v1037_v16, 0.0  ;;  %v1068_v23 = vmax.f32 %v1004_v19, 0.0  ;;  %v1346_v25 = vpop.f32.mrb[14].mxu0 }
  0xf8   :  { %v1100_v24 = vmax.f32 %v1036_v20, 0.0  ;;  %v1394_v26 = vpop.f32.mrb[14].mxu1  ;;  %1133 = vst [vmem:[%s1971_s3 + $0x68] sm:$0xff] %v1069_v21  ;;  %v1007_v27 = vadd.f32 %v1346_v25, %v1710_v3  ;;  %v541_v29 = vpop.f32.mrb[15].mxu0 }
  0xf9   :  { %1165 = vst [vmem:[%s1971_s3 + $0x168] sm:$0xff] %v1101_v22  ;;  %v1039_v28 = vadd.f32 %v1394_v26, %v1710_v3  ;;  %v701_v30 = vpop.f32.mrb[15].mxu1  ;;  %1132 = vst [vmem:[%s1971_s3 + $0x60] sm:$0xff] %v1068_v23  ;;  %v1006_v31 = vadd.f32 %v1710_v3, %v541_v29 }
  0xfa   :  { %1164 = vst [vmem:[%s1971_s3 + $0x160] sm:$0xff] %v1100_v24  ;;  %v1038_v32 = vadd.f32 %v1710_v3, %v701_v30  ;;  %v1071_v33 = vmax.f32 %v1007_v27, 0.0 }
  0xfb   :  { %v1103_v34 = vmax.f32 %v1039_v28, 0.0  ;;  %v1070_v35 = vmax.f32 %v1006_v31, 0.0  ;;  %v1349_v37 = vpop.f32.mrb[16].mxu0 }
  0xfc   :  { %v1102_v36 = vmax.f32 %v1038_v32, 0.0  ;;  %v1397_v38 = vpop.f32.mrb[16].mxu1  ;;  %1135 = vst [vmem:[%s1971_s3 + $0x78] sm:$0xff] %v1071_v33  ;;  %v1009_v39 = vadd.f32 %v1349_v37, %v1710_v3  ;;  %v551_v41 = vpop.f32.mrb[17].mxu0 }
  0xfd   :  { %1167 = vst [vmem:[%s1971_s3 + $0x178] sm:$0xff] %v1103_v34  ;;  %v1041_v40 = vadd.f32 %v1397_v38, %v1710_v3  ;;  %v711_v42 = vpop.f32.mrb[17].mxu1  ;;  %1134 = vst [vmem:[%s1971_s3 + $0x70] sm:$0xff] %v1070_v35  ;;  %v1008_v43 = vadd.f32 %v1710_v3, %v551_v41 }
  0xfe   :  { %1166 = vst [vmem:[%s1971_s3 + $0x170] sm:$0xff] %v1102_v36  ;;  %v1040_v44 = vadd.f32 %v1710_v3, %v711_v42  ;;  %v1073_v45 = vmax.f32 %v1009_v39, 0.0 }
  0xff   :  { %v1105_v46 = vmax.f32 %v1041_v40, 0.0  ;;  %v1072_v47 = vmax.f32 %v1008_v43, 0.0  ;;  %v1352_v49 = vpop.f32.mrb[18].mxu0 }
 0x100   :  { %v1104_v48 = vmax.f32 %v1040_v44, 0.0  ;;  %v1400_v50 = vpop.f32.mrb[18].mxu1  ;;  %1137 = vst [vmem:[%s1971_s3 + $0x88] sm:$0xff] %v1073_v45  ;;  %v1011_v51 = vadd.f32 %v1352_v49, %v1710_v3  ;;  %v561_v53 = vpop.f32.mrb[19].mxu0 }
 0x101   :  { %1169 = vst [vmem:[%s1971_s3 + $0x188] sm:$0xff] %v1105_v46  ;;  %v1043_v52 = vadd.f32 %v1400_v50, %v1710_v3  ;;  %v721_v54 = vpop.f32.mrb[19].mxu1  ;;  %1136 = vst [vmem:[%s1971_s3 + $0x80] sm:$0xff] %v1072_v47  ;;  %v1010_v55 = vadd.f32 %v1710_v3, %v561_v53 }
 0x102   :  { %1168 = vst [vmem:[%s1971_s3 + $0x180] sm:$0xff] %v1104_v48  ;;  %v1042_v56 = vadd.f32 %v1710_v3, %v721_v54  ;;  %v1075_v57 = vmax.f32 %v1011_v51, 0.0 }
 0x103   :  { %v1107_v58 = vmax.f32 %v1043_v52, 0.0  ;;  %v1074_v59 = vmax.f32 %v1010_v55, 0.0  ;;  %v1355_v61 = vpop.f32.mrb[20].mxu0 }
 0x104   :  { %v1106_v60 = vmax.f32 %v1042_v56, 0.0  ;;  %v1403_v62 = vpop.f32.mrb[20].mxu1  ;;  %1139 = vst [vmem:[%s1971_s3 + $0x98] sm:$0xff] %v1075_v57  ;;  %v1013_v63 = vadd.f32 %v1355_v61, %v1710_v3  ;;  %v571_v1 = vpop.f32.mrb[21].mxu0 }
 0x105   :  { %1171 = vst [vmem:[%s1971_s3 + $0x198] sm:$0xff] %v1107_v58  ;;  %v1045_v0 = vadd.f32 %v1403_v62, %v1710_v3  ;;  %v731_v2 = vpop.f32.mrb[21].mxu1  ;;  %1138 = vst [vmem:[%s1971_s3 + $0x90] sm:$0xff] %v1074_v59  ;;  %v1012_v4 = vadd.f32 %v1710_v3, %v571_v1 }
 0x106   :  { %1170 = vst [vmem:[%s1971_s3 + $0x190] sm:$0xff] %v1106_v60  ;;  %v1044_v5 = vadd.f32 %v1710_v3, %v731_v2  ;;  %v1077_v6 = vmax.f32 %v1013_v63, 0.0 }
 0x107   :  { %v1109_v7 = vmax.f32 %v1045_v0, 0.0  ;;  %v1076_v8 = vmax.f32 %v1012_v4, 0.0  ;;  %v1358_v10 = vpop.f32.mrb[22].mxu0 }
 0x108   :  { %v1108_v9 = vmax.f32 %v1044_v5, 0.0  ;;  %v1406_v11 = vpop.f32.mrb[22].mxu1  ;;  %1141 = vst [vmem:[%s1971_s3 + $0xa8] sm:$0xff] %v1077_v6  ;;  %v1015_v12 = vadd.f32 %v1358_v10, %v1710_v3  ;;  %v581_v14 = vpop.f32.mrb[23].mxu0 }
 0x109   :  { %1173 = vst [vmem:[%s1971_s3 + $0x1a8] sm:$0xff] %v1109_v7  ;;  %v1047_v13 = vadd.f32 %v1406_v11, %v1710_v3  ;;  %v741_v15 = vpop.f32.mrb[23].mxu1  ;;  %1140 = vst [vmem:[%s1971_s3 + $0xa0] sm:$0xff] %v1076_v8  ;;  %v1014_v16 = vadd.f32 %v1710_v3, %v581_v14 }
 0x10a   :  { %1172 = vst [vmem:[%s1971_s3 + $0x1a0] sm:$0xff] %v1108_v9  ;;  %v1046_v17 = vadd.f32 %v1710_v3, %v741_v15  ;;  %v1079_v18 = vmax.f32 %v1015_v12, 0.0 }
 0x10b   :  { %v1111_v19 = vmax.f32 %v1047_v13, 0.0  ;;  %v1078_v20 = vmax.f32 %v1014_v16, 0.0  ;;  %v1361_v22 = vpop.f32.mrb[24].mxu0 }
 0x10c   :  { %v1110_v21 = vmax.f32 %v1046_v17, 0.0  ;;  %v1409_v23 = vpop.f32.mrb[24].mxu1  ;;  %1143 = vst [vmem:[%s1971_s3 + $0xb8] sm:$0xff] %v1079_v18  ;;  %v1017_v24 = vadd.f32 %v1361_v22, %v1710_v3  ;;  %v591_v26 = vpop.f32.mrb[25].mxu0 }
 0x10d   :  { %1175 = vst [vmem:[%s1971_s3 + $0x1b8] sm:$0xff] %v1111_v19  ;;  %v1049_v25 = vadd.f32 %v1409_v23, %v1710_v3  ;;  %v751_v27 = vpop.f32.mrb[25].mxu1  ;;  %1142 = vst [vmem:[%s1971_s3 + $0xb0] sm:$0xff] %v1078_v20  ;;  %v1016_v28 = vadd.f32 %v1710_v3, %v591_v26 }
 0x10e   :  { %1174 = vst [vmem:[%s1971_s3 + $0x1b0] sm:$0xff] %v1110_v21  ;;  %v1048_v29 = vadd.f32 %v1710_v3, %v751_v27  ;;  %v1081_v30 = vmax.f32 %v1017_v24, 0.0 }
 0x10f   :  { %v1113_v31 = vmax.f32 %v1049_v25, 0.0  ;;  %v1080_v32 = vmax.f32 %v1016_v28, 0.0  ;;  %v1364_v34 = vpop.f32.mrb[26].mxu0 }
 0x110   :  { %v1112_v33 = vmax.f32 %v1048_v29, 0.0  ;;  %v1412_v35 = vpop.f32.mrb[26].mxu1  ;;  %1145 = vst [vmem:[%s1971_s3 + $0xc8] sm:$0xff] %v1081_v30  ;;  %v1019_v36 = vadd.f32 %v1364_v34, %v1710_v3  ;;  %v601_v38 = vpop.f32.mrb[27].mxu0 }
 0x111   :  { %1177 = vst [vmem:[%s1971_s3 + $0x1c8] sm:$0xff] %v1113_v31  ;;  %v1051_v37 = vadd.f32 %v1412_v35, %v1710_v3  ;;  %v761_v39 = vpop.f32.mrb[27].mxu1  ;;  %1144 = vst [vmem:[%s1971_s3 + $0xc0] sm:$0xff] %v1080_v32  ;;  %v1018_v40 = vadd.f32 %v1710_v3, %v601_v38 }
 0x112   :  { %1176 = vst [vmem:[%s1971_s3 + $0x1c0] sm:$0xff] %v1112_v33  ;;  %v1050_v41 = vadd.f32 %v1710_v3, %v761_v39  ;;  %v1083_v42 = vmax.f32 %v1019_v36, 0.0 }
 0x113   :  { %v1115_v43 = vmax.f32 %v1051_v37, 0.0  ;;  %v1082_v44 = vmax.f32 %v1018_v40, 0.0  ;;  %v1367_v46 = vpop.f32.mrb[28].mxu0 }
 0x114   :  { %v1114_v45 = vmax.f32 %v1050_v41, 0.0  ;;  %v1415_v47 = vpop.f32.mrb[28].mxu1  ;;  %1147 = vst [vmem:[%s1971_s3 + $0xd8] sm:$0xff] %v1083_v42  ;;  %v1021_v48 = vadd.f32 %v1367_v46, %v1710_v3  ;;  %v611_v50 = vpop.f32.mrb[29].mxu0 }
 0x115   :  { %1179 = vst [vmem:[%s1971_s3 + $0x1d8] sm:$0xff] %v1115_v43  ;;  %v1053_v49 = vadd.f32 %v1415_v47, %v1710_v3  ;;  %v771_v51 = vpop.f32.mrb[29].mxu1  ;;  %1146 = vst [vmem:[%s1971_s3 + $0xd0] sm:$0xff] %v1082_v44  ;;  %v1020_v52 = vadd.f32 %v1710_v3, %v611_v50 }
 0x116   :  { %1178 = vst [vmem:[%s1971_s3 + $0x1d0] sm:$0xff] %v1114_v45  ;;  %v1052_v53 = vadd.f32 %v1710_v3, %v771_v51  ;;  %v1085_v54 = vmax.f32 %v1021_v48, 0.0 }
 0x117   :  { %v1117_v55 = vmax.f32 %v1053_v49, 0.0  ;;  %v1084_v56 = vmax.f32 %v1020_v52, 0.0  ;;  %v1370_v58 = vpop.f32.mrb[30].mxu0 }
 0x118   :  { %v1116_v57 = vmax.f32 %v1052_v53, 0.0  ;;  %v1418_v59 = vpop.f32.mrb[30].mxu1  ;;  %1149 = vst [vmem:[%s1971_s3 + $0xe8] sm:$0xff] %v1085_v54  ;;  %v1023_v60 = vadd.f32 %v1370_v58, %v1710_v3  ;;  %v621_v62 = vpop.f32.mrb[31].mxu0 }
 0x119   :  { %1181 = vst [vmem:[%s1971_s3 + $0x1e8] sm:$0xff] %v1117_v55  ;;  %v1055_v61 = vadd.f32 %v1418_v59, %v1710_v3  ;;  %v781_v63 = vpop.f32.mrb[31].mxu1  ;;  %1148 = vst [vmem:[%s1971_s3 + $0xe0] sm:$0xff] %v1084_v56  ;;  %v1022_v0 = vadd.f32 %v1710_v3, %v621_v62 }
 0x11a   :  { %1180 = vst [vmem:[%s1971_s3 + $0x1e0] sm:$0xff] %v1116_v57  ;;  %v1054_v1 = vadd.f32 %v1710_v3, %v781_v63  ;;  %v1087_v2 = vmax.f32 %v1023_v60, 0.0 }
 0x11b   :  { %v1119_v4 = vmax.f32 %v1055_v61, 0.0  ;;  %v1086_v5 = vmax.f32 %v1022_v0, 0.0 }
 0x11c   :  { %v1118_v6 = vmax.f32 %v1054_v1, 0.0  ;;  %1151 = vst [vmem:[%s1971_s3 + $0xf8] sm:$0xff] %v1087_v2 }
 0x11d   :  { %1183 = vst [vmem:[%s1971_s3 + $0x1f8] sm:$0xff] %v1119_v4  ;;  %1150 = vst [vmem:[%s1971_s3 + $0xf0] sm:$0xff] %v1086_v5 }
 0x11e   :  { %1182 = vst [vmem:[%s1971_s3 + $0x1f0] sm:$0xff] %v1118_v6 }

// kernel: _lambda_.24
= control target key start
LH: loop header
LB: loop body
LE: loop exit
PB: predicated region body
PF: predicated region fallthrough
CT: control target
= control target key end

     0   :  { %vm70_vm0 = vcmask 64512   ;;  %s677_s1 = inlined_call_operand.vmem [shape: f32[8,128], index: 1, kind: input, shape index: {}]   ;;  %s678_s0 = inlined_call_operand.vmem [shape: f32[128,8], index: 0, kind: input, shape index: {}]   ;;  %s679_s2 = inlined_call_operand.vmem [shape: f32[1,128], index: 2, kind: input, shape index: {}]   ;;  %s680_s3 = inlined_call_operand.vmem [shape: f32[128,128], index: 3, kind: input, shape index: {}]   ;;  %s681_s4 = inlined_call_operand.vmem [shape: f32[128,128], index: 4, kind: output, shape index: {}]  }
   0x1   :  { %v69_v0 = vld [vmem:[%s677_s1] sm:$0xff]  ;;  %v54_v3 = vld [vmem:[%s678_s0 + $0x8] sm:$0xff]  ;;  %v55_v5 = vld [vmem:[%s678_s0 + $0x10] sm:$0xff] }
   0x2   :  { %v53_v1 = vld [vmem:[%s678_s0] sm:$0xff]  ;;  %440 = vmatprep.subr.mxu0 %v69_v0  ;;  %466 = vmatprep.subr.mxu1 %v69_v0  ;;  %v62_v4 = vld [vmem:[%s678_s0 + $0x48] sm:$0xff]  ;;  %v63_v6 = vld [vmem:[%s678_s0 + $0x50] sm:$0xff] }
   0x3   :  { %v61_v2 = vld [vmem:[%s678_s0 + $0x40] sm:$0xff]  ;;  %441 = vmatpush3.msra.mxu0 %v69_v0  ;;  %467 = vmatpush3.msra.mxu1 %v69_v0  ;;  %v56_v7 = vld [vmem:[%s678_s0 + $0x18] sm:$0xff]  ;;  %v58_v11 = vld [vmem:[%s678_s0 + $0x28] sm:$0xff] }
   0x4   :  { %442 = vmatprep.mubr.msk.f32.mxu0 %vm70_vm0, %v53_v1  ;;  %454 = vmatprep.mubr.msk.f32.mxu1 %vm70_vm0, %v61_v2  ;;  %v64_v8 = vld [vmem:[%s678_s0 + $0x58] sm:$0xff]  ;;  %v57_v9 = vld [vmem:[%s678_s0 + $0x20] sm:$0xff]  ;;  %v66_v12 = vld [vmem:[%s678_s0 + $0x68] sm:$0xff] }
   0x5   :  { %443 = vmatmul.mubr.msk.f32.vlgmr.msra.gmra.mrb[0].mxu0 %vm70_vm0, %v54_v3  ;;  %455 = vmatmul.mubr.msk.f32.vlgmr.msra.gmra.mrb[0].mxu1 %vm70_vm0, %v62_v4  ;;  %v65_v10 = vld [vmem:[%s678_s0 + $0x60] sm:$0xff]  ;;  %v59_v13 = vld [vmem:[%s678_s0 + $0x30] sm:$0xff]  ;;  %v60_v15 = vld [vmem:[%s678_s0 + $0x38] sm:$0xff] }
   0x6   :  { %445 = vmatprep.mubr.msk.f32.mxu0 %vm70_vm0, %v55_v5  ;;  %457 = vmatprep.mubr.msk.f32.mxu1 %vm70_vm0, %v63_v6  ;;  %v67_v14 = vld [vmem:[%s678_s0 + $0x70] sm:$0xff]  ;;  %v68_v16 = vld [vmem:[%s678_s0 + $0x78] sm:$0xff]  ;;  %v563_v17 = vld [vmem:[%s679_s2] ss:$0 sm:$0xff] }
   0x7   :  { %v339_v19 = vld [vmem:[%s680_s3 + $0x8] sm:$0xff]  ;;  %v338_v25 = vld [vmem:[%s680_s3] sm:$0xff]  ;;  %v341_v35 = vld [vmem:[%s680_s3 + $0x18] sm:$0xff] }
   0x8   :  { %v347_v21 = vld [vmem:[%s680_s3 + $0x48] sm:$0xff]  ;;  %v346_v27 = vld [vmem:[%s680_s3 + $0x40] sm:$0xff]  ;;  %v349_v37 = vld [vmem:[%s680_s3 + $0x58] sm:$0xff] }
   0x9   :  { %446 = vmatmul.mubr.msk.f32.gmra.mrb[2].mxu0 %vm70_vm0, %v56_v7  ;;  %458 = vmatmul.mubr.msk.f32.gmra.mrb[2].mxu1 %vm70_vm0, %v64_v8  ;;  %v340_v43 = vld [vmem:[%s680_s3 + $0x10] sm:$0xff]  ;;  %v343_v55 = vld [vmem:[%s680_s3 + $0x28] sm:$0xff]  ;;  %v342_v63 = vld [vmem:[%s680_s3 + $0x20] sm:$0xff] }
   0xa   :  { %448 = vmatprep.mubr.msk.f32.mxu0 %vm70_vm0, %v57_v9  ;;  %460 = vmatprep.mubr.msk.f32.mxu1 %vm70_vm0, %v65_v10  ;;  %v348_v45 = vld [vmem:[%s680_s3 + $0x50] sm:$0xff]  ;;  %v351_v57 = vld [vmem:[%s680_s3 + $0x68] sm:$0xff]  ;;  %v350_v1 = vld [vmem:[%s680_s3 + $0x60] sm:$0xff] }
   0xd   :  { %449 = vmatmul.mubr.msk.f32.gmra.mrb[4].mxu0 %vm70_vm0, %v58_v11  ;;  %461 = vmatmul.mubr.msk.f32.gmra.mrb[4].mxu1 %vm70_vm0, %v66_v12  ;;  %v345_v11 = vld [vmem:[%s680_s3 + $0x38] sm:$0xff] }
   0xe   :  { %451 = vmatprep.mubr.msk.f32.mxu0 %vm70_vm0, %v59_v13  ;;  %463 = vmatprep.mubr.msk.f32.mxu1 %vm70_vm0, %v67_v14  ;;  %v353_v13 = vld [vmem:[%s680_s3 + $0x78] sm:$0xff] }
  0x11   :  { %452 = vmatmul.mubr.msk.f32.gmra.mrb[6].mxu0 %vm70_vm0, %v60_v15  ;;  %464 = vmatmul.mubr.msk.f32.gmra.mrb[6].mxu1 %vm70_vm0, %v68_v16 }
  0xd8   :  { %v444_v18 = vpop.f32.mrb[0].mxu0  ;;  %v456_v20 = vpop.f32.mrb[0].mxu1 }
  0xd9   :  { %v323_v22 = vadd.f32 %v444_v18, %v563_v17  ;;  %v331_v23 = vadd.f32 %v456_v20, %v563_v17  ;;  %v185_v24 = vpop.f32.mrb[1].mxu0  ;;  %v225_v26 = vpop.f32.mrb[1].mxu1  ;;  %v344_v20 = vld [vmem:[%s680_s3 + $0x30] sm:$0xff] }
  0xda   :  { %v322_v28 = vadd.f32 %v563_v17, %v185_v24  ;;  %v330_v29 = vadd.f32 %v563_v17, %v225_v26 }
  0xdb   :  { %v355_v30 = vadd.f32 %v339_v19, %v323_v22  ;;  %v363_v31 = vadd.f32 %v347_v21, %v331_v23  ;;  %v352_v22 = vld [vmem:[%s680_s3 + $0x70] sm:$0xff] }
  0xdc   :  { %v354_v32 = vadd.f32 %v338_v25, %v322_v28  ;;  %v362_v33 = vadd.f32 %v346_v27, %v330_v29  ;;  %v447_v34 = vpop.f32.mrb[2].mxu0  ;;  %v459_v36 = vpop.f32.mrb[2].mxu1 }
  0xdd   :  { %v371_v38 = vmax.f32 %v355_v30, 0.0  ;;  %v379_v39 = vmax.f32 %v363_v31, 0.0  ;;  %v325_v40 = vadd.f32 %v447_v34, %v563_v17  ;;  %v333_v41 = vadd.f32 %v459_v36, %v563_v17  ;;  %v195_v42 = vpop.f32.mrb[3].mxu0  ;;  %v235_v44 = vpop.f32.mrb[3].mxu1 }
  0xde   :  { %v370_v46 = vmax.f32 %v354_v32, 0.0  ;;  %v378_v47 = vmax.f32 %v362_v33, 0.0  ;;  %v324_v48 = vadd.f32 %v563_v17, %v195_v42  ;;  %v332_v49 = vadd.f32 %v563_v17, %v235_v44 }
  0xdf   :  { %387 = vst [vmem:[%s681_s4 + $0x8] sm:$0xff] %v371_v38  ;;  %395 = vst [vmem:[%s681_s4 + $0x48] sm:$0xff] %v379_v39  ;;  %v357_v50 = vadd.f32 %v341_v35, %v325_v40  ;;  %v365_v51 = vadd.f32 %v349_v37, %v333_v41 }
  0xe0   :  { %386 = vst [vmem:[%s681_s4] sm:$0xff] %v370_v46  ;;  %394 = vst [vmem:[%s681_s4 + $0x40] sm:$0xff] %v378_v47  ;;  %v356_v52 = vadd.f32 %v340_v43, %v324_v48  ;;  %v364_v53 = vadd.f32 %v348_v45, %v332_v49  ;;  %v450_v54 = vpop.f32.mrb[4].mxu0  ;;  %v462_v56 = vpop.f32.mrb[4].mxu1 }
  0xe1   :  { %v373_v58 = vmax.f32 %v357_v50, 0.0  ;;  %v381_v59 = vmax.f32 %v365_v51, 0.0  ;;  %v327_v60 = vadd.f32 %v450_v54, %v563_v17  ;;  %v335_v61 = vadd.f32 %v462_v56, %v563_v17  ;;  %v205_v62 = vpop.f32.mrb[5].mxu0  ;;  %v245_v0 = vpop.f32.mrb[5].mxu1 }
  0xe2   :  { %v372_v2 = vmax.f32 %v356_v52, 0.0  ;;  %v380_v3 = vmax.f32 %v364_v53, 0.0  ;;  %v326_v4 = vadd.f32 %v563_v17, %v205_v62  ;;  %v334_v5 = vadd.f32 %v563_v17, %v245_v0 }
  0xe3   :  { %389 = vst [vmem:[%s681_s4 + $0x18] sm:$0xff] %v373_v58  ;;  %397 = vst [vmem:[%s681_s4 + $0x58] sm:$0xff] %v381_v59  ;;  %v359_v6 = vadd.f32 %v343_v55, %v327_v60  ;;  %v367_v7 = vadd.f32 %v351_v57, %v335_v61 }
  0xe4   :  { %388 = vst [vmem:[%s681_s4 + $0x10] sm:$0xff] %v372_v2  ;;  %396 = vst [vmem:[%s681_s4 + $0x50] sm:$0xff] %v380_v3  ;;  %v358_v8 = vadd.f32 %v342_v63, %v326_v4  ;;  %v366_v9 = vadd.f32 %v350_v1, %v334_v5  ;;  %v453_v10 = vpop.f32.mrb[6].mxu0  ;;  %v465_v12 = vpop.f32.mrb[6].mxu1 }
  0xe5   :  { %v375_v14 = vmax.f32 %v359_v6, 0.0  ;;  %v383_v15 = vmax.f32 %v367_v7, 0.0  ;;  %v329_v16 = vadd.f32 %v453_v10, %v563_v17  ;;  %v337_v18 = vadd.f32 %v465_v12, %v563_v17  ;;  %v215_v19 = vpop.f32.mrb[7].mxu0  ;;  %v255_v21 = vpop.f32.mrb[7].mxu1 }
  0xe6   :  { %v374_v23 = vmax.f32 %v358_v8, 0.0  ;;  %v382_v24 = vmax.f32 %v366_v9, 0.0  ;;  %v328_v25 = vadd.f32 %v563_v17, %v215_v19  ;;  %v336_v26 = vadd.f32 %v563_v17, %v255_v21 }
  0xe7   :  { %391 = vst [vmem:[%s681_s4 + $0x28] sm:$0xff] %v375_v14  ;;  %399 = vst [vmem:[%s681_s4 + $0x68] sm:$0xff] %v383_v15  ;;  %v361_v27 = vadd.f32 %v345_v11, %v329_v16  ;;  %v369_v28 = vadd.f32 %v353_v13, %v337_v18 }
  0xe8   :  { %390 = vst [vmem:[%s681_s4 + $0x20] sm:$0xff] %v374_v23  ;;  %398 = vst [vmem:[%s681_s4 + $0x60] sm:$0xff] %v382_v24  ;;  %v360_v29 = vadd.f32 %v344_v20, %v328_v25  ;;  %v368_v17 = vadd.f32 %v352_v22, %v336_v26 }
  0xe9   :  { %v377_v30 = vmax.f32 %v361_v27, 0.0  ;;  %v385_v31 = vmax.f32 %v369_v28, 0.0 }
  0xea   :  { %v376_v32 = vmax.f32 %v360_v29, 0.0  ;;  %v384_v33 = vmax.f32 %v368_v17, 0.0 }
  0xeb   :  { %393 = vst [vmem:[%s681_s4 + $0x38] sm:$0xff] %v377_v30  ;;  %401 = vst [vmem:[%s681_s4 + $0x78] sm:$0xff] %v385_v31 }
  0xec   :  { %392 = vst [vmem:[%s681_s4 + $0x30] sm:$0xff] %v376_v32  ;;  %400 = vst [vmem:[%s681_s4 + $0x70] sm:$0xff] %v384_v33 }

// kernel: _lambda_.23
= control target key start
LH: loop header
LB: loop body
LE: loop exit
PB: predicated region body
PF: predicated region fallthrough
CT: control target
= control target key end

     0   :  { %vm75_vm0 = vcmask 588800   ;;  %s651_s1 = inlined_call_operand.vmem [shape: f32[72,128], index: 1, kind: input, shape index: {}]   ;;  %s652_s0 = inlined_call_operand.vmem [shape: f32[128,72], index: 0, kind: input, shape index: {}]   ;;  %s653_s2 = inlined_call_operand.vmem [shape: f32[1,128], index: 2, kind: input, shape index: {}]   ;;  %s654_s3 = inlined_call_operand.vmem [shape: f32[128,128], index: 3, kind: output, shape index: {}]  }
   0x1   :  { %v66_v0 = vld [vmem:[%s651_s1] sm:$0xff]  ;;  %v67_v1 = vld [vmem:[%s651_s1 + $0x8] sm:$0xff]  ;;  %v68_v2 = vld [vmem:[%s651_s1 + $0x10] sm:$0xff] }
   0x2   :  { %v463_v3 = vpack.c.bf16 %v67_v1, %v66_v0  ;;  %v69_v4 = vld [vmem:[%s651_s1 + $0x18] sm:$0xff]  ;;  %v70_v6 = vld [vmem:[%s651_s1 + $0x20] sm:$0xff]  ;;  %v71_v7 = vld [vmem:[%s651_s1 + $0x28] sm:$0xff] }
   0x3   :  { %v467_v5 = vpack.c.bf16 %v69_v4, %v68_v2  ;;  %v50_v8 = vld [vmem:[%s652_s0] sm:$0xff]  ;;  %v471_v10 = vpack.c.bf16 %v71_v7, %v70_v6  ;;  %v72_v11 = vld [vmem:[%s651_s1 + $0x30] sm:$0xff]  ;;  %v73_v12 = vld [vmem:[%s651_s1 + $0x38] sm:$0xff] }
   0x4   :  { %464 = vmatprep.subr.bf16.mxu0 %v463_v3  ;;  %479 = vmatprep.subr.bf16.mxu1 %v463_v3  ;;  %v58_v9 = vld [vmem:[%s652_s0 + $0x40] sm:$0xff]  ;;  %v475_v13 = vpack.c.bf16 %v73_v12, %v72_v11  ;;  %v51_v15 = vld [vmem:[%s652_s0 + $0x8] sm:$0xff]  ;;  %v52_v17 = vld [vmem:[%s652_s0 + $0x10] sm:$0xff] }
   0x5   :  { %466 = vmatpush3.bf16.msra.mxu0 %v463_v3  ;;  %484 = vmatpush3.bf16.msra.mxu1 %v463_v3  ;;  %v74_v14 = vld [vmem:[%s651_s1 + $0x40] sm:$0xff]  ;;  %v59_v16 = vld [vmem:[%s652_s0 + $0x48] sm:$0xff]  ;;  %v60_v18 = vld [vmem:[%s652_s0 + $0x50] sm:$0xff] }
   0x6   :  { %468 = vmatprep.subr.bf16.mxu0 %v467_v5  ;;  %480 = vmatprep.subr.bf16.mxu1 %v467_v5  ;;  %v53_v19 = vld [vmem:[%s652_s0 + $0x18] sm:$0xff]  ;;  %v54_v21 = vld [vmem:[%s652_s0 + $0x20] sm:$0xff]  ;;  %v55_v23 = vld [vmem:[%s652_s0 + $0x28] sm:$0xff] }
   0x7   :  { %439 = vmatprep.mubr.msk.f32.mxu0 %vm75_vm0, %v50_v8  ;;  %451 = vmatprep.mubr.msk.f32.mxu1 %vm75_vm0, %v58_v9  ;;  %v61_v20 = vld [vmem:[%s652_s0 + $0x58] sm:$0xff]  ;;  %v62_v22 = vld [vmem:[%s652_s0 + $0x60] sm:$0xff]  ;;  %v63_v24 = vld [vmem:[%s652_s0 + $0x68] sm:$0xff] }
   0x8   :  { %v56_v25 = vld [vmem:[%s652_s0 + $0x30] sm:$0xff]  ;;  %v57_v27 = vld [vmem:[%s652_s0 + $0x38] sm:$0xff]  ;;  %v395_v29 = vld [vmem:[%s653_s2] ss:$0 sm:$0xff] }
   0x9   :  { %470 = vmatpush3.bf16.msra.mxu0 %v467_v5  ;;  %485 = vmatpush3.bf16.msra.mxu1 %v467_v5  ;;  %v64_v26 = vld [vmem:[%s652_s0 + $0x70] sm:$0xff]  ;;  %v65_v28 = vld [vmem:[%s652_s0 + $0x78] sm:$0xff] }
   0xa   :  { %472 = vmatprep.subr.bf16.mxu0 %v471_v10  ;;  %481 = vmatprep.subr.bf16.mxu1 %v471_v10 }
   0xd   :  { %474 = vmatpush3.bf16.msra.mxu0 %v471_v10  ;;  %486 = vmatpush3.bf16.msra.mxu1 %v471_v10 }
   0xe   :  { %476 = vmatprep.subr.bf16.mxu0 %v475_v13  ;;  %482 = vmatprep.subr.bf16.mxu1 %v475_v13 }
  0x11   :  { %478 = vmatpush3.bf16.msra.mxu0 %v475_v13  ;;  %487 = vmatpush3.bf16.msra.mxu1 %v475_v13 }
  0x12   :  { %437 = vmatprep.subr.mxu0 %v74_v14  ;;  %483 = vmatprep.subr.mxu1 %v74_v14 }
  0x15   :  { %438 = vmatpush3.msra.mxu0 %v74_v14  ;;  %488 = vmatpush3.msra.mxu1 %v74_v14 }
  0x16   :  { %440 = vmatmul.mubr.msk.f32.vlgmr.msra.gmra.mrb[0].mxu0 %vm75_vm0, %v51_v15  ;;  %452 = vmatmul.mubr.msk.f32.vlgmr.msra.gmra.mrb[0].mxu1 %vm75_vm0, %v59_v16 }
  0x17   :  { %442 = vmatprep.mubr.msk.f32.mxu0 %vm75_vm0, %v52_v17  ;;  %454 = vmatprep.mubr.msk.f32.mxu1 %vm75_vm0, %v60_v18 }
  0x1a   :  { %443 = vmatmul.mubr.msk.f32.gmra.mrb[2].mxu0 %vm75_vm0, %v53_v19  ;;  %455 = vmatmul.mubr.msk.f32.gmra.mrb[2].mxu1 %vm75_vm0, %v61_v20 }
  0x1b   :  { %445 = vmatprep.mubr.msk.f32.mxu0 %vm75_vm0, %v54_v21  ;;  %457 = vmatprep.mubr.msk.f32.mxu1 %vm75_vm0, %v62_v22 }
  0x1e   :  { %446 = vmatmul.mubr.msk.f32.gmra.mrb[4].mxu0 %vm75_vm0, %v55_v23  ;;  %458 = vmatmul.mubr.msk.f32.gmra.mrb[4].mxu1 %vm75_vm0, %v63_v24 }
  0x1f   :  { %448 = vmatprep.mubr.msk.f32.mxu0 %vm75_vm0, %v56_v25  ;;  %460 = vmatprep.mubr.msk.f32.mxu1 %vm75_vm0, %v64_v26 }
  0x22   :  { %449 = vmatmul.mubr.msk.f32.gmra.mrb[6].mxu0 %vm75_vm0, %v57_v27  ;;  %461 = vmatmul.mubr.msk.f32.gmra.mrb[6].mxu1 %vm75_vm0, %v65_v28 }
  0xe9   :  { %v441_v30 = vpop.f32.mrb[0].mxu0  ;;  %v453_v31 = vpop.f32.mrb[0].mxu1 }
  0xea   :  { %v328_v32 = vadd.f32 %v441_v30, %v395_v29  ;;  %v336_v33 = vadd.f32 %v453_v31, %v395_v29  ;;  %v190_v34 = vpop.f32.mrb[1].mxu0  ;;  %v230_v35 = vpop.f32.mrb[1].mxu1 }
  0xeb   :  { %v327_v36 = vadd.f32 %v395_v29, %v190_v34  ;;  %v335_v37 = vadd.f32 %v395_v29, %v230_v35 }
  0xec   :  { %v344_v38 = vmax.f32 %v328_v32, 0.0  ;;  %v352_v39 = vmax.f32 %v336_v33, 0.0 }
  0xed   :  { %v343_v40 = vmax.f32 %v327_v36, 0.0  ;;  %v351_v41 = vmax.f32 %v335_v37, 0.0  ;;  %v444_v42 = vpop.f32.mrb[2].mxu0  ;;  %v456_v43 = vpop.f32.mrb[2].mxu1 }
  0xee   :  { %360 = vst [vmem:[%s654_s3 + $0x8] sm:$0xff] %v344_v38  ;;  %368 = vst [vmem:[%s654_s3 + $0x48] sm:$0xff] %v352_v39  ;;  %v330_v44 = vadd.f32 %v444_v42, %v395_v29  ;;  %v338_v45 = vadd.f32 %v456_v43, %v395_v29  ;;  %v200_v46 = vpop.f32.mrb[3].mxu0  ;;  %v240_v47 = vpop.f32.mrb[3].mxu1 }
  0xef   :  { %359 = vst [vmem:[%s654_s3] sm:$0xff] %v343_v40  ;;  %367 = vst [vmem:[%s654_s3 + $0x40] sm:$0xff] %v351_v41  ;;  %v329_v48 = vadd.f32 %v395_v29, %v200_v46  ;;  %v337_v49 = vadd.f32 %v395_v29, %v240_v47 }
  0xf0   :  { %v346_v50 = vmax.f32 %v330_v44, 0.0  ;;  %v354_v51 = vmax.f32 %v338_v45, 0.0 }
  0xf1   :  { %v345_v52 = vmax.f32 %v329_v48, 0.0  ;;  %v353_v53 = vmax.f32 %v337_v49, 0.0  ;;  %v447_v54 = vpop.f32.mrb[4].mxu0  ;;  %v459_v55 = vpop.f32.mrb[4].mxu1 }
  0xf2   :  { %362 = vst [vmem:[%s654_s3 + $0x18] sm:$0xff] %v346_v50  ;;  %370 = vst [vmem:[%s654_s3 + $0x58] sm:$0xff] %v354_v51  ;;  %v332_v56 = vadd.f32 %v447_v54, %v395_v29  ;;  %v340_v57 = vadd.f32 %v459_v55, %v395_v29  ;;  %v210_v58 = vpop.f32.mrb[5].mxu0  ;;  %v250_v59 = vpop.f32.mrb[5].mxu1 }
  0xf3   :  { %361 = vst [vmem:[%s654_s3 + $0x10] sm:$0xff] %v345_v52  ;;  %369 = vst [vmem:[%s654_s3 + $0x50] sm:$0xff] %v353_v53  ;;  %v331_v60 = vadd.f32 %v395_v29, %v210_v58  ;;  %v339_v61 = vadd.f32 %v395_v29, %v250_v59 }
  0xf4   :  { %v348_v62 = vmax.f32 %v332_v56, 0.0  ;;  %v356_v63 = vmax.f32 %v340_v57, 0.0 }
  0xf5   :  { %v347_v0 = vmax.f32 %v331_v60, 0.0  ;;  %v355_v1 = vmax.f32 %v339_v61, 0.0  ;;  %v450_v2 = vpop.f32.mrb[6].mxu0  ;;  %v462_v3 = vpop.f32.mrb[6].mxu1 }
  0xf6   :  { %364 = vst [vmem:[%s654_s3 + $0x28] sm:$0xff] %v348_v62  ;;  %372 = vst [vmem:[%s654_s3 + $0x68] sm:$0xff] %v356_v63  ;;  %v334_v4 = vadd.f32 %v450_v2, %v395_v29  ;;  %v342_v5 = vadd.f32 %v462_v3, %v395_v29  ;;  %v220_v6 = vpop.f32.mrb[7].mxu0  ;;  %v260_v7 = vpop.f32.mrb[7].mxu1 }
  0xf7   :  { %363 = vst [vmem:[%s654_s3 + $0x20] sm:$0xff] %v347_v0  ;;  %371 = vst [vmem:[%s654_s3 + $0x60] sm:$0xff] %v355_v1  ;;  %v333_v8 = vadd.f32 %v395_v29, %v220_v6  ;;  %v341_v9 = vadd.f32 %v395_v29, %v260_v7 }
  0xf8   :  { %v350_v10 = vmax.f32 %v334_v4, 0.0  ;;  %v358_v11 = vmax.f32 %v342_v5, 0.0 }
  0xf9   :  { %v349_v12 = vmax.f32 %v333_v8, 0.0  ;;  %v357_v13 = vmax.f32 %v341_v9, 0.0 }
  0xfa   :  { %366 = vst [vmem:[%s654_s3 + $0x38] sm:$0xff] %v350_v10  ;;  %374 = vst [vmem:[%s654_s3 + $0x78] sm:$0xff] %v358_v11 }
  0xfb   :  { %365 = vst [vmem:[%s654_s3 + $0x30] sm:$0xff] %v349_v12  ;;  %373 = vst [vmem:[%s654_s3 + $0x70] sm:$0xff] %v357_v13 }

// kernel: _lambda_.25
= control target key start
LH: loop header
LB: loop body
LE: loop exit
PB: predicated region body
PF: predicated region fallthrough
CT: control target
= control target key end

     0   :  { %vm70_vm0 = vcmask 261120   ;;  %s602_s1 = inlined_call_operand.vmem [shape: f32[32,128], index: 1, kind: input, shape index: {}]   ;;  %s603_s0 = inlined_call_operand.vmem [shape: f32[128,32], index: 0, kind: input, shape index: {}]   ;;  %s604_s2 = inlined_call_operand.vmem [shape: f32[1,128], index: 2, kind: input, shape index: {}]   ;;  %s605_s3 = inlined_call_operand.vmem [shape: f32[128,128], index: 3, kind: output, shape index: {}]  }
   0x1   :  { %v66_v0 = vld [vmem:[%s602_s1] sm:$0xff]  ;;  %v67_v1 = vld [vmem:[%s602_s1 + $0x8] sm:$0xff]  ;;  %v68_v2 = vld [vmem:[%s602_s1 + $0x10] sm:$0xff] }
   0x2   :  { %v443_v3 = vpack.c.bf16 %v67_v1, %v66_v0  ;;  %v69_v4 = vld [vmem:[%s602_s1 + $0x18] sm:$0xff]  ;;  %v50_v5 = vld [vmem:[%s603_s0] sm:$0xff]  ;;  %v51_v8 = vld [vmem:[%s603_s0 + $0x8] sm:$0xff] }
   0x3   :  { %v58_v6 = vld [vmem:[%s603_s0 + $0x40] sm:$0xff]  ;;  %v447_v7 = vpack.c.bf16 %v69_v4, %v68_v2  ;;  %419 = vmatprep.mubr.msk.f32.mxu0 %vm70_vm0, %v50_v5  ;;  %v59_v9 = vld [vmem:[%s603_s0 + $0x48] sm:$0xff]  ;;  %v52_v10 = vld [vmem:[%s603_s0 + $0x10] sm:$0xff] }
   0x4   :  { %431 = vmatprep.mubr.msk.f32.mxu1 %vm70_vm0, %v58_v6  ;;  %444 = vmatprep.subr.bf16.mxu0 %v443_v3  ;;  %v60_v11 = vld [vmem:[%s603_s0 + $0x50] sm:$0xff]  ;;  %v53_v12 = vld [vmem:[%s603_s0 + $0x18] sm:$0xff]  ;;  %v54_v14 = vld [vmem:[%s603_s0 + $0x20] sm:$0xff] }
   0x5   :  { %451 = vmatprep.subr.bf16.mxu1 %v443_v3  ;;  %446 = vmatpush3.bf16.msra.mxu0 %v443_v3  ;;  %v61_v13 = vld [vmem:[%s603_s0 + $0x58] sm:$0xff]  ;;  %v62_v15 = vld [vmem:[%s603_s0 + $0x60] sm:$0xff]  ;;  %v55_v16 = vld [vmem:[%s603_s0 + $0x28] sm:$0xff] }
   0x6   :  { %453 = vmatpush3.bf16.msra.mxu1 %v443_v3  ;;  %448 = vmatprep.subr.bf16.mxu0 %v447_v7  ;;  %v63_v17 = vld [vmem:[%s603_s0 + $0x68] sm:$0xff]  ;;  %v56_v18 = vld [vmem:[%s603_s0 + $0x30] sm:$0xff]  ;;  %v57_v20 = vld [vmem:[%s603_s0 + $0x38] sm:$0xff] }
   0x7   :  { %452 = vmatprep.subr.bf16.mxu1 %v447_v7  ;;  %v64_v19 = vld [vmem:[%s603_s0 + $0x70] sm:$0xff]  ;;  %v65_v21 = vld [vmem:[%s603_s0 + $0x78] sm:$0xff]  ;;  %v390_v22 = vld [vmem:[%s604_s2] ss:$0 sm:$0xff] }
   0x9   :  { %450 = vmatpush3.bf16.msra.mxu0 %v447_v7 }
   0xa   :  { %454 = vmatpush3.bf16.msra.mxu1 %v447_v7 }
   0xc   :  { %420 = vmatmul.mubr.msk.f32.vlgmr.msra.gmra.mrb[0].mxu0 %vm70_vm0, %v51_v8 }
   0xd   :  { %432 = vmatmul.mubr.msk.f32.vlgmr.msra.gmra.mrb[0].mxu1 %vm70_vm0, %v59_v9  ;;  %422 = vmatprep.mubr.msk.f32.mxu0 %vm70_vm0, %v52_v10 }
   0xe   :  { %434 = vmatprep.mubr.msk.f32.mxu1 %vm70_vm0, %v60_v11 }
  0x10   :  { %423 = vmatmul.mubr.msk.f32.gmra.mrb[2].mxu0 %vm70_vm0, %v53_v12 }
  0x11   :  { %435 = vmatmul.mubr.msk.f32.gmra.mrb[2].mxu1 %vm70_vm0, %v61_v13  ;;  %425 = vmatprep.mubr.msk.f32.mxu0 %vm70_vm0, %v54_v14 }
  0x12   :  { %437 = vmatprep.mubr.msk.f32.mxu1 %vm70_vm0, %v62_v15 }
  0x14   :  { %426 = vmatmul.mubr.msk.f32.gmra.mrb[4].mxu0 %vm70_vm0, %v55_v16 }
  0x15   :  { %438 = vmatmul.mubr.msk.f32.gmra.mrb[4].mxu1 %vm70_vm0, %v63_v17  ;;  %428 = vmatprep.mubr.msk.f32.mxu0 %vm70_vm0, %v56_v18 }
  0x16   :  { %440 = vmatprep.mubr.msk.f32.mxu1 %vm70_vm0, %v64_v19 }
  0x18   :  { %429 = vmatmul.mubr.msk.f32.gmra.mrb[6].mxu0 %vm70_vm0, %v57_v20 }
  0x19   :  { %441 = vmatmul.mubr.msk.f32.gmra.mrb[6].mxu1 %vm70_vm0, %v65_v21 }
  0xdf   :  { %v421_v23 = vpop.f32.mrb[0].mxu0 }
  0xe0   :  { %v433_v24 = vpop.f32.mrb[0].mxu1  ;;  %v323_v25 = vadd.f32 %v421_v23, %v390_v22  ;;  %v185_v27 = vpop.f32.mrb[1].mxu0 }
  0xe1   :  { %v331_v26 = vadd.f32 %v433_v24, %v390_v22  ;;  %v225_v28 = vpop.f32.mrb[1].mxu1  ;;  %v322_v29 = vadd.f32 %v390_v22, %v185_v27 }
  0xe2   :  { %v330_v30 = vadd.f32 %v390_v22, %v225_v28  ;;  %v339_v31 = vmax.f32 %v323_v25, 0.0 }
  0xe3   :  { %v347_v32 = vmax.f32 %v331_v26, 0.0  ;;  %v338_v33 = vmax.f32 %v322_v29, 0.0  ;;  %v424_v35 = vpop.f32.mrb[2].mxu0 }
  0xe4   :  { %v346_v34 = vmax.f32 %v330_v30, 0.0  ;;  %v436_v36 = vpop.f32.mrb[2].mxu1  ;;  %355 = vst [vmem:[%s605_s3 + $0x8] sm:$0xff] %v339_v31  ;;  %v325_v37 = vadd.f32 %v424_v35, %v390_v22  ;;  %v195_v39 = vpop.f32.mrb[3].mxu0 }
  0xe5   :  { %363 = vst [vmem:[%s605_s3 + $0x48] sm:$0xff] %v347_v32  ;;  %v333_v38 = vadd.f32 %v436_v36, %v390_v22  ;;  %v235_v40 = vpop.f32.mrb[3].mxu1  ;;  %354 = vst [vmem:[%s605_s3] sm:$0xff] %v338_v33  ;;  %v324_v41 = vadd.f32 %v390_v22, %v195_v39 }
  0xe6   :  { %362 = vst [vmem:[%s605_s3 + $0x40] sm:$0xff] %v346_v34  ;;  %v332_v42 = vadd.f32 %v390_v22, %v235_v40  ;;  %v341_v43 = vmax.f32 %v325_v37, 0.0 }
  0xe7   :  { %v349_v44 = vmax.f32 %v333_v38, 0.0  ;;  %v340_v45 = vmax.f32 %v324_v41, 0.0  ;;  %v427_v47 = vpop.f32.mrb[4].mxu0 }
  0xe8   :  { %v348_v46 = vmax.f32 %v332_v42, 0.0  ;;  %v439_v48 = vpop.f32.mrb[4].mxu1  ;;  %357 = vst [vmem:[%s605_s3 + $0x18] sm:$0xff] %v341_v43  ;;  %v327_v49 = vadd.f32 %v427_v47, %v390_v22  ;;  %v205_v51 = vpop.f32.mrb[5].mxu0 }
  0xe9   :  { %365 = vst [vmem:[%s605_s3 + $0x58] sm:$0xff] %v349_v44  ;;  %v335_v50 = vadd.f32 %v439_v48, %v390_v22  ;;  %v245_v52 = vpop.f32.mrb[5].mxu1  ;;  %356 = vst [vmem:[%s605_s3 + $0x10] sm:$0xff] %v340_v45  ;;  %v326_v53 = vadd.f32 %v390_v22, %v205_v51 }
  0xea   :  { %364 = vst [vmem:[%s605_s3 + $0x50] sm:$0xff] %v348_v46  ;;  %v334_v54 = vadd.f32 %v390_v22, %v245_v52  ;;  %v343_v55 = vmax.f32 %v327_v49, 0.0 }
  0xeb   :  { %v351_v56 = vmax.f32 %v335_v50, 0.0  ;;  %v342_v57 = vmax.f32 %v326_v53, 0.0  ;;  %v430_v59 = vpop.f32.mrb[6].mxu0 }
  0xec   :  { %v350_v58 = vmax.f32 %v334_v54, 0.0  ;;  %v442_v60 = vpop.f32.mrb[6].mxu1  ;;  %359 = vst [vmem:[%s605_s3 + $0x28] sm:$0xff] %v343_v55  ;;  %v329_v61 = vadd.f32 %v430_v59, %v390_v22  ;;  %v215_v63 = vpop.f32.mrb[7].mxu0 }
  0xed   :  { %367 = vst [vmem:[%s605_s3 + $0x68] sm:$0xff] %v351_v56  ;;  %v337_v62 = vadd.f32 %v442_v60, %v390_v22  ;;  %v255_v0 = vpop.f32.mrb[7].mxu1  ;;  %358 = vst [vmem:[%s605_s3 + $0x20] sm:$0xff] %v342_v57  ;;  %v328_v1 = vadd.f32 %v390_v22, %v215_v63 }
  0xee   :  { %366 = vst [vmem:[%s605_s3 + $0x60] sm:$0xff] %v350_v58  ;;  %v336_v2 = vadd.f32 %v390_v22, %v255_v0  ;;  %v345_v3 = vmax.f32 %v329_v61, 0.0 }
  0xef   :  { %v353_v4 = vmax.f32 %v337_v62, 0.0  ;;  %v344_v5 = vmax.f32 %v328_v1, 0.0 }
  0xf0   :  { %v352_v6 = vmax.f32 %v336_v2, 0.0  ;;  %361 = vst [vmem:[%s605_s3 + $0x38] sm:$0xff] %v345_v3 }
  0xf1   :  { %369 = vst [vmem:[%s605_s3 + $0x78] sm:$0xff] %v353_v4  ;;  %360 = vst [vmem:[%s605_s3 + $0x30] sm:$0xff] %v344_v5 }
  0xf2   :  { %368 = vst [vmem:[%s605_s3 + $0x70] sm:$0xff] %v352_v6 }

// kernel: _lambda_.27
= control target key start
LH: loop header
LB: loop body
LE: loop exit
PB: predicated region body
PF: predicated region fallthrough
CT: control target
= control target key end

     0   :  { %vm71_vm0 = vcmask 64512   ;;  %s684_s0 = inlined_call_operand.vmem [shape: f32[128,8], index: 0, kind: input, shape index: {}]   ;;  %s685_s1 = inlined_call_operand.vmem [shape: f32[8,128], index: 1, kind: input, shape index: {}]   ;;  %s686_s2 = inlined_call_operand.vmem [shape: f32[1,128], index: 2, kind: input, shape index: {}]   ;;  %s687_s3 = inlined_call_operand.vmem [shape: f32[128,128], index: 3, kind: input, shape index: {}]   ;;  %s688_s4 = inlined_call_operand.hbm [shape: f32[128,128], index: 4, kind: output, shape index: {}]  }
   0x1   :  { %v70_v0 = vld [vmem:[%s685_s1] sm:$0xff]  ;;  %v55_v3 = vld [vmem:[%s684_s0 + $0x8] sm:$0xff]  ;;  %v56_v5 = vld [vmem:[%s684_s0 + $0x10] sm:$0xff] }
   0x2   :  { %v54_v1 = vld [vmem:[%s684_s0] sm:$0xff]  ;;  %453 = vmatprep.subr.mxu0 %v70_v0  ;;  %479 = vmatprep.subr.mxu1 %v70_v0  ;;  %v63_v4 = vld [vmem:[%s684_s0 + $0x48] sm:$0xff]  ;;  %v64_v6 = vld [vmem:[%s684_s0 + $0x50] sm:$0xff] }
   0x3   :  { %v62_v2 = vld [vmem:[%s684_s0 + $0x40] sm:$0xff]  ;;  %454 = vmatpush3.msra.mxu0 %v70_v0  ;;  %480 = vmatpush3.msra.mxu1 %v70_v0  ;;  %v57_v7 = vld [vmem:[%s684_s0 + $0x18] sm:$0xff] }
   0x4   :  { %455 = vmatprep.mubr.msk.f32.mxu0 %vm71_vm0, %v54_v1  ;;  %467 = vmatprep.mubr.msk.f32.mxu1 %vm71_vm0, %v62_v2  ;;  %v65_v8 = vld [vmem:[%s684_s0 + $0x58] sm:$0xff] }
   0x5   :  { %456 = vmatmul.mubr.msk.f32.vlgmr.msra.gmra.mrb[0].mxu0 %vm71_vm0, %v55_v3  ;;  %468 = vmatmul.mubr.msk.f32.vlgmr.msra.gmra.mrb[0].mxu1 %vm71_vm0, %v63_v4 }
   0x6   :  { %458 = vmatprep.mubr.msk.f32.mxu0 %vm71_vm0, %v56_v5  ;;  %470 = vmatprep.mubr.msk.f32.mxu1 %vm71_vm0, %v64_v6 }
   0x7   :  { %9 = vsyncpa [#allocation4], 0  ;;  %v58_v9 = vld [vmem:[%s684_s0 + $0x20] sm:$0xff]  ;;  %v59_v11 = vld [vmem:[%s684_s0 + $0x28] sm:$0xff]  ;;  %s508_s26 = smov [#allocation3]  }
   0x8   :  { %v66_v10 = vld [vmem:[%s684_s0 + $0x60] sm:$0xff]  ;;  %v67_v12 = vld [vmem:[%s684_s0 + $0x68] sm:$0xff]  ;;  %v60_v13 = vld [vmem:[%s684_s0 + $0x30] sm:$0xff] }
   0x9   :  { %459 = vmatmul.mubr.msk.f32.gmra.mrb[2].mxu0 %vm71_vm0, %v57_v7  ;;  %471 = vmatmul.mubr.msk.f32.gmra.mrb[2].mxu1 %vm71_vm0, %v65_v8  ;;  %v68_v14 = vld [vmem:[%s684_s0 + $0x70] sm:$0xff]  ;;  %v61_v15 = vld [vmem:[%s684_s0 + $0x38] sm:$0xff]  ;;  %v606_v17 = vld [vmem:[%s686_s2] ss:$0 sm:$0xff] }
   0xa   :  { %461 = vmatprep.mubr.msk.f32.mxu0 %vm71_vm0, %v58_v9  ;;  %473 = vmatprep.mubr.msk.f32.mxu1 %vm71_vm0, %v66_v10  ;;  %v69_v16 = vld [vmem:[%s684_s0 + $0x78] sm:$0xff]  ;;  %v340_v19 = vld [vmem:[%s687_s3 + $0x8] sm:$0xff]  ;;  %v339_v25 = vld [vmem:[%s687_s3] sm:$0xff]  ;;  %s408_s0 = sshll.u32 %s508_s26, 4  ;;  %s409_s0 = int_to_ptr.vmem [resolvable:$true] %s408_s0 }
   0xb   :  { %v348_v21 = vld [vmem:[%s687_s3 + $0x48] sm:$0xff]  ;;  %v347_v27 = vld [vmem:[%s687_s3 + $0x40] sm:$0xff]  ;;  %v342_v35 = vld [vmem:[%s687_s3 + $0x18] sm:$0xff]  ;;  %p489_p1 = scmp.lt.s32.totalorder %s409_s0, %s409_s0 }
   0xc   :  { %v350_v37 = vld [vmem:[%s687_s3 + $0x58] sm:$0xff]  ;;  %v341_v43 = vld [vmem:[%s687_s3 + $0x10] sm:$0xff]  ;;  %v344_v55 = vld [vmem:[%s687_s3 + $0x28] sm:$0xff] }
   0xd   :  { %462 = vmatmul.mubr.msk.f32.gmra.mrb[4].mxu0 %vm71_vm0, %v59_v11  ;;  %474 = vmatmul.mubr.msk.f32.gmra.mrb[4].mxu1 %vm71_vm0, %v67_v12  ;;  %v349_v45 = vld [vmem:[%s687_s3 + $0x50] sm:$0xff]  ;;  %v352_v57 = vld [vmem:[%s687_s3 + $0x68] sm:$0xff]  ;;  %v343_v63 = vld [vmem:[%s687_s3 + $0x20] sm:$0xff] }
   0xe   :  { %464 = vmatprep.mubr.msk.f32.mxu0 %vm71_vm0, %v60_v13  ;;  %476 = vmatprep.mubr.msk.f32.mxu1 %vm71_vm0, %v68_v14  ;;  %v351_v1 = vld [vmem:[%s687_s3 + $0x60] sm:$0xff]  ;;  %v346_v11 = vld [vmem:[%s687_s3 + $0x38] sm:$0xff] }
   0xf   :  { %v354_v13 = vld [vmem:[%s687_s3 + $0x78] sm:$0xff] }
  0x11   :  { %465 = vmatmul.mubr.msk.f32.gmra.mrb[6].mxu0 %vm71_vm0, %v61_v15  ;;  %477 = vmatmul.mubr.msk.f32.gmra.mrb[6].mxu1 %vm71_vm0, %v69_v16 }
  0xd8   :  { %v457_v18 = vpop.f32.mrb[0].mxu0  ;;  %v469_v20 = vpop.f32.mrb[0].mxu1 }
  0xd9   :  { %v324_v22 = vadd.f32 %v457_v18, %v606_v17  ;;  %v332_v23 = vadd.f32 %v469_v20, %v606_v17  ;;  %v186_v24 = vpop.f32.mrb[1].mxu0  ;;  %v226_v26 = vpop.f32.mrb[1].mxu1  ;;  %v345_v20 = vld [vmem:[%s687_s3 + $0x30] sm:$0xff] }
  0xda   :  { %v323_v28 = vadd.f32 %v606_v17, %v186_v24  ;;  %v331_v29 = vadd.f32 %v606_v17, %v226_v26 }
  0xdb   :  { %v356_v30 = vadd.f32 %v340_v19, %v324_v22  ;;  %v364_v31 = vadd.f32 %v348_v21, %v332_v23  ;;  %v353_v22 = vld [vmem:[%s687_s3 + $0x70] sm:$0xff]  ;;  %s484_s3 = scalar_lea.vmem %s409_s0, 2048 }
  0xdc   :  { %v355_v32 = vadd.f32 %v339_v25, %v323_v28  ;;  %v363_v33 = vadd.f32 %v347_v27, %v331_v29  ;;  %v460_v34 = vpop.f32.mrb[2].mxu0  ;;  %v472_v36 = vpop.f32.mrb[2].mxu1  ;;  %p485_p0 = scmp.ne.s32.totalorder %s409_s0, %s484_s3  ;;  %p490_p2 = scmp.lt.s32.totalorder %s484_s3, %s484_s3 }
  0xdd   :  { %v372_v38 = vmax.f32 %v356_v30, 0.0  ;;  %v380_v39 = vmax.f32 %v364_v31, 0.0  ;;  %v326_v40 = vadd.f32 %v460_v34, %v606_v17  ;;  %v334_v41 = vadd.f32 %v472_v36, %v606_v17  ;;  %v196_v42 = vpop.f32.mrb[3].mxu0  ;;  %v236_v44 = vpop.f32.mrb[3].mxu1 }
  0xde   :  { %v371_v46 = vmax.f32 %v355_v32, 0.0  ;;  %v379_v47 = vmax.f32 %v363_v33, 0.0  ;;  %v325_v48 = vadd.f32 %v606_v17, %v196_v42  ;;  %v333_v49 = vadd.f32 %v606_v17, %v236_v44  ;;  %p491_p3 = por %p490_p2, %p489_p1 }
  0xdf   :  { %388 = vst [vmem:[#allocation3 + $0x8] sm:$0xff] %v372_v38  ;;  %396 = vst [vmem:[#allocation3 + $0x48] sm:$0xff] %v380_v39  ;;  %v358_v50 = vadd.f32 %v342_v35, %v326_v40  ;;  %v366_v51 = vadd.f32 %v350_v37, %v334_v41 }
  0xe0   :  { %387 = vst [vmem:[#allocation3] sm:$0xff] %v371_v46  ;;  %395 = vst [vmem:[#allocation3 + $0x40] sm:$0xff] %v379_v47  ;;  %v357_v52 = vadd.f32 %v341_v43, %v325_v48  ;;  %v365_v53 = vadd.f32 %v349_v45, %v333_v49  ;;  %v463_v54 = vpop.f32.mrb[4].mxu0  ;;  %v475_v56 = vpop.f32.mrb[4].mxu1  ;;  %p492_p4 = pnand %p491_p3, %p485_p0 }
  0xe1   :  { %v374_v58 = vmax.f32 %v358_v50, 0.0  ;;  %v382_v59 = vmax.f32 %v366_v51, 0.0  ;;  %v328_v60 = vadd.f32 %v463_v54, %v606_v17  ;;  %v336_v61 = vadd.f32 %v475_v56, %v606_v17  ;;  %v206_v62 = vpop.f32.mrb[5].mxu0  ;;  %v246_v0 = vpop.f32.mrb[5].mxu1 }
  0xe2   :  { %v373_v2 = vmax.f32 %v357_v52, 0.0  ;;  %v381_v3 = vmax.f32 %v365_v53, 0.0  ;;  %v327_v4 = vadd.f32 %v606_v17, %v206_v62  ;;  %v335_v5 = vadd.f32 %v606_v17, %v246_v0 }
  0xe3   :  { %390 = vst [vmem:[#allocation3 + $0x18] sm:$0xff] %v374_v58  ;;  %398 = vst [vmem:[#allocation3 + $0x58] sm:$0xff] %v382_v59  ;;  %v360_v6 = vadd.f32 %v344_v55, %v328_v60  ;;  %v368_v7 = vadd.f32 %v352_v57, %v336_v61 }
  0xe4   :  { %389 = vst [vmem:[#allocation3 + $0x10] sm:$0xff] %v373_v2  ;;  %397 = vst [vmem:[#allocation3 + $0x50] sm:$0xff] %v381_v3  ;;  %v359_v8 = vadd.f32 %v343_v63, %v327_v4  ;;  %v367_v9 = vadd.f32 %v351_v1, %v335_v5  ;;  %v466_v10 = vpop.f32.mrb[6].mxu0  ;;  %v478_v12 = vpop.f32.mrb[6].mxu1 }
  0xe5   :  { %v376_v14 = vmax.f32 %v360_v6, 0.0  ;;  %v384_v15 = vmax.f32 %v368_v7, 0.0  ;;  %v330_v16 = vadd.f32 %v466_v10, %v606_v17  ;;  %v338_v18 = vadd.f32 %v478_v12, %v606_v17  ;;  %v216_v19 = vpop.f32.mrb[7].mxu0  ;;  %v256_v21 = vpop.f32.mrb[7].mxu1 }
  0xe6   :  { %v375_v23 = vmax.f32 %v359_v8, 0.0  ;;  %v383_v24 = vmax.f32 %v367_v9, 0.0  ;;  %v329_v25 = vadd.f32 %v606_v17, %v216_v19  ;;  %v337_v26 = vadd.f32 %v606_v17, %v256_v21 }
  0xe7   :  { %392 = vst [vmem:[#allocation3 + $0x28] sm:$0xff] %v376_v14  ;;  %400 = vst [vmem:[#allocation3 + $0x68] sm:$0xff] %v384_v15  ;;  %v362_v27 = vadd.f32 %v346_v11, %v330_v16  ;;  %v370_v28 = vadd.f32 %v354_v13, %v338_v18 }
  0xe8   :  { %391 = vst [vmem:[#allocation3 + $0x20] sm:$0xff] %v375_v23  ;;  %399 = vst [vmem:[#allocation3 + $0x60] sm:$0xff] %v383_v24  ;;  %v361_v29 = vadd.f32 %v345_v20, %v329_v25  ;;  %v369_v30 = vadd.f32 %v353_v22, %v337_v26 }
  0xe9   :  { %v378_v31 = vmax.f32 %v362_v27, 0.0  ;;  %v386_v32 = vmax.f32 %v370_v28, 0.0 }
  0xea   :  { %v377_v33 = vmax.f32 %v361_v29, 0.0  ;;  %v385_v34 = vmax.f32 %v369_v30, 0.0 }
  0xeb   :  { %394 = vst [vmem:[#allocation3 + $0x38] sm:$0xff] %v378_v31  ;;  %402 = vst [vmem:[#allocation3 + $0x78] sm:$0xff] %v386_v32 }
  0xec   :  { %393 = vst [vmem:[#allocation3 + $0x30] sm:$0xff] %v377_v33  ;;  %401 = vst [vmem:[#allocation3 + $0x70] sm:$0xff] %v385_v34 }
  0xed   :  { %495 = shalt.err (!%p492_p4)
}
  0xee   :  { %s496_s28 = scalar_lea.hbm %s688_s4, 2048 }
  0xef   :  { %p497_p5 = scmp.ne.s32.totalorder %s688_s4, %s496_s28  ;;  %p500_p6 = scmp.lt.u32.totalorder %s496_s28, %s688_s4 }
  0xf1   :  { %p502_p7 = pnand %p500_p6, %p497_p5 }
  0xf3   :  { %505 = shalt.err (!%p502_p7)
}
  0xf4   :  { %s509_s7 = smov 128   ;;  %s510_s8 = smov 8  }
  0xf5   :  { %414 = dma.vmem_to_hbm [thread:$0]  %s409_s0, 2048, %s688_s4, [#allocation4], %s509_s7, %s509_s7, %s510_s8  }
  0xf6   :  { %506 = dma.done.wait [#allocation4], 2048  }
  0xf7   :  { %507 = vsyncadd [#allocation4], 4294965248 }
  0xf8   :  { %418 = vsyncpa [#allocation4], 1 }

</bundles_post_ra>
